<compile_context>
chip_gen: v5e
topology: v5e:2x2
jax: 0.10.0
libtpu: 0.0.40
codegen_flags: <defaults>
</compile_context>

<pallas_src>
import functools

import numpy as np
import jax
import jax.numpy as jnp
from jax.experimental import pallas as pl
from jax.experimental.pallas import tpu as pltpu


def _round_up(x, m):
    return ((x + m - 1) // m) * m


# ---------------------------------------------------------------------------
# In-kernel helpers
# ---------------------------------------------------------------------------
def _mlp(x, w1, b1, w2, b2, w3, b3):
    x = jnp.maximum(jnp.dot(x, w1, preferred_element_type=jnp.float32) + b1, 0.0)
    x = jnp.maximum(jnp.dot(x, w2, preferred_element_type=jnp.float32) + b2, 0.0)
    return jnp.dot(x, w3, preferred_element_type=jnp.float32) + b3


def _lstm_from_gates(gates, c, dim):
    # PyTorch LSTM gate order: input, forget, cell(g), output.  All f32.
    i = jax.nn.sigmoid(gates[:, 0 * dim:1 * dim])
    f = jax.nn.sigmoid(gates[:, 1 * dim:2 * dim])
    g = jnp.tanh(gates[:, 2 * dim:3 * dim])
    o = jax.nn.sigmoid(gates[:, 3 * dim:4 * dim])
    c_new = f * c + i * g
    h_new = o * jnp.tanh(c_new)
    return h_new, c_new


# ---------------------------------------------------------------------------
# Pallas kernel: full NeuroSAT message-passing + vote head
# ---------------------------------------------------------------------------
def neurosat_kernel(adj_ref, adjT_ref, lh0_ref, ch0_ref,
                    lm_w1, lm_b1, lm_w2, lm_b2, lm_w3, lm_b3,
                    cm_w1, cm_b1, cm_w2, cm_b2, cm_w3, cm_b3,
                    cu_wih, cu_whh, cu_b,
                    lu_wih_a, lu_wih_b, lu_whh, lu_b,
                    lv_w1, lv_b1, lv_w2, lv_b2, lv_w3, lv_b3,
                    vote_ref, logits_ref,
                    lc_ref, ch_ref, cc_ref,
                    *, n_vars_pad, dim, n_rounds):
    n_lits = 2 * n_vars_pad
    n_clauses = adjT_ref.shape[0]

    adj = adj_ref[...]        # (n_lits, n_clauses)  bf16
    adj_t = adjT_ref[...]     # (n_clauses, n_lits)  bf16 (transpose hoisted)

    # Hoist all weight/bias loads out of the round loop.
    lm = (lm_w1[...], lm_b1[...], lm_w2[...], lm_b2[...], lm_w3[...], lm_b3[...])
    cm = (cm_w1[...], cm_b1[...], cm_w2[...], cm_b2[...], cm_w3[...], cm_b3[...])
    cuw = (cu_wih[...], cu_whh[...], cu_b[...])
    luw = (lu_wih_a[...], lu_wih_b[...], lu_whh[...], lu_b[...])

    # State init.  Lh (the logits) lives directly in logits_ref; Lc/Ch/Cc in
    # explicit VMEM scratch.
    logits_ref[...] = jnp.broadcast_to(lh0_ref[...], (n_lits, dim))
    lc_ref[...] = jnp.zeros_like(lc_ref)
    ch_ref[...] = jnp.broadcast_to(ch0_ref[...], (n_clauses, dim))
    cc_ref[...] = jnp.zeros_like(cc_ref)

    @pl.loop(0, n_rounds)
    def _(_r):
        lh = logits_ref[...]

        # literal -> clause messages
        l_pre = _mlp(lh, *lm)
        lc_msg = jnp.dot(adj_t, l_pre.astype(adj_t.dtype),
                         preferred_element_type=jnp.float32)
        c_gates = (jnp.dot(lc_msg, cuw[0], preferred_element_type=jnp.float32)
                   + jnp.dot(ch_ref[...], cuw[1], preferred_element_type=jnp.float32)
                   + cuw[2])
        ch_new, cc_new = _lstm_from_gates(c_gates, cc_ref[...], dim)
        ch_ref[...] = ch_new
        cc_ref[...] = cc_new

        # clause -> literal messages
        c_pre = _mlp(ch_new, *cm)
        cl_msg = jnp.dot(adj, c_pre.astype(adj.dtype),
                         preferred_element_type=jnp.float32)
        # flip(Lh, n_vars): swap positive/negative halves via sublane roll
        # (shift is a multiple of 8 because n_vars_pad % 8 == 0).
        flipped = pltpu.roll(lh, shift=n_vars_pad, axis=0)
        # Split-weight LSTM input: no (n_lits, 2*dim) concat temporary.
        l_gates = (jnp.dot(cl_msg, luw[0], preferred_element_type=jnp.float32)
                   + jnp.dot(flipped, luw[1], preferred_element_type=jnp.float32)
                   + jnp.dot(lh, luw[2], preferred_element_type=jnp.float32)
                   + luw[3])
        lh_new, lc_new = _lstm_from_gates(l_gates, lc_ref[...], dim)
        logits_ref[...] = lh_new
        lc_ref[...] = lc_new

    # Vote head.  lv_w3/lv_b3 are zero-padded (dim,128)/(1,128) so the output
    # store is lane-dense; only column 0 is the real vote.
    vote_ref[...] = _mlp(logits_ref[...], lv_w1[...], lv_b1[...],
                         lv_w2[...], lv_b2[...], lv_w3[...], lv_b3[...])


# ---------------------------------------------------------------------------
# Parameter init (deterministic, PyTorch-default-style uniform init)
# ---------------------------------------------------------------------------
def _linear_params(key, in_dim, out_dim):
    k1, k2 = jax.random.split(key)
    bound = 1.0 / float(np.sqrt(in_dim))
    w = jax.random.uniform(k1, (out_dim, in_dim), jnp.float32, -bound, bound)
    b = jax.random.uniform(k2, (out_dim,), jnp.float32, -bound, bound)
    return w, b


def _lstm_params(key, input_size, hidden):
    k1, k2, k3, k4 = jax.random.split(key, 4)
    bound = 1.0 / float(np.sqrt(hidden))
    w_ih = jax.random.uniform(k1, (4 * hidden, input_size), jnp.float32, -bound, bound)
    w_hh = jax.random.uniform(k2, (4 * hidden, hidden), jnp.float32, -bound, bound)
    b_ih = jax.random.uniform(k3, (4 * hidden,), jnp.float32, -bound, bound)
    b_hh = jax.random.uniform(k4, (4 * hidden,), jnp.float32, -bound, bound)
    return w_ih, w_hh, b_ih, b_hh


def init_params(key, dim):
    ks = jax.random.split(key, 11)
    p = {}
    p['L_init'] = _linear_params(ks[0], 1, dim)
    p['C_init'] = _linear_params(ks[1], 1, dim)
    p['L_msg'] = [_linear_params(ks[2], dim, dim),
                  _linear_params(ks[3], dim, dim),
                  _linear_params(ks[4], dim, dim)]
    p['C_msg'] = [_linear_params(ks[5], dim, dim),
                  _linear_params(ks[6], dim, dim),
                  _linear_params(ks[7], dim, dim)]
    p['L_update'] = _lstm_params(ks[8], 2 * dim, dim)   # input = [CL_msg, flip(Lh)]
    p['C_update'] = _lstm_params(ks[9], dim, dim)
    kv = jax.random.split(ks[10], 3)
    p['L_vote'] = [_linear_params(kv[0], dim, dim),
                   _linear_params(kv[1], dim, dim),
                   _linear_params(kv[2], dim, 1)]
    return p


# ---------------------------------------------------------------------------
# Wrapper (glue): padding, parameter plumbing, pallas_call, per-sample mean
# ---------------------------------------------------------------------------
def neurosat_forward(adj, n_vars_list, n_clauses_list, params, dim, n_rounds):
    n_vars = int(np.sum(n_vars_list))
    n_clauses = int(np.sum(n_clauses_list))

    # Pad to multiples of 8 sublanes (ideally 128 for very large problems) so
    # every per-round matmul/store sees aligned tiles.  Zero-padded adj rows /
    # cols keep padded literals/clauses completely decoupled from real ones.
    nv_pad = _round_up(max(n_vars, 8), 8)
    nc_pad = _round_up(max(n_clauses, 8), 8)
    nl_pad = 2 * nv_pad

    adj = jnp.asarray(adj, jnp.float32)
    adj_pad = jnp.zeros((nl_pad, nc_pad), jnp.float32)
    adj_pad = adj_pad.at[:n_vars, :n_clauses].set(adj[:n_vars])
    adj_pad = adj_pad.at[nv_pad:nv_pad + n_vars, :n_clauses].set(adj[n_vars:])
    # adj is 0/1 -> bf16 exact; halves VMEM footprint and runs the dominant
    # adj matmuls at full bf16 MXU rate on v6e/v7x.
    adj_bf = adj_pad.astype(jnp.bfloat16)
    adjT_bf = adj_pad.T.astype(jnp.bfloat16)    # transpose hoisted out of loop

    def lin_t(wb):
        w, b = wb
        return [w.T, b.reshape(1, -1)]

    # L_init / C_init applied to init_ts = ones(1): vec = W[:, 0] + b
    lw, lb = params['L_init']
    lh0 = (lw[:, 0] + lb).reshape(1, dim)
    cw, cb = params['C_init']
    ch0 = (cw[:, 0] + cb).reshape(1, dim)

    lm = [a for wb in params['L_msg'] for a in lin_t(wb)]
    cm = [a for wb in params['C_msg'] for a in lin_t(wb)]

    cu_wih, cu_whh, cu_bih, cu_bhh = params['C_update']
    lu_wih, lu_whh, lu_bih, lu_bhh = params['L_update']
    cu = [cu_wih.T, cu_whh.T, (cu_bih + cu_bhh).reshape(1, -1)]
    # Split L_update w_ih into the half that multiplies CL_msg and the half
    # that multiplies flip(Lh) -> no lane-axis concat inside the kernel.
    lu = [lu_wih[:, :dim].T, lu_wih[:, dim:].T, lu_whh.T,
          (lu_bih + lu_bhh).reshape(1, -1)]

    # L_vote: final (dim -> 1) layer zero-padded to (dim -> 128) so the vote
    # output store is lane-dense (column 0 real).
    lv12 = [a for wb in params['L_vote'][:2] for a in lin_t(wb)]
    w3, b3 = params['L_vote'][2]                      # (1, dim), (1,)
    w3_pad = jnp.zeros((dim, 128), jnp.float32).at[:, 0].set(w3[0])
    b3_pad = jnp.zeros((1, 128), jnp.float32).at[0, 0].set(b3[0])
    lv = lv12 + [w3_pad, b3_pad]

    inputs = [adj_bf, adjT_bf, lh0, ch0] + lm + cm + cu + lu + lv

    # Explicit scoped-VMEM budget (default scoped limits are well below
    # physical VMEM on v5e/v6e): everything resident + 2x headroom.
    vmem_bytes = (adj_bf.size + adjT_bf.size) * 2                       # bf16
    vmem_bytes += (2 * nl_pad * dim + 2 * nc_pad * dim) * 4             # states
    vmem_bytes += (nl_pad * 128 + nl_pad * dim) * 4                     # outputs
    vmem_bytes += sum(int(np.prod(x.shape)) * 4 for x in inputs[2:])    # weights
    vmem_limit = int(min(100 * 2**20, max(32 * 2**20, 2 * vmem_bytes + (8 << 20))))

    kernel = functools.partial(neurosat_kernel, n_vars_pad=nv_pad, dim=dim,
                               n_rounds=n_rounds)
    vote_full, logits_pad = pl.pallas_call(
        kernel,
        out_shape=(jax.ShapeDtypeStruct((nl_pad, 128), jnp.float32),
                   jax.ShapeDtypeStruct((nl_pad, dim), jnp.float32)),
        in_specs=[pl.BlockSpec(memory_space=pltpu.MemorySpace.VMEM)] * len(inputs),
        out_specs=(pl.BlockSpec(memory_space=pltpu.MemorySpace.VMEM),
                   pl.BlockSpec(memory_space=pltpu.MemorySpace.VMEM)),
        scratch_shapes=[pltpu.VMEM((nl_pad, dim), jnp.float32),   # Lc
                        pltpu.VMEM((nc_pad, dim), jnp.float32),   # Ch
                        pltpu.VMEM((nc_pad, dim), jnp.float32)],  # Cc
        compiler_params=pltpu.CompilerParams(vmem_limit_bytes=vmem_limit),
    )(*inputs)

    # Strip padding; restore original [pos literals; neg literals] row order.
    vote = jnp.concatenate([vote_full[:n_vars, 0:1],
                            vote_full[nv_pad:nv_pad + n_vars, 0:1]], axis=0)
    logits = jnp.concatenate([logits_pad[:n_vars, :],
                              logits_pad[nv_pad:nv_pad + n_vars, :]], axis=0)

    # vote_join = cat([vote[:nv], vote[nv:]], dim=1), per-sample mean
    # (variable-length split -> plain JAX glue).
    vote_join = jnp.concatenate([vote[:n_vars, :], vote[n_vars:, :]], axis=1)
    offs = np.cumsum([0] + list(n_vars_list))
    vote_mean = jnp.stack([jnp.mean(vote_join[offs[i]:offs[i + 1]])
                           for i in range(len(n_vars_list))])
    return vote_mean, vote, logits


# ---------------------------------------------------------------------------
# Main
# ---------------------------------------------------------------------------
if __name__ == "__main__":
    dim = 128          # module default
    n_rounds = 26      # module default
    n_vars_list = [4, 4]       # 2 problems, 4 vars each  -> 8 vars, 16 literals
    n_clauses_list = [8, 8]    # 8 clauses each           -> 16 clauses
    nv = sum(n_vars_list)
    nc = sum(n_clauses_list)

    key = jax.random.PRNGKey(0)
    kp, ka = jax.random.split(key)
    params = init_params(kp, dim)

    # Block-diagonal literal-clause adjacency mimicking NeuroSAT.collate_fn:
    # adj = cat([block_diag(pos), block_diag(neg)], dim=0)  -> (2*nv, nc)
    mask = np.zeros((2 * nv, nc), np.float32)
    vo = co = 0
    for v, c in zip(n_vars_list, n_clauses_list):
        mask[vo:vo + v, co:co + c] = 1.0
        mask[nv + vo:nv + vo + v, co:co + c] = 1.0
        vo += v
        co += c
    rnd = jax.random.uniform(ka, (2 * nv, nc))
    adj = (rnd < 0.4).astype(jnp.float32) * jnp.asarray(mask)

    vote_mean, vote, logits = neurosat_forward(
        adj, n_vars_list, n_clauses_list, params, dim, n_rounds)
    jax.block_until_ready((vote_mean, vote, logits))

    assert vote_mean.shape == (len(n_vars_list),)
    assert vote.shape == (2 * nv, 1)
    assert logits.shape == (2 * nv, dim)
    assert bool(jnp.all(jnp.isfinite(vote_mean)))
    assert bool(jnp.all(jnp.isfinite(vote)))
    assert bool(jnp.all(jnp.isfinite(logits)))
    print("KERNEL_OK")
</pallas_src>

<mosaic_0001>
module attributes {stable_mosaic.version = 11 : i64} {
  func.func @neurosat_kernel(%arg0: memref<16x16xbf16, #tpu.memory_space<vmem>>, %arg1: memref<16x16xbf16, #tpu.memory_space<vmem>>, %arg2: memref<1x128xf32, #tpu.memory_space<vmem>>, %arg3: memref<1x128xf32, #tpu.memory_space<vmem>>, %arg4: memref<128x128xf32, #tpu.memory_space<vmem>>, %arg5: memref<1x128xf32, #tpu.memory_space<vmem>>, %arg6: memref<128x128xf32, #tpu.memory_space<vmem>>, %arg7: memref<1x128xf32, #tpu.memory_space<vmem>>, %arg8: memref<128x128xf32, #tpu.memory_space<vmem>>, %arg9: memref<1x128xf32, #tpu.memory_space<vmem>>, %arg10: memref<128x128xf32, #tpu.memory_space<vmem>>, %arg11: memref<1x128xf32, #tpu.memory_space<vmem>>, %arg12: memref<128x128xf32, #tpu.memory_space<vmem>>, %arg13: memref<1x128xf32, #tpu.memory_space<vmem>>, %arg14: memref<128x128xf32, #tpu.memory_space<vmem>>, %arg15: memref<1x128xf32, #tpu.memory_space<vmem>>, %arg16: memref<128x512xf32, #tpu.memory_space<vmem>>, %arg17: memref<128x512xf32, #tpu.memory_space<vmem>>, %arg18: memref<1x512xf32, #tpu.memory_space<vmem>>, %arg19: memref<128x512xf32, #tpu.memory_space<vmem>>, %arg20: memref<128x512xf32, #tpu.memory_space<vmem>>, %arg21: memref<128x512xf32, #tpu.memory_space<vmem>>, %arg22: memref<1x512xf32, #tpu.memory_space<vmem>>, %arg23: memref<128x128xf32, #tpu.memory_space<vmem>>, %arg24: memref<1x128xf32, #tpu.memory_space<vmem>>, %arg25: memref<128x128xf32, #tpu.memory_space<vmem>>, %arg26: memref<1x128xf32, #tpu.memory_space<vmem>>, %arg27: memref<128x128xf32, #tpu.memory_space<vmem>>, %arg28: memref<1x128xf32, #tpu.memory_space<vmem>>, %arg29: memref<16x128xf32, #tpu.memory_space<vmem>>, %arg30: memref<16x128xf32, #tpu.memory_space<vmem>>, %arg31: memref<16x128xf32, #tpu.memory_space<vmem>>, %arg32: memref<16x128xf32, #tpu.memory_space<vmem>>, %arg33: memref<16x128xf32, #tpu.memory_space<vmem>>) attributes {dimension_semantics = [], scalar_prefetch = 0 : i64, scratch_operands = 3 : i64, tpu.core_type = #tpu.core_type<tc>} {
    %c0 = arith.constant 0 : index
    %c0_0 = arith.constant 0 : index
    %0 = vector.load %arg0[%c0, %c0_0] : memref<16x16xbf16, #tpu.memory_space<vmem>>, vector<16x16xbf16>
    %c0_1 = arith.constant 0 : index
    %c0_2 = arith.constant 0 : index
    %1 = vector.load %arg1[%c0_1, %c0_2] : memref<16x16xbf16, #tpu.memory_space<vmem>>, vector<16x16xbf16>
    %c0_3 = arith.constant 0 : index
    %c0_4 = arith.constant 0 : index
    %2 = vector.load %arg4[%c0_3, %c0_4] : memref<128x128xf32, #tpu.memory_space<vmem>>, vector<128x128xf32>
    %c0_5 = arith.constant 0 : index
    %c0_6 = arith.constant 0 : index
    %3 = vector.load %arg5[%c0_5, %c0_6] : memref<1x128xf32, #tpu.memory_space<vmem>>, vector<1x128xf32>
    %c0_7 = arith.constant 0 : index
    %c0_8 = arith.constant 0 : index
    %4 = vector.load %arg6[%c0_7, %c0_8] : memref<128x128xf32, #tpu.memory_space<vmem>>, vector<128x128xf32>
    %c0_9 = arith.constant 0 : index
    %c0_10 = arith.constant 0 : index
    %5 = vector.load %arg7[%c0_9, %c0_10] : memref<1x128xf32, #tpu.memory_space<vmem>>, vector<1x128xf32>
    %c0_11 = arith.constant 0 : index
    %c0_12 = arith.constant 0 : index
    %6 = vector.load %arg8[%c0_11, %c0_12] : memref<128x128xf32, #tpu.memory_space<vmem>>, vector<128x128xf32>
    %c0_13 = arith.constant 0 : index
    %c0_14 = arith.constant 0 : index
    %7 = vector.load %arg9[%c0_13, %c0_14] : memref<1x128xf32, #tpu.memory_space<vmem>>, vector<1x128xf32>
    %c0_15 = arith.constant 0 : index
    %c0_16 = arith.constant 0 : index
    %8 = vector.load %arg10[%c0_15, %c0_16] : memref<128x128xf32, #tpu.memory_space<vmem>>, vector<128x128xf32>
    %c0_17 = arith.constant 0 : index
    %c0_18 = arith.constant 0 : index
    %9 = vector.load %arg11[%c0_17, %c0_18] : memref<1x128xf32, #tpu.memory_space<vmem>>, vector<1x128xf32>
    %c0_19 = arith.constant 0 : index
    %c0_20 = arith.constant 0 : index
    %10 = vector.load %arg12[%c0_19, %c0_20] : memref<128x128xf32, #tpu.memory_space<vmem>>, vector<128x128xf32>
    %c0_21 = arith.constant 0 : index
    %c0_22 = arith.constant 0 : index
    %11 = vector.load %arg13[%c0_21, %c0_22] : memref<1x128xf32, #tpu.memory_space<vmem>>, vector<1x128xf32>
    %c0_23 = arith.constant 0 : index
    %c0_24 = arith.constant 0 : index
    %12 = vector.load %arg14[%c0_23, %c0_24] : memref<128x128xf32, #tpu.memory_space<vmem>>, vector<128x128xf32>
    %c0_25 = arith.constant 0 : index
    %c0_26 = arith.constant 0 : index
    %13 = vector.load %arg15[%c0_25, %c0_26] : memref<1x128xf32, #tpu.memory_space<vmem>>, vector<1x128xf32>
    %c0_27 = arith.constant 0 : index
    %c0_28 = arith.constant 0 : index
    %14 = vector.load %arg16[%c0_27, %c0_28] : memref<128x512xf32, #tpu.memory_space<vmem>>, vector<128x512xf32>
    %c0_29 = arith.constant 0 : index
    %c0_30 = arith.constant 0 : index
    %15 = vector.load %arg17[%c0_29, %c0_30] : memref<128x512xf32, #tpu.memory_space<vmem>>, vector<128x512xf32>
    %c0_31 = arith.constant 0 : index
    %c0_32 = arith.constant 0 : index
    %16 = vector.load %arg18[%c0_31, %c0_32] : memref<1x512xf32, #tpu.memory_space<vmem>>, vector<1x512xf32>
    %c0_33 = arith.constant 0 : index
    %c0_34 = arith.constant 0 : index
    %17 = vector.load %arg19[%c0_33, %c0_34] : memref<128x512xf32, #tpu.memory_space<vmem>>, vector<128x512xf32>
    %c0_35 = arith.constant 0 : index
    %c0_36 = arith.constant 0 : index
    %18 = vector.load %arg20[%c0_35, %c0_36] : memref<128x512xf32, #tpu.memory_space<vmem>>, vector<128x512xf32>
    %c0_37 = arith.constant 0 : index
    %c0_38 = arith.constant 0 : index
    %19 = vector.load %arg21[%c0_37, %c0_38] : memref<128x512xf32, #tpu.memory_space<vmem>>, vector<128x512xf32>
    %c0_39 = arith.constant 0 : index
    %c0_40 = arith.constant 0 : index
    %20 = vector.load %arg22[%c0_39, %c0_40] : memref<1x512xf32, #tpu.memory_space<vmem>>, vector<1x512xf32>
    %c0_41 = arith.constant 0 : index
    %c0_42 = arith.constant 0 : index
    %21 = vector.load %arg2[%c0_41, %c0_42] : memref<1x128xf32, #tpu.memory_space<vmem>>, vector<1x128xf32>
    %22 = vector.shape_cast %21 : vector<1x128xf32> to vector<1x128xf32>
    %23 = vector.broadcast %22 : vector<1x128xf32> to vector<16x128xf32>
    %c0_43 = arith.constant 0 : index
    %c0_44 = arith.constant 0 : index
    %24 = vector.load %arg30[%c0_43, %c0_44] : memref<16x128xf32, #tpu.memory_space<vmem>>, vector<16x128xf32>
    tpu.vector_store %arg30[%c0_43, %c0_44], %23 {strides = array<i32>} : memref<16x128xf32, #tpu.memory_space<vmem>>, vector<16x128xf32>,
    %cst = arith.constant 0.000000e+00 : f32
    %25 = vector.broadcast %cst : f32 to vector<16x128xf32>
    %c0_45 = arith.constant 0 : index
    %c0_46 = arith.constant 0 : index
    %26 = vector.load %arg31[%c0_45, %c0_46] : memref<16x128xf32, #tpu.memory_space<vmem>>, vector<16x128xf32>
    tpu.vector_store %arg31[%c0_45, %c0_46], %25 {strides = array<i32>} : memref<16x128xf32, #tpu.memory_space<vmem>>, vector<16x128xf32>,
    %c0_47 = arith.constant 0 : index
    %c0_48 = arith.constant 0 : index
    %27 = vector.load %arg3[%c0_47, %c0_48] : memref<1x128xf32, #tpu.memory_space<vmem>>, vector<1x128xf32>
    %28 = vector.shape_cast %27 : vector<1x128xf32> to vector<1x128xf32>
    %29 = vector.broadcast %28 : vector<1x128xf32> to vector<16x128xf32>
    %c0_49 = arith.constant 0 : index
    %c0_50 = arith.constant 0 : index
    %30 = vector.load %arg32[%c0_49, %c0_50] : memref<16x128xf32, #tpu.memory_space<vmem>>, vector<16x128xf32>
    tpu.vector_store %arg32[%c0_49, %c0_50], %29 {strides = array<i32>} : memref<16x128xf32, #tpu.memory_space<vmem>>, vector<16x128xf32>,
    %cst_51 = arith.constant 0.000000e+00 : f32
    %31 = vector.broadcast %cst_51 : f32 to vector<16x128xf32>
    %c0_52 = arith.constant 0 : index
    %c0_53 = arith.constant 0 : index
    %32 = vector.load %arg33[%c0_52, %c0_53] : memref<16x128xf32, #tpu.memory_space<vmem>>, vector<16x128xf32>
    tpu.vector_store %arg33[%c0_52, %c0_53], %31 {strides = array<i32>} : memref<16x128xf32, #tpu.memory_space<vmem>>, vector<16x128xf32>,
    %c0_i32 = arith.constant 0 : i32
    %c26_i32 = arith.constant 26 : i32
    %33 = arith.addi %c0_i32, %c26_i32 : i32
    %c1_i32 = arith.constant 1 : i32
    scf.for %arg34 = %c0_i32 to %33 step %c1_i32  : i32 {
      %c0_75 = arith.constant 0 : index
      %c0_76 = arith.constant 0 : index
      %55 = vector.load %arg30[%c0_75, %c0_76] : memref<16x128xf32, #tpu.memory_space<vmem>>, vector<16x128xf32>
      %cst_77 = arith.constant dense<0.000000e+00> : vector<16x128xf32>
      %56 = tpu.matmul %55, %2, %cst_77 {dimension_numbers = #tpu.dot_dimension_numbers<[1], [0], [0], [1], [0, 0, 1, 1], [], []>} : vector<16x128xf32>, vector<128x128xf32>, vector<16x128xf32> -> vector<16x128xf32>
      %57 = vector.broadcast %3 : vector<1x128xf32> to vector<16x128xf32>
      %58 = arith.addf %56, %57 : vector<16x128xf32>
      %cst_78 = arith.constant 0.000000e+00 : f32
      %59 = vector.broadcast %cst_78 : f32 to vector<16x128xf32>
      %60 = arith.maximumf %58, %59 : vector<16x128xf32>
      %cst_79 = arith.constant dense<0.000000e+00> : vector<16x128xf32>
      %61 = tpu.matmul %60, %4, %cst_79 {dimension_numbers = #tpu.dot_dimension_numbers<[1], [0], [0], [1], [0, 0, 1, 1], [], []>} : vector<16x128xf32>, vector<128x128xf32>, vector<16x128xf32> -> vector<16x128xf32>
      %62 = vector.broadcast %5 : vector<1x128xf32> to vector<16x128xf32>
      %63 = arith.addf %61, %62 : vector<16x128xf32>
      %cst_80 = arith.constant 0.000000e+00 : f32
      %64 = vector.broadcast %cst_80 : f32 to vector<16x128xf32>
      %65 = arith.maximumf %63, %64 : vector<16x128xf32>
      %cst_81 = arith.constant dense<0.000000e+00> : vector<16x128xf32>
      %66 = tpu.matmul %65, %6, %cst_81 {dimension_numbers = #tpu.dot_dimension_numbers<[1], [0], [0], [1], [0, 0, 1, 1], [], []>} : vector<16x128xf32>, vector<128x128xf32>, vector<16x128xf32> -> vector<16x128xf32>
      %67 = vector.broadcast %7 : vector<1x128xf32> to vector<16x128xf32>
      %68 = arith.addf %66, %67 : vector<16x128xf32>
      %69 = arith.truncf %68 : vector<16x128xf32> to vector<16x128xbf16>
      %cst_82 = arith.constant dense<0.000000e+00> : vector<16x128xf32>
      %70 = tpu.matmul %1, %69, %cst_82 {dimension_numbers = #tpu.dot_dimension_numbers<[1], [0], [0], [1], [0, 0, 1, 1], [], []>} : vector<16x16xbf16>, vector<16x128xbf16>, vector<16x128xf32> -> vector<16x128xf32>
      %cst_83 = arith.constant dense<0.000000e+00> : vector<16x512xf32>
      %71 = tpu.matmul %70, %14, %cst_83 {dimension_numbers = #tpu.dot_dimension_numbers<[1], [0], [0], [1], [0, 0, 1, 1], [], []>} : vector<16x128xf32>, vector<128x512xf32>, vector<16x512xf32> -> vector<16x512xf32>
      %c0_84 = arith.constant 0 : index
      %c0_85 = arith.constant 0 : index
      %72 = vector.load %arg32[%c0_84, %c0_85] : memref<16x128xf32, #tpu.memory_space<vmem>>, vector<16x128xf32>
      %cst_86 = arith.constant dense<0.000000e+00> : vector<16x512xf32>
      %73 = tpu.matmul %72, %15, %cst_86 {dimension_numbers = #tpu.dot_dimension_numbers<[1], [0], [0], [1], [0, 0, 1, 1], [], []>} : vector<16x128xf32>, vector<128x512xf32>, vector<16x512xf32> -> vector<16x512xf32>
      %74 = arith.addf %71, %73 : vector<16x512xf32>
      %75 = vector.broadcast %16 : vector<1x512xf32> to vector<16x512xf32>
      %76 = arith.addf %74, %75 : vector<16x512xf32>
      %c0_87 = arith.constant 0 : index
      %c0_88 = arith.constant 0 : index
      %77 = vector.load %arg33[%c0_87, %c0_88] : memref<16x128xf32, #tpu.memory_space<vmem>>, vector<16x128xf32>
      %78 = vector.extract_strided_slice %76 {offsets = [0, 0], sizes = [16, 128], strides = [1, 1]} : vector<16x512xf32> to vector<16x128xf32>
      %79 = arith.negf %78 : vector<16x128xf32>
      %80 = math.exp %79 : vector<16x128xf32>
      %cst_89 = arith.constant 1.000000e+00 : f32
      %81 = vector.broadcast %cst_89 : f32 to vector<16x128xf32>
      %82 = arith.addf %81, %80 : vector<16x128xf32>
      %83 = arith.divf %81, %82 : vector<16x128xf32>
      %84 = vector.extract_strided_slice %76 {offsets = [0, 128], sizes = [16, 128], strides = [1, 1]} : vector<16x512xf32> to vector<16x128xf32>
      %85 = arith.negf %84 : vector<16x128xf32>
      %86 = math.exp %85 : vector<16x128xf32>
      %cst_90 = arith.constant 1.000000e+00 : f32
      %87 = vector.broadcast %cst_90 : f32 to vector<16x128xf32>
      %88 = arith.addf %87, %86 : vector<16x128xf32>
      %89 = arith.divf %87, %88 : vector<16x128xf32>
      %90 = vector.extract_strided_slice %76 {offsets = [0, 256], sizes = [16, 128], strides = [1, 1]} : vector<16x512xf32> to vector<16x128xf32>
      %91 = math.tanh %90 : vector<16x128xf32>
      %92 = vector.extract_strided_slice %76 {offsets = [0, 384], sizes = [16, 128], strides = [1, 1]} : vector<16x512xf32> to vector<16x128xf32>
      %93 = arith.negf %92 : vector<16x128xf32>
      %94 = math.exp %93 : vector<16x128xf32>
      %cst_91 = arith.constant 1.000000e+00 : f32
      %95 = vector.broadcast %cst_91 : f32 to vector<16x128xf32>
      %96 = arith.addf %95, %94 : vector<16x128xf32>
      %97 = arith.divf %95, %96 : vector<16x128xf32>
      %98 = arith.mulf %89, %77 : vector<16x128xf32>
      %99 = arith.mulf %83, %91 : vector<16x128xf32>
      %100 = arith.addf %98, %99 : vector<16x128xf32>
      %101 = math.tanh %100 : vector<16x128xf32>
      %102 = arith.mulf %97, %101 : vector<16x128xf32>
      %c0_92 = arith.constant 0 : index
      %c0_93 = arith.constant 0 : index
      %103 = vector.load %arg32[%c0_92, %c0_93] : memref<16x128xf32, #tpu.memory_space<vmem>>, vector<16x128xf32>
      tpu.vector_store %arg32[%c0_92, %c0_93], %102 {strides = array<i32>} : memref<16x128xf32, #tpu.memory_space<vmem>>, vector<16x128xf32>,
      %c0_94 = arith.constant 0 : index
      %c0_95 = arith.constant 0 : index
      %104 = vector.load %arg33[%c0_94, %c0_95] : memref<16x128xf32, #tpu.memory_space<vmem>>, vector<16x128xf32>
      tpu.vector_store %arg33[%c0_94, %c0_95], %100 {strides = array<i32>} : memref<16x128xf32, #tpu.memory_space<vmem>>, vector<16x128xf32>,
      %cst_96 = arith.constant dense<0.000000e+00> : vector<16x128xf32>
      %105 = tpu.matmul %102, %8, %cst_96 {dimension_numbers = #tpu.dot_dimension_numbers<[1], [0], [0], [1], [0, 0, 1, 1], [], []>} : vector<16x128xf32>, vector<128x128xf32>, vector<16x128xf32> -> vector<16x128xf32>
      %106 = vector.broadcast %9 : vector<1x128xf32> to vector<16x128xf32>
      %107 = arith.addf %105, %106 : vector<16x128xf32>
      %cst_97 = arith.constant 0.000000e+00 : f32
      %108 = vector.broadcast %cst_97 : f32 to vector<16x128xf32>
      %109 = arith.maximumf %107, %108 : vector<16x128xf32>
      %cst_98 = arith.constant dense<0.000000e+00> : vector<16x128xf32>
      %110 = tpu.matmul %109, %10, %cst_98 {dimension_numbers = #tpu.dot_dimension_numbers<[1], [0], [0], [1], [0, 0, 1, 1], [], []>} : vector<16x128xf32>, vector<128x128xf32>, vector<16x128xf32> -> vector<16x128xf32>
      %111 = vector.broadcast %11 : vector<1x128xf32> to vector<16x128xf32>
      %112 = arith.addf %110, %111 : vector<16x128xf32>
      %cst_99 = arith.constant 0.000000e+00 : f32
      %113 = vector.broadcast %cst_99 : f32 to vector<16x128xf32>
      %114 = arith.maximumf %112, %113 : vector<16x128xf32>
      %cst_100 = arith.constant dense<0.000000e+00> : vector<16x128xf32>
      %115 = tpu.matmul %114, %12, %cst_100 {dimension_numbers = #tpu.dot_dimension_numbers<[1], [0], [0], [1], [0, 0, 1, 1], [], []>} : vector<16x128xf32>, vector<128x128xf32>, vector<16x128xf32> -> vector<16x128xf32>
      %116 = vector.broadcast %13 : vector<1x128xf32> to vector<16x128xf32>
      %117 = arith.addf %115, %116 : vector<16x128xf32>
      %118 = arith.truncf %117 : vector<16x128xf32> to vector<16x128xbf16>
      %cst_101 = arith.constant dense<0.000000e+00> : vector<16x128xf32>
      %119 = tpu.matmul %0, %118, %cst_101 {dimension_numbers = #tpu.dot_dimension_numbers<[1], [0], [0], [1], [0, 0, 1, 1], [], []>} : vector<16x16xbf16>, vector<16x128xbf16>, vector<16x128xf32> -> vector<16x128xf32>
      %c8_i32 = arith.constant 8 : i32
      %120 = tpu.dynamic_rotate %55 by %c8_i32 dim 0 : vector<16x128xf32>, i32 -> vector<16x128xf32>
      %cst_102 = arith.constant dense<0.000000e+00> : vector<16x512xf32>
      %121 = tpu.matmul %119, %17, %cst_102 {dimension_numbers = #tpu.dot_dimension_numbers<[1], [0], [0], [1], [0, 0, 1, 1], [], []>} : vector<16x128xf32>, vector<128x512xf32>, vector<16x512xf32> -> vector<16x512xf32>
      %cst_103 = arith.constant dense<0.000000e+00> : vector<16x512xf32>
      %122 = tpu.matmul %120, %18, %cst_103 {dimension_numbers = #tpu.dot_dimension_numbers<[1], [0], [0], [1], [0, 0, 1, 1], [], []>} : vector<16x128xf32>, vector<128x512xf32>, vector<16x512xf32> -> vector<16x512xf32>
      %123 = arith.addf %121, %122 : vector<16x512xf32>
      %cst_104 = arith.constant dense<0.000000e+00> : vector<16x512xf32>
      %124 = tpu.matmul %55, %19, %cst_104 {dimension_numbers = #tpu.dot_dimension_numbers<[1], [0], [0], [1], [0, 0, 1, 1], [], []>} : vector<16x128xf32>, vector<128x512xf32>, vector<16x512xf32> -> vector<16x512xf32>
      %125 = arith.addf %123, %124 : vector<16x512xf32>
      %126 = vector.broadcast %20 : vector<1x512xf32> to vector<16x512xf32>
      %127 = arith.addf %125, %126 : vector<16x512xf32>
      %c0_105 = arith.constant 0 : index
      %c0_106 = arith.constant 0 : index
      %128 = vector.load %arg31[%c0_105, %c0_106] : memref<16x128xf32, #tpu.memory_space<vmem>>, vector<16x128xf32>
      %129 = vector.extract_strided_slice %127 {offsets = [0, 0], sizes = [16, 128], strides = [1, 1]} : vector<16x512xf32> to vector<16x128xf32>
      %130 = arith.negf %129 : vector<16x128xf32>
      %131 = math.exp %130 : vector<16x128xf32>
      %cst_107 = arith.constant 1.000000e+00 : f32
      %132 = vector.broadcast %cst_107 : f32 to vector<16x128xf32>
      %133 = arith.addf %132, %131 : vector<16x128xf32>
      %134 = arith.divf %132, %133 : vector<16x128xf32>
      %135 = vector.extract_strided_slice %127 {offsets = [0, 128], sizes = [16, 128], strides = [1, 1]} : vector<16x512xf32> to vector<16x128xf32>
      %136 = arith.negf %135 : vector<16x128xf32>
      %137 = math.exp %136 : vector<16x128xf32>
      %cst_108 = arith.constant 1.000000e+00 : f32
      %138 = vector.broadcast %cst_108 : f32 to vector<16x128xf32>
      %139 = arith.addf %138, %137 : vector<16x128xf32>
      %140 = arith.divf %138, %139 : vector<16x128xf32>
      %141 = vector.extract_strided_slice %127 {offsets = [0, 256], sizes = [16, 128], strides = [1, 1]} : vector<16x512xf32> to vector<16x128xf32>
      %142 = math.tanh %141 : vector<16x128xf32>
      %143 = vector.extract_strided_slice %127 {offsets = [0, 384], sizes = [16, 128], strides = [1, 1]} : vector<16x512xf32> to vector<16x128xf32>
      %144 = arith.negf %143 : vector<16x128xf32>
      %145 = math.exp %144 : vector<16x128xf32>
      %cst_109 = arith.constant 1.000000e+00 : f32
      %146 = vector.broadcast %cst_109 : f32 to vector<16x128xf32>
      %147 = arith.addf %146, %145 : vector<16x128xf32>
      %148 = arith.divf %146, %147 : vector<16x128xf32>
      %149 = arith.mulf %140, %128 : vector<16x128xf32>
      %150 = arith.mulf %134, %142 : vector<16x128xf32>
      %151 = arith.addf %149, %150 : vector<16x128xf32>
      %152 = math.tanh %151 : vector<16x128xf32>
      %153 = arith.mulf %148, %152 : vector<16x128xf32>
      %c0_110 = arith.constant 0 : index
      %c0_111 = arith.constant 0 : index
      %154 = vector.load %arg30[%c0_110, %c0_111] : memref<16x128xf32, #tpu.memory_space<vmem>>, vector<16x128xf32>
      tpu.vector_store %arg30[%c0_110, %c0_111], %153 {strides = array<i32>} : memref<16x128xf32, #tpu.memory_space<vmem>>, vector<16x128xf32>,
      %c0_112 = arith.constant 0 : index
      %c0_113 = arith.constant 0 : index
      %155 = vector.load %arg31[%c0_112, %c0_113] : memref<16x128xf32, #tpu.memory_space<vmem>>, vector<16x128xf32>
      tpu.vector_store %arg31[%c0_112, %c0_113], %151 {strides = array<i32>} : memref<16x128xf32, #tpu.memory_space<vmem>>, vector<16x128xf32>,
    }
    %c0_54 = arith.constant 0 : index
    %c0_55 = arith.constant 0 : index
    %34 = vector.load %arg30[%c0_54, %c0_55] : memref<16x128xf32, #tpu.memory_space<vmem>>, vector<16x128xf32>
    %c0_56 = arith.constant 0 : index
    %c0_57 = arith.constant 0 : index
    %35 = vector.load %arg23[%c0_56, %c0_57] : memref<128x128xf32, #tpu.memory_space<vmem>>, vector<128x128xf32>
    %c0_58 = arith.constant 0 : index
    %c0_59 = arith.constant 0 : index
    %36 = vector.load %arg24[%c0_58, %c0_59] : memref<1x128xf32, #tpu.memory_space<vmem>>, vector<1x128xf32>
    %c0_60 = arith.constant 0 : index
    %c0_61 = arith.constant 0 : index
    %37 = vector.load %arg25[%c0_60, %c0_61] : memref<128x128xf32, #tpu.memory_space<vmem>>, vector<128x128xf32>
    %c0_62 = arith.constant 0 : index
    %c0_63 = arith.constant 0 : index
    %38 = vector.load %arg26[%c0_62, %c0_63] : memref<1x128xf32, #tpu.memory_space<vmem>>, vector<1x128xf32>
    %c0_64 = arith.constant 0 : index
    %c0_65 = arith.constant 0 : index
    %39 = vector.load %arg27[%c0_64, %c0_65] : memref<128x128xf32, #tpu.memory_space<vmem>>, vector<128x128xf32>
    %c0_66 = arith.constant 0 : index
    %c0_67 = arith.constant 0 : index
    %40 = vector.load %arg28[%c0_66, %c0_67] : memref<1x128xf32, #tpu.memory_space<vmem>>, vector<1x128xf32>
    %cst_68 = arith.constant dense<0.000000e+00> : vector<16x128xf32>
    %41 = tpu.matmul %34, %35, %cst_68 {dimension_numbers = #tpu.dot_dimension_numbers<[1], [0], [0], [1], [0, 0, 1, 1], [], []>} : vector<16x128xf32>, vector<128x128xf32>, vector<16x128xf32> -> vector<16x128xf32>
    %42 = vector.broadcast %36 : vector<1x128xf32> to vector<16x128xf32>
    %43 = arith.addf %41, %42 : vector<16x128xf32>
    %cst_69 = arith.constant 0.000000e+00 : f32
    %44 = vector.broadcast %cst_69 : f32 to vector<16x128xf32>
    %45 = arith.maximumf %43, %44 : vector<16x128xf32>
    %cst_70 = arith.constant dense<0.000000e+00> : vector<16x128xf32>
    %46 = tpu.matmul %45, %37, %cst_70 {dimension_numbers = #tpu.dot_dimension_numbers<[1], [0], [0], [1], [0, 0, 1, 1], [], []>} : vector<16x128xf32>, vector<128x128xf32>, vector<16x128xf32> -> vector<16x128xf32>
    %47 = vector.broadcast %38 : vector<1x128xf32> to vector<16x128xf32>
    %48 = arith.addf %46, %47 : vector<16x128xf32>
    %cst_71 = arith.constant 0.000000e+00 : f32
    %49 = vector.broadcast %cst_71 : f32 to vector<16x128xf32>
    %50 = arith.maximumf %48, %49 : vector<16x128xf32>
    %cst_72 = arith.constant dense<0.000000e+00> : vector<16x128xf32>
    %51 = tpu.matmul %50, %39, %cst_72 {dimension_numbers = #tpu.dot_dimension_numbers<[1], [0], [0], [1], [0, 0, 1, 1], [], []>} : vector<16x128xf32>, vector<128x128xf32>, vector<16x128xf32> -> vector<16x128xf32>
    %52 = vector.broadcast %40 : vector<1x128xf32> to vector<16x128xf32>
    %53 = arith.addf %51, %52 : vector<16x128xf32>
    %c0_73 = arith.constant 0 : index
    %c0_74 = arith.constant 0 : index
    %54 = vector.load %arg29[%c0_73, %c0_74] : memref<16x128xf32, #tpu.memory_space<vmem>>, vector<16x128xf32>
    tpu.vector_store %arg29[%c0_73, %c0_74], %53 {strides = array<i32>} : memref<16x128xf32, #tpu.memory_space<vmem>>, vector<16x128xf32>,
    return
  }
}

</mosaic_0001>

<bundles_post_ra>
// kernel: tpu_custom_call.1
= control target key start
LH: loop header
LB: loop body
LE: loop exit
PB: predicated region body
PF: predicated region fallthrough
CT: control target
= control target key end

     0   :  { %s2875_s6 = smov 1   ;;  %s2876_s10 = smov 2   ;;  %s4727_s0 = inlined_call_operand.smem [shape: u32[31], index: -1, kind: input, shape index: {}] }
   0x1   :  { %s2943_s5 = sld [smem:[%s4727_s0]]   ;;  %s2877_s14 = smov 3  }
   0x2   :  { %s2948_s9 = sld [smem:[%s4727_s0 + %s2875_s6]]   ;;  %s2878_s18 = smov 4  }
   0x3   :  { %s2953_s13 = sld [smem:[%s4727_s0 + %s2876_s10]]   ;;  %s2879_s22 = smov 5  }
   0x4   :  { %s2958_s17 = sld [smem:[%s4727_s0 + %s2877_s14]]   ;;  %s2880_s26 = smov 6  }
   0x5   :  { %s2963_s21 = sld [smem:[%s4727_s0 + %s2878_s18]]   ;;  %s2881_s30 = smov 7  }
   0x6   :  { %s2968_s25 = sld [smem:[%s4727_s0 + %s2879_s22]]   ;;  %s2882_s4 = smov 8  }
   0x7   :  { %s2973_s29 = sld [smem:[%s4727_s0 + %s2880_s26]]   ;;  %s2883_s10 = smov 9  }
   0x8   :  { %s2978_s3 = sld [smem:[%s4727_s0 + %s2881_s30]]   ;;  %s2884_s15 = smov 10  }
   0x9   :  { %s2983_s8 = sld [smem:[%s4727_s0 + %s2882_s4]]   ;;  %s2885_s20 = smov 11  }
   0xa   :  { %s2988_s14 = sld [smem:[%s4727_s0 + %s2883_s10]]   ;;  %s2886_s26 = smov 12  }
   0xb   :  { %s2993_s19 = sld [smem:[%s4727_s0 + %s2884_s15]]   ;;  %s2887_s1 = smov 13  }
   0xc   :  { %s2998_s24 = sld [smem:[%s4727_s0 + %s2885_s20]]   ;;  %s2888_s7 = smov 14  }
   0xd   :  { %s3003_s30 = sld [smem:[%s4727_s0 + %s2886_s26]]   ;;  %s2889_s15 = smov 15  }
   0xe   :  { %s3008_s6 = sld [smem:[%s4727_s0 + %s2887_s1]]   ;;  %s2890_s22 = smov 16  }
   0xf   :  { %4764 = sst [smem:[#allocation54_spill]] %s2983_s8  ;;  %s2891_s28 = smov 17  }
  0x10   :  { %s3013_s12 = sld [smem:[%s4727_s0 + %s2888_s7]]   ;;  %s2892_s7 = smov 18  }
  0x11   :  { %4765 = sst [smem:[#allocation55_spill]] %s2993_s19 }
  0x12   :  { %4766 = sst [smem:[#allocation56_spill]] %s2998_s24 }
  0x13   :  { %s3018_s20 = sld [smem:[%s4727_s0 + %s2889_s15]]   ;;  %s2893_s15 = smov 19  }
  0x14   :  { %4767 = sst [smem:[#allocation57_spill]] %s3008_s6 }
  0x15   :  { %s3023_s27 = sld [smem:[%s4727_s0 + %s2890_s22]]   ;;  %s2894_s22 = smov 20  }
  0x16   :  { %4768 = sst [smem:[#allocation58_spill]] %s3013_s12 }
  0x17   :  { %s3028_s4 = sld [smem:[%s4727_s0 + %s2891_s28]]   ;;  %s2895_s28 = smov 21  }
  0x18   :  { %s3033_s6 = sld [smem:[%s4727_s0 + %s2892_s7]]   ;;  %s2896_s7 = smov 22  }
  0x19   :  { %4769 = sst [smem:[#allocation59_spill]] %s3018_s20 }
  0x1a   :  { %s3038_s20 = sld [smem:[%s4727_s0 + %s2893_s15]]   ;;  %s2897_s15 = smov 23  }
  0x1b   :  { %s3043_s24 = sld [smem:[%s4727_s0 + %s2894_s22]]   ;;  %s2898_s22 = smov 24  }
  0x1c   :  { %s3058_s12 = sld [smem:[%s4727_s0 + %s2897_s15]]   ;;  %s2901_s15 = smov 27  }
  0x1d   :  { %4770 = sst [smem:[#allocation60_spill]] %s3028_s4 }
  0x1e   :  { %4771 = sst [smem:[#allocation61_spill]] %s3033_s6 }
  0x1f   :  { %s3048_s4 = sld [smem:[%s4727_s0 + %s2895_s28]]   ;;  %s2899_s28 = smov 25  }
  0x20   :  { %s3053_s6 = sld [smem:[%s4727_s0 + %s2896_s7]]   ;;  %s2900_s7 = smov 26  }
  0x21   :  { %4772 = sst [smem:[#allocation62_spill]] %s3043_s24 }
  0x22   :  { %4774 = sst [smem:[#allocation64_spill]] %s3058_s12 }
  0x23   :  { %s3063_s24 = sld [smem:[%s4727_s0 + %s2898_s22]]   ;;  %s2902_s22 = smov 28  }
  0x24   :  { %s3068_s19 = sld [smem:[%s4727_s0 + %s2899_s28]]   ;;  %s2903_s28 = smov 29  }
  0x25   :  { %s3078_s12 = sld [smem:[%s4727_s0 + %s2901_s15]]  }
  0x26   :  { %4773 = sst [smem:[#allocation63_spill]] %s3053_s6 }
  0x27   :  { %s3073_s6 = sld [smem:[%s4727_s0 + %s2900_s7]]   ;;  %s2904_s7 = smov 30  }
  0x28   :  { %s3088_s8 = sld [smem:[%s4727_s0 + %s2903_s28]]  }
  0x29   :  { %4775 = sst [smem:[#allocation65_spill]] %s3063_s24 }
  0x2a   :  { %s3083_s24 = sld [smem:[%s4727_s0 + %s2902_s22]]  }
  0x2d   :  { %4776 = sst [smem:[#allocation66_spill]] %s3073_s6 }
  0x2e   :  { %s3093_s6 = sld [smem:[%s4727_s0 + %s2904_s7]]  }
  0x2f   :  { %67 = vsyncpa [#allocation6], 0 }
  0x30   :  { %68 = vsyncpa [#allocation9], 0 }
  0x31   :  { %69 = vsyncpa [#allocation12], 0 }
  0x32   :  { %70 = vsyncpa [#allocation15], 0 }
  0x33   :  { %71 = vsyncpa [#allocation18], 0 }
  0x34   :  { %72 = vsyncpa [#allocation21], 0 }
  0x35   :  { %73 = vsyncpa [#allocation24], 0 }
  0x36   :  { %74 = vsyncpa [#allocation27], 0 }
  0x37   :  { %75 = vsyncpa [#allocation30], 0 }
  0x38   :  { %76 = vsyncpa [#allocation33], 0 }
  0x39   :  { %77 = vsyncpa [#allocation36], 0 }
  0x3a   :  { %78 = vsyncpa [#allocation7], 0 }
  0x3b   :  { %79 = vsyncpa [#allocation40], 0  ;;  %s97_s15 = sshll.u32 %s2948_s9, 4  ;;  %s2905_s0 = smov [#allocation8]   ;;  %s98_s15 = int_to_ptr.hbm [resolvable:$true] %s97_s15 }
  0x3c   :  { %s99_s16 = sshll.u32 %s2905_s0, 4  ;;  %s122_s18 = sshll.u32 %s2958_s17, 4  ;;  %s100_s16 = int_to_ptr.vmem [resolvable:$true] %s99_s16  ;;  %s123_s18 = int_to_ptr.hbm [resolvable:$true] %s122_s18 }
  0x3d   :  { %s2289_s22 = sshra.s32 %s98_s15, 4  ;;  %s2293_s26 = scalar_lea.hbm %s2948_s9, 8  ;;  %s2290_s22 = int_to_ptr.hbm [resolvable:$true] %s2289_s22 }
  0x3e   :  { %s2291_s23 = scalar_lea.hbm %s2290_s22, 8  ;;  %p2294_p1 = scmp.lt.s32.totalorder %s2290_s22, %s2948_s9 }
  0x3f   :  { %p2292_p0 = scmp.ne.s32.totalorder %s2290_s22, %s2291_s23  ;;  %p2295_p2 = scmp.lt.s32.totalorder %s2293_s26, %s2291_s23 }
  0x41   :  { %p2296_p3 = por %p2295_p2, %p2294_p1 }
  0x43   :  { %p2297_p4 = pnand %p2296_p3, %p2292_p0 }
  0x45   :  { %2300 = shalt.err (!%p2297_p4)
}
  0x46   :  { %s2906_s28 = smov 64   ;;  %s2907_s1 = smov 4  }
  0x47   :  { %105 = dma.hbm_to_vmem [thread:$0]  %s98_s15, 128, %s100_s16, [#allocation9], %s2906_s28, %s2906_s28, %s2907_s1  }
  0x48   :  { %s2908_s2 = smov [#allocation11]   ;;  %s146_s10 = sshll.u32 %s2968_s25, 4  ;;  %s147_s10 = int_to_ptr.hbm [resolvable:$true] %s146_s10 }
  0x49   :  { %s124_s7 = sshll.u32 %s2908_s2, 4  ;;  %s2313_s9 = sshra.s32 %s123_s18, 4  ;;  %s125_s7 = int_to_ptr.vmem [resolvable:$true] %s124_s7  ;;  %s2314_s9 = int_to_ptr.hbm [resolvable:$true] %s2313_s9 }
  0x4a   :  { %s2315_s11 = scalar_lea.hbm %s2314_s9, 1  ;;  %s2317_s0 = scalar_lea.hbm %s2958_s17, 1 }
  0x4b   :  { %p2316_p5 = scmp.ne.s32.totalorder %s2314_s9, %s2315_s11  ;;  %p2318_p6 = scmp.lt.s32.totalorder %s2314_s9, %s2958_s17 }
  0x4c   :  { %p2319_p7 = scmp.lt.s32.totalorder %s2317_s0, %s2315_s11 }
  0x4e   :  { %p2320_p8 = por %p2319_p7, %p2318_p6 }
  0x50   :  { %p2321_p9 = pnand %p2320_p8, %p2316_p5 }
  0x52   :  { %2324 = shalt.err (!%p2321_p9)
}
  0x53   :  { %127 = dma.hbm_to_vmem [thread:$0]  %s123_s18, 16, %s125_s7, [#allocation12]  }
  0x54   :  { %s170_s15 = sshll.u32 %s2978_s3, 4  ;;  %s2909_s16 = smov [#allocation14]   ;;  %s171_s15 = int_to_ptr.hbm [resolvable:$true] %s170_s15 }
  0x55   :  { %s148_s22 = sshll.u32 %s2909_s16, 4  ;;  %s2337_s23 = sshra.s32 %s147_s10, 4  ;;  %s149_s22 = int_to_ptr.vmem [resolvable:$true] %s148_s22  ;;  %s2338_s23 = int_to_ptr.hbm [resolvable:$true] %s2337_s23 }
  0x56   :  { %s2339_s26 = scalar_lea.hbm %s2338_s23, 1  ;;  %s2341_s2 = scalar_lea.hbm %s2968_s25, 1 }
  0x57   :  { %p2340_p10 = scmp.ne.s32.totalorder %s2338_s23, %s2339_s26  ;;  %p2342_p11 = scmp.lt.s32.totalorder %s2338_s23, %s2968_s25 }
  0x58   :  { %p2343_p12 = scmp.lt.s32.totalorder %s2341_s2, %s2339_s26 }
  0x5a   :  { %p2344_p13 = por %p2343_p12, %p2342_p11 }
  0x5c   :  { %p2345_p0 = pnand %p2344_p13, %p2340_p10 }
  0x5e   :  { %2348 = shalt.err (!%p2345_p0)
}
  0x5f   :  { %151 = dma.hbm_to_vmem [thread:$0]  %s147_s10, 16, %s149_s22, [#allocation15]  }
  0x60   :  { %s2910_s17 = smov [#allocation17]   ;;  %s194_s7 = sshll.u32 %s2988_s14, 4  ;;  %s195_s7 = int_to_ptr.hbm [resolvable:$true] %s194_s7 }
  0x61   :  { %s172_s18 = sshll.u32 %s2910_s17, 4  ;;  %s2361_s9 = sshra.s32 %s171_s15, 4  ;;  %s173_s18 = int_to_ptr.vmem [resolvable:$true] %s172_s18  ;;  %s2362_s9 = int_to_ptr.hbm [resolvable:$true] %s2361_s9 }
  0x62   :  { %s2363_s11 = scalar_lea.hbm %s2362_s9, 1  ;;  %s2365_s0 = scalar_lea.hbm %s2978_s3, 1 }
  0x63   :  { %p2364_p1 = scmp.ne.s32.totalorder %s2362_s9, %s2363_s11  ;;  %p2366_p2 = scmp.lt.s32.totalorder %s2362_s9, %s2978_s3 }
  0x64   :  { %p2367_p3 = scmp.lt.s32.totalorder %s2365_s0, %s2363_s11 }
  0x66   :  { %p2368_p4 = por %p2367_p3, %p2366_p2 }
  0x68   :  { %p2369_p5 = pnand %p2368_p4, %p2364_p1 }
  0x6a   :  { %2372 = shalt.err (!%p2369_p5)
}
  0x6b   :  { %175 = dma.hbm_to_vmem [thread:$0]  %s171_s15, 16, %s173_s18, [#allocation18]  }
  0x6c   :  { %s2911_s25 = smov [#allocation20]   ;;  %s219_s16 = sshll.u32 %s3003_s30, 4  ;;  %s220_s16 = int_to_ptr.hbm [resolvable:$true] %s219_s16 }
  0x6d   :  { %s196_s10 = sshll.u32 %s2911_s25, 4  ;;  %s2385_s22 = sshra.s32 %s195_s7, 4  ;;  %s197_s10 = int_to_ptr.vmem [resolvable:$true] %s196_s10  ;;  %s2386_s22 = int_to_ptr.hbm [resolvable:$true] %s2385_s22 }
  0x6e   :  { %s2387_s23 = scalar_lea.hbm %s2386_s22, 1  ;;  %s2389_s26 = scalar_lea.hbm %s2988_s14, 1 }
  0x6f   :  { %p2388_p6 = scmp.ne.s32.totalorder %s2386_s22, %s2387_s23  ;;  %p2390_p7 = scmp.lt.s32.totalorder %s2386_s22, %s2988_s14 }
  0x70   :  { %p2391_p8 = scmp.lt.s32.totalorder %s2389_s26, %s2387_s23 }
  0x72   :  { %p2392_p9 = por %p2391_p8, %p2390_p7 }
  0x74   :  { %p2393_p10 = pnand %p2392_p9, %p2388_p6 }
  0x76   :  { %2396 = shalt.err (!%p2393_p10)
}
  0x77   :  { %199 = dma.hbm_to_vmem [thread:$0]  %s195_s7, 16, %s197_s10, [#allocation21]  }
  0x78   :  { %s2912_s3 = smov [#allocation23]   ;;  %s249_s2 = sshll.u32 %s3023_s27, 4  ;;  %s3115_s2 = int_to_ptr.hbm [resolvable:$true] %s249_s2 }
  0x79   :  { %s221_s15 = sshll.u32 %s2912_s3, 4  ;;  %s2409_s17 = sshra.s32 %s220_s16, 4  ;;  %s222_s15 = int_to_ptr.vmem [resolvable:$true] %s221_s15  ;;  %s2410_s17 = int_to_ptr.hbm [resolvable:$true] %s2409_s17 }
  0x7a   :  { %s2411_s18 = scalar_lea.hbm %s2410_s17, 128  ;;  %s2413_s14 = scalar_lea.hbm %s3003_s30, 128 }
  0x7b   :  { %p2412_p11 = scmp.ne.s32.totalorder %s2410_s17, %s2411_s18  ;;  %p2414_p12 = scmp.lt.s32.totalorder %s2410_s17, %s3003_s30 }
  0x7c   :  { %p2415_p13 = scmp.lt.s32.totalorder %s2413_s14, %s2411_s18 }
  0x7e   :  { %p2416_p0 = por %p2415_p13, %p2414_p12 }
  0x80   :  { %p2417_p1 = pnand %p2416_p0, %p2412_p11 }
  0x82   :  { %2420 = shalt.err (!%p2417_p1)
}
  0x83   :  { %s2913_s7 = smov 128   ;;  %s2914_s9 = smov 8  }
  0x84   :  { %227 = dma.hbm_to_vmem [thread:$0]  %s220_s16, 2048, %s222_s15, [#allocation24], %s2913_s7, %s2913_s7, %s2914_s9  }
  0x85   :  { %s2915_s11 = smov [#allocation26]   ;;  %s277_s25 = sshll.u32 %s3038_s20, 4  ;;  %s278_s25 = int_to_ptr.hbm [resolvable:$true] %s277_s25 }
  0x86   :  { %s251_s0 = sshll.u32 %s2915_s11, 4  ;;  %s2433_s10 = sshra.s32 %s3115_s2, 4  ;;  %s252_s0 = int_to_ptr.vmem [resolvable:$true] %s251_s0  ;;  %s2434_s10 = int_to_ptr.hbm [resolvable:$true] %s2433_s10 }
  0x87   :  { %s2435_s30 = scalar_lea.hbm %s2434_s10, 512  ;;  %s2437_s22 = scalar_lea.hbm %s3023_s27, 512 }
  0x88   :  { %p2436_p2 = scmp.ne.s32.totalorder %s2434_s10, %s2435_s30  ;;  %p2438_p3 = scmp.lt.s32.totalorder %s2434_s10, %s3023_s27 }
  0x89   :  { %p2439_p4 = scmp.lt.s32.totalorder %s2437_s22, %s2435_s30 }
  0x8b   :  { %p2440_p5 = por %p2439_p4, %p2438_p3 }
  0x8d   :  { %p2441_p6 = pnand %p2440_p5, %p2436_p2 }
  0x8f   :  { %2444 = shalt.err (!%p2441_p6)
}
  0x90   :  { %s2916_s23 = smov 512   ;;  %s2917_s16 = smov 32  }
  0x91   :  { %257 = dma.hbm_to_vmem [thread:$0]  %s3115_s2, 8192, %s252_s0, [#allocation27], %s2916_s23, %s2916_s23, %s2917_s16  }
  0x92   :  { %s2918_s26 = smov [#allocation29]   ;;  %s303_s15 = sshll.u32 %s3048_s4, 4  ;;  %s3131_s15 = int_to_ptr.hbm [resolvable:$true] %s303_s15 }
  0x93   :  { %s279_s3 = sshll.u32 %s2918_s26, 4  ;;  %s2457_s27 = sshra.s32 %s278_s25, 4  ;;  %s280_s3 = int_to_ptr.vmem [resolvable:$true] %s279_s3  ;;  %s2458_s27 = int_to_ptr.hbm [resolvable:$true] %s2457_s27 }
  0x94   :  { %s2459_s17 = scalar_lea.hbm %s2458_s27, 512  ;;  %s2461_s18 = scalar_lea.hbm %s3038_s20, 512 }
  0x95   :  { %p2460_p7 = scmp.ne.s32.totalorder %s2458_s27, %s2459_s17  ;;  %p2462_p8 = scmp.lt.s32.totalorder %s2458_s27, %s3038_s20 }
  0x96   :  { %p2463_p9 = scmp.lt.s32.totalorder %s2461_s18, %s2459_s17 }
  0x98   :  { %p2464_p10 = por %p2463_p9, %p2462_p8 }
  0x9a   :  { %p2465_p11 = pnand %p2464_p10, %p2460_p7 }
  0x9c   :  { %2468 = shalt.err (!%p2465_p11)
}
  0x9d   :  { %285 = dma.hbm_to_vmem [thread:$0]  %s278_s25, 8192, %s280_s3, [#allocation30], %s2916_s23, %s2916_s23, %s2917_s16  }
  0x9e   :  { %s333_s2 = sshll.u32 %s3068_s19, 4  ;;  %s2919_s14 = smov [#allocation32]   ;;  %s3139_s2 = int_to_ptr.hbm [resolvable:$true] %s333_s2 }
  0x9f   :  { %s305_s11 = sshll.u32 %s2919_s14, 4  ;;  %s2481_s0 = sshra.s32 %s3131_s15, 4  ;;  %s306_s11 = int_to_ptr.vmem [resolvable:$true] %s305_s11  ;;  %s2482_s0 = int_to_ptr.hbm [resolvable:$true] %s2481_s0 }
  0xa0   :  { %s2483_s20 = scalar_lea.hbm %s2482_s0, 512  ;;  %s2485_s10 = scalar_lea.hbm %s3048_s4, 512 }
  0xa1   :  { %p2484_p12 = scmp.ne.s32.totalorder %s2482_s0, %s2483_s20  ;;  %p2486_p13 = scmp.lt.s32.totalorder %s2482_s0, %s3048_s4 }
  0xa2   :  { %p2487_p0 = scmp.lt.s32.totalorder %s2485_s10, %s2483_s20 }
  0xa4   :  { %p2488_p1 = por %p2487_p0, %p2486_p13 }
  0xa6   :  { %p2489_p2 = pnand %p2488_p1, %p2484_p12 }
  0xa8   :  { %2492 = shalt.err (!%p2489_p2)
}
  0xa9   :  { %311 = dma.hbm_to_vmem [thread:$0]  %s3131_s15, 8192, %s306_s11, [#allocation33], %s2916_s23, %s2916_s23, %s2917_s16  }
  0xaa   :  { %s2920_s25 = smov [#allocation35]   ;;  %s84_s22 = sshll.u32 %s2943_s5, 4  ;;  %s3149_s22 = int_to_ptr.hbm [resolvable:$true] %s84_s22 }
  0xab   :  { %s335_s30 = sshll.u32 %s2920_s25, 4  ;;  %s2505_s4 = sshra.s32 %s3139_s2, 4  ;;  %s336_s30 = int_to_ptr.vmem [resolvable:$true] %s335_s30  ;;  %s2506_s4 = int_to_ptr.hbm [resolvable:$true] %s2505_s4 }
  0xac   :  { %s2507_s26 = scalar_lea.hbm %s2506_s4, 128  ;;  %s2509_s3 = scalar_lea.hbm %s3068_s19, 128 }
  0xad   :  { %p2508_p3 = scmp.ne.s32.totalorder %s2506_s4, %s2507_s26  ;;  %p2510_p4 = scmp.lt.s32.totalorder %s2506_s4, %s3068_s19 }
  0xae   :  { %p2511_p5 = scmp.lt.s32.totalorder %s2509_s3, %s2507_s26 }
  0xb0   :  { %p2512_p6 = por %p2511_p5, %p2510_p4 }
  0xb2   :  { %p2513_p7 = pnand %p2512_p6, %p2508_p3 }
  0xb4   :  { %2516 = shalt.err (!%p2513_p7)
}
  0xb5   :  { %341 = dma.hbm_to_vmem [thread:$0]  %s3139_s2, 2048, %s336_s30, [#allocation36], %s2913_s7, %s2913_s7, %s2914_s9  }
  0xb6   :  { %s111_s15 = sshll.u32 %s2953_s13, 4  ;;  %s2921_s27 = smov [#allocation5]   ;;  %s112_s15 = int_to_ptr.hbm [resolvable:$true] %s111_s15 }
  0xb7   :  { %s86_s17 = sshll.u32 %s2921_s27, 4  ;;  %s2529_s18 = sshra.s32 %s3149_s22, 4  ;;  %s87_s17 = int_to_ptr.vmem [resolvable:$true] %s86_s17  ;;  %s2530_s18 = int_to_ptr.hbm [resolvable:$true] %s2529_s18 }
  0xb8   :  { %s2531_s19 = scalar_lea.hbm %s2530_s18, 8  ;;  %s2533_s14 = scalar_lea.hbm %s2943_s5, 8 }
  0xb9   :  { %p2532_p8 = scmp.ne.s32.totalorder %s2530_s18, %s2531_s19  ;;  %p2534_p9 = scmp.lt.s32.totalorder %s2530_s18, %s2943_s5 }
  0xba   :  { %p2535_p10 = scmp.lt.s32.totalorder %s2533_s14, %s2531_s19 }
  0xbc   :  { %p2536_p11 = por %p2535_p10, %p2534_p9 }
  0xbe   :  { %p2537_p12 = pnand %p2536_p11, %p2532_p8 }
  0xc0   :  { %2540 = shalt.err (!%p2537_p12)
}
  0xc1   :  { %92 = dma.hbm_to_vmem [thread:$0]  %s3149_s22, 128, %s87_s17, [#allocation6], %s2906_s28, %s2906_s28, %s2907_s1  }
  0xc2   :  { %s2922_s2 = smov [#allocation10]   ;;  %s132_s0 = sshll.u32 %s2963_s21, 4  ;;  %s3167_s0 = int_to_ptr.hbm [resolvable:$true] %s132_s0 }
  0xc3   :  { %s113_s11 = sshll.u32 %s2922_s2, 4  ;;  %s2553_s20 = sshra.s32 %s112_s15, 4  ;;  %s114_s11 = int_to_ptr.vmem [resolvable:$true] %s113_s11  ;;  %s2554_s20 = int_to_ptr.hbm [resolvable:$true] %s2553_s20 }
  0xc4   :  { %s2555_s5 = scalar_lea.hbm %s2554_s20, 1  ;;  %s2557_s10 = scalar_lea.hbm %s2953_s13, 1 }
  0xc5   :  { %p2556_p13 = scmp.ne.s32.totalorder %s2554_s20, %s2555_s5  ;;  %p2558_p0 = scmp.lt.s32.totalorder %s2554_s20, %s2953_s13 }
  0xc6   :  { %p2559_p1 = scmp.lt.s32.totalorder %s2557_s10, %s2555_s5 }
  0xc8   :  { %p2560_p2 = por %p2559_p1, %p2558_p0 }
  0xca   :  { %p2561_p3 = pnand %p2560_p2, %p2556_p13 }
  0xcc   :  { %2564 = shalt.err (!%p2561_p3)
}
  0xcd   :  { %116 = dma.hbm_to_vmem [thread:$0]  %s112_s15, 16, %s114_s11, [#allocation9]  }
  0xce   :  { %s156_s28 = sshll.u32 %s2973_s29, 4  ;;  %s2923_s1 = smov [#allocation13]   ;;  %s3172_s28 = int_to_ptr.hbm [resolvable:$true] %s156_s28 }
  0xcf   :  { %s134_s25 = sshll.u32 %s2923_s1, 4  ;;  %s2577_s30 = sshra.s32 %s3167_s0, 4  ;;  %s135_s25 = int_to_ptr.vmem [resolvable:$true] %s134_s25  ;;  %s2578_s30 = int_to_ptr.hbm [resolvable:$true] %s2577_s30 }
  0xd0   :  { %s2579_s22 = scalar_lea.hbm %s2578_s30, 128  ;;  %s2581_s13 = scalar_lea.hbm %s2963_s21, 128 }
  0xd1   :  { %p2580_p4 = scmp.ne.s32.totalorder %s2578_s30, %s2579_s22  ;;  %p2582_p5 = scmp.lt.s32.totalorder %s2578_s30, %s2963_s21 }
  0xd2   :  { %p2583_p6 = scmp.lt.s32.totalorder %s2581_s13, %s2579_s22 }
  0xd4   :  { %p2584_p7 = por %p2583_p6, %p2582_p5 }
  0xd6   :  { %p2585_p8 = pnand %p2584_p7, %p2580_p4 }
  0xd8   :  { %2588 = shalt.err (!%p2585_p8)
}
  0xd9   :  { %s4777_s4 = sld [smem:[#allocation54_spill]]  ;;  %s2924_s26 = smov [#allocation16]  }
  0xda   :  { %140 = dma.hbm_to_vmem [thread:$0]  %s3167_s0, 2048, %s135_s25, [#allocation12], %s2913_s7, %s2913_s7, %s2914_s9  }
  0xdb   :  { %s158_s3 = sshll.u32 %s2924_s26, 4  ;;  %s2601_s21 = sshra.s32 %s3172_s28, 4  ;;  %s159_s3 = int_to_ptr.vmem [resolvable:$true] %s158_s3  ;;  %s2602_s21 = int_to_ptr.hbm [resolvable:$true] %s2601_s21 }
  0xdc   :  { %s2603_s27 = scalar_lea.hbm %s2602_s21, 128  ;;  %s2605_s17 = scalar_lea.hbm %s2973_s29, 128 }
  0xdd   :  { %p2604_p9 = scmp.ne.s32.totalorder %s2602_s21, %s2603_s27  ;;  %p2606_p10 = scmp.lt.s32.totalorder %s2602_s21, %s2973_s29 }
  0xde   :  { %p2607_p11 = scmp.lt.s32.totalorder %s2605_s17, %s2603_s27 }
  0xdf   :  { %s180_s15 = sshll.u32 %s4777_s4, 4  ;;  %s3182_s15 = int_to_ptr.hbm [resolvable:$true] %s180_s15 }
  0xe0   :  { %p2608_p12 = por %p2607_p11, %p2606_p10 }
  0xe2   :  { %p2609_p13 = pnand %p2608_p12, %p2604_p9 }
  0xe4   :  { %2612 = shalt.err (!%p2609_p13)
}
  0xe5   :  { %s4778_s18 = sld [smem:[#allocation55_spill]]  ;;  %s2925_s14 = smov [#allocation19]  }
  0xe6   :  { %164 = dma.hbm_to_vmem [thread:$0]  %s3172_s28, 2048, %s159_s3, [#allocation15], %s2913_s7, %s2913_s7, %s2914_s9  }
  0xe7   :  { %s182_s2 = sshll.u32 %s2925_s14, 4  ;;  %s2625_s29 = sshra.s32 %s3182_s15, 4  ;;  %s183_s2 = int_to_ptr.vmem [resolvable:$true] %s182_s2  ;;  %s2626_s29 = int_to_ptr.hbm [resolvable:$true] %s2625_s29 }
  0xe8   :  { %s2627_s11 = scalar_lea.hbm %s2626_s29, 128  ;;  %s2629_s0 = scalar_lea.hbm %s4777_s4, 128 }
  0xe9   :  { %p2628_p0 = scmp.ne.s32.totalorder %s2626_s29, %s2627_s11  ;;  %p2630_p1 = scmp.lt.s32.totalorder %s2626_s29, %s4777_s4 }
  0xea   :  { %p2631_p2 = scmp.lt.s32.totalorder %s2629_s0, %s2627_s11 }
  0xeb   :  { %s204_s19 = sshll.u32 %s4778_s18, 4  ;;  %s3192_s19 = int_to_ptr.hbm [resolvable:$true] %s204_s19 }
  0xec   :  { %p2632_p3 = por %p2631_p2, %p2630_p1 }
  0xee   :  { %p2633_p4 = pnand %p2632_p3, %p2628_p0 }
  0xf0   :  { %2636 = shalt.err (!%p2633_p4)
}
  0xf1   :  { %s4779_s20 = sld [smem:[#allocation58_spill]]  ;;  %s2926_s5 = smov [#allocation22]  }
  0xf2   :  { %188 = dma.hbm_to_vmem [thread:$0]  %s3182_s15, 2048, %s183_s2, [#allocation18], %s2913_s7, %s2913_s7, %s2914_s9  }
  0xf3   :  { %s206_s10 = sshll.u32 %s2926_s5, 4  ;;  %s2649_s1 = sshra.s32 %s3192_s19, 4  ;;  %s207_s10 = int_to_ptr.vmem [resolvable:$true] %s206_s10  ;;  %s2650_s1 = int_to_ptr.hbm [resolvable:$true] %s2649_s1 }
  0xf4   :  { %s2651_s25 = scalar_lea.hbm %s2650_s1, 128  ;;  %s2653_s30 = scalar_lea.hbm %s4778_s18, 128 }
  0xf5   :  { %p2652_p5 = scmp.ne.s32.totalorder %s2650_s1, %s2651_s25  ;;  %p2654_p6 = scmp.lt.s32.totalorder %s2650_s1, %s4778_s18 }
  0xf6   :  { %p2655_p7 = scmp.lt.s32.totalorder %s2653_s30, %s2651_s25 }
  0xf7   :  { %s234_s28 = sshll.u32 %s4779_s20, 4  ;;  %s3202_s28 = int_to_ptr.hbm [resolvable:$true] %s234_s28 }
  0xf8   :  { %p2656_p8 = por %p2655_p7, %p2654_p6 }
  0xfa   :  { %p2657_p9 = pnand %p2656_p8, %p2652_p5 }
  0xfc   :  { %2660 = shalt.err (!%p2657_p9)
}
  0xfd   :  { %s4780_s22 = sld [smem:[#allocation60_spill]]  ;;  %s2927_s4 = smov [#allocation25]  }
  0xfe   :  { %212 = dma.hbm_to_vmem [thread:$0]  %s3192_s19, 2048, %s207_s10, [#allocation21], %s2913_s7, %s2913_s7, %s2914_s9  }
  0xff   :  { %s236_s26 = sshll.u32 %s2927_s4, 4  ;;  %s2673_s3 = sshra.s32 %s3202_s28, 4  ;;  %s237_s26 = int_to_ptr.vmem [resolvable:$true] %s236_s26  ;;  %s2674_s3 = int_to_ptr.hbm [resolvable:$true] %s2673_s3 }
 0x100   :  { %s2675_s15 = scalar_lea.hbm %s2674_s3, 128  ;;  %s2677_s21 = scalar_lea.hbm %s4779_s20, 128 }
 0x101   :  { %p2676_p10 = scmp.ne.s32.totalorder %s2674_s3, %s2675_s15  ;;  %p2678_p11 = scmp.lt.s32.totalorder %s2674_s3, %s4779_s20 }
 0x102   :  { %p2679_p12 = scmp.lt.s32.totalorder %s2677_s21, %s2675_s15 }
 0x103   :  { %s262_s13 = sshll.u32 %s4780_s22, 4  ;;  %s3212_s13 = int_to_ptr.hbm [resolvable:$true] %s262_s13 }
 0x104   :  { %p2680_p13 = por %p2679_p12, %p2678_p11 }
 0x106   :  { %p2681_p0 = pnand %p2680_p13, %p2676_p10 }
 0x108   :  { %2684 = shalt.err (!%p2681_p0)
}
 0x109   :  { %s4781_s27 = sld [smem:[#allocation62_spill]]  ;;  %s2928_s17 = smov [#allocation28]  }
 0x10a   :  { %242 = dma.hbm_to_vmem [thread:$0]  %s3202_s28, 2048, %s237_s26, [#allocation24], %s2913_s7, %s2913_s7, %s2914_s9  }
 0x10b   :  { %s264_s18 = sshll.u32 %s2928_s17, 4  ;;  %s2697_s14 = sshra.s32 %s3212_s13, 4  ;;  %s265_s18 = int_to_ptr.vmem [resolvable:$true] %s264_s18  ;;  %s2698_s14 = int_to_ptr.hbm [resolvable:$true] %s2697_s14 }
 0x10c   :  { %s2699_s2 = scalar_lea.hbm %s2698_s14, 512  ;;  %s2701_s29 = scalar_lea.hbm %s4780_s22, 512 }
 0x10d   :  { %p2700_p1 = scmp.ne.s32.totalorder %s2698_s14, %s2699_s2  ;;  %p2702_p2 = scmp.lt.s32.totalorder %s2698_s14, %s4780_s22 }
 0x10e   :  { %p2703_p3 = scmp.lt.s32.totalorder %s2701_s29, %s2699_s2 }
 0x10f   :  { %s290_s19 = sshll.u32 %s4781_s27, 4  ;;  %s3222_s19 = int_to_ptr.hbm [resolvable:$true] %s290_s19 }
 0x110   :  { %p2704_p4 = por %p2703_p3, %p2702_p2 }
 0x112   :  { %p2705_p5 = pnand %p2704_p4, %p2700_p1 }
 0x114   :  { %2708 = shalt.err (!%p2705_p5)
}
 0x115   :  { %s4782_s11 = sld [smem:[#allocation64_spill]]  ;;  %s2929_s20 = smov [#allocation31]  }
 0x116   :  { %270 = dma.hbm_to_vmem [thread:$0]  %s3212_s13, 8192, %s265_s18, [#allocation27], %s2916_s23, %s2916_s23, %s2917_s16  }
 0x117   :  { %s292_s5 = sshll.u32 %s2929_s20, 4  ;;  %s2721_s10 = sshra.s32 %s3222_s19, 4  ;;  %s293_s5 = int_to_ptr.vmem [resolvable:$true] %s292_s5  ;;  %s2722_s10 = int_to_ptr.hbm [resolvable:$true] %s2721_s10 }
 0x118   :  { %s2723_s28 = scalar_lea.hbm %s2722_s10, 512  ;;  %s2725_s1 = scalar_lea.hbm %s4781_s27, 512 }
 0x119   :  { %p2724_p6 = scmp.ne.s32.totalorder %s2722_s10, %s2723_s28  ;;  %p2726_p7 = scmp.lt.s32.totalorder %s2722_s10, %s4781_s27 }
 0x11a   :  { %p2727_p8 = scmp.lt.s32.totalorder %s2725_s1, %s2723_s28 }
 0x11b   :  { %s318_s0 = sshll.u32 %s4782_s11, 4  ;;  %s3232_s0 = int_to_ptr.hbm [resolvable:$true] %s318_s0 }
 0x11c   :  { %p2728_p9 = por %p2727_p8, %p2726_p7 }
 0x11e   :  { %p2729_p10 = pnand %p2728_p9, %p2724_p6 }
 0x120   :  { %2732 = shalt.err (!%p2729_p10)
}
 0x121   :  { %298 = dma.hbm_to_vmem [thread:$0]  %s3222_s19, 8192, %s293_s5, [#allocation30], %s2916_s23, %s2916_s23, %s2917_s16  }
 0x122   :  { %s2930_s25 = smov [#allocation34]   ;;  %s348_s22 = sshll.u32 %s3078_s12, 4  ;;  %s349_s22 = int_to_ptr.hbm [resolvable:$true] %s348_s22 }
 0x123   :  { %s320_s30 = sshll.u32 %s2930_s25, 4  ;;  %s2745_s13 = sshra.s32 %s3232_s0, 4  ;;  %s321_s30 = int_to_ptr.vmem [resolvable:$true] %s320_s30  ;;  %s2746_s13 = int_to_ptr.hbm [resolvable:$true] %s2745_s13 }
 0x124   :  { %s2747_s4 = scalar_lea.hbm %s2746_s13, 128  ;;  %s2749_s26 = scalar_lea.hbm %s4782_s11, 128 }
 0x125   :  { %p2748_p11 = scmp.ne.s32.totalorder %s2746_s13, %s2747_s4  ;;  %p2750_p12 = scmp.lt.s32.totalorder %s2746_s13, %s4782_s11 }
 0x126   :  { %p2751_p13 = scmp.lt.s32.totalorder %s2749_s26, %s2747_s4 }
 0x128   :  { %p2752_p0 = por %p2751_p13, %p2750_p12 }
 0x12a   :  { %p2753_p1 = pnand %p2752_p0, %p2748_p11 }
 0x12c   :  { %2756 = shalt.err (!%p2753_p1)
}
 0x12d   :  { %326 = dma.hbm_to_vmem [thread:$0]  %s3232_s0, 2048, %s321_s30, [#allocation33], %s2913_s7, %s2913_s7, %s2914_s9  }
 0x12e   :  { %s2931_s23 = smov [#allocation37]   ;;  %s2769_s3 = sshra.s32 %s349_s22, 4  ;;  %s2770_s3 = int_to_ptr.hbm [resolvable:$true] %s2769_s3 }
 0x12f   :  { %s350_s16 = sshll.u32 %s2931_s23, 4  ;;  %s2771_s15 = scalar_lea.hbm %s2770_s3, 128  ;;  %s351_s16 = int_to_ptr.vmem [resolvable:$true] %s350_s16 }
 0x130   :  { %p2772_p2 = scmp.ne.s32.totalorder %s2770_s3, %s2771_s15  ;;  %s2773_s21 = scalar_lea.hbm %s3078_s12, 128 }
 0x131   :  { %p2774_p3 = scmp.lt.s32.totalorder %s2770_s3, %s3078_s12  ;;  %p2775_p4 = scmp.lt.s32.totalorder %s2773_s21, %s2771_s15 }
 0x133   :  { %p2776_p5 = por %p2775_p4, %p2774_p3 }
 0x135   :  { %p2777_p6 = pnand %p2776_p5, %p2772_p2 }
 0x137   :  { %2780 = shalt.err (!%p2777_p6)
}
 0x138   :  { %356 = dma.hbm_to_vmem [thread:$0]  %s349_s22, 2048, %s351_s16, [#allocation36], %s2913_s7, %s2913_s7, %s2914_s9  }
 0x139   :  { %2845 = dma.done.wait [#allocation6], 128  }
 0x13a   :  { %2846 = vsyncadd [#allocation6], 4294967168 }
 0x13b   :  { %2847 = dma.done.wait [#allocation9], 144  }
 0x13c   :  { %2848 = vsyncadd [#allocation9], 4294967152 }
 0x13d   :  { %2849 = dma.done.wait [#allocation12], 2064  }
 0x13e   :  { %2850 = vsyncadd [#allocation12], 4294965232 }
 0x13f   :  { %2851 = dma.done.wait [#allocation15], 2064  }
 0x140   :  { %2852 = vsyncadd [#allocation15], 4294965232 }
 0x141   :  { %2853 = dma.done.wait [#allocation18], 2064  }
 0x142   :  { %2854 = vsyncadd [#allocation18], 4294965232 }
 0x143   :  { %2855 = dma.done.wait [#allocation21], 2064  }
 0x144   :  { %2856 = vsyncadd [#allocation21], 4294965232 }
 0x145   :  { %2857 = dma.done.wait [#allocation24], 4096  }
 0x146   :  { %2858 = vsyncadd [#allocation24], 4294963200 }
 0x147   :  { %2859 = dma.done.wait [#allocation27], 16384  }
 0x148   :  { %2860 = vsyncadd [#allocation27], 4294950912 }
 0x149   :  { %2861 = dma.done.wait [#allocation30], 16384  }
 0x14a   :  { %2862 = vsyncadd [#allocation30], 4294950912 }
 0x14b   :  { %2863 = dma.done.wait [#allocation33], 10240  }
 0x14c   :  { %2864 = vsyncadd [#allocation33], 4294957056 }
 0x14d   :  { %2865 = dma.done.wait [#allocation36], 4096  }
 0x14e   :  { %2866 = vsyncadd [#allocation36], 4294963200  ;;  %v3254_v0 = vld [vmem:[#allocation5] sm:$0xf]  ;;  %v3256_v1 = vld [vmem:[#allocation5] sm:$0xf0] }
 0x14f   :  { %4783 = vst [vmem:[#allocation67_spill] sm:$0xff] %v3254_v0  ;;  %v3258_v2 = vld [vmem:[#allocation8] sm:$0xf]  ;;  %v3260_v3 = vld [vmem:[#allocation8] sm:$0xf0]  ;;  %v3262_v4 = vld [vmem:[#allocation13] sm:$0xff] }
 0x150   :  { %4784 = vst [vmem:[#allocation68_spill] sm:$0xff] %v3256_v1  ;;  %v3264_v5 = vld [vmem:[#allocation13 + $0x8] sm:$0xff]  ;;  %v3266_v6 = vld [vmem:[#allocation13 + $0x10] sm:$0xff]  ;;  %v3268_v7 = vld [vmem:[#allocation13 + $0x18] sm:$0xff]  ;;  %s4820_s12 = sld [smem:[#allocation56_spill]]  ;;  %s4115_s14 = smov 0  }
 0x151   :  { %4785 = vst [vmem:[#allocation69_spill] sm:$0xff] %v3258_v2  ;;  %v3270_v8 = vld [vmem:[#allocation13 + $0x20] sm:$0xff]  ;;  %v3272_v9 = vld [vmem:[#allocation13 + $0x28] sm:$0xff]  ;;  %v3274_v10 = vld [vmem:[#allocation13 + $0x30] sm:$0xff]  ;;  %s4838_s27 = sld [smem:[#allocation57_spill]] }
 0x152   :  { %4786 = vst [vmem:[#allocation70_spill] sm:$0xff] %v3260_v3  ;;  %v3276_v11 = vld [vmem:[#allocation13 + $0x38] sm:$0xff]  ;;  %v3278_v12 = vld [vmem:[#allocation13 + $0x40] sm:$0xff]  ;;  %v3280_v13 = vld [vmem:[#allocation13 + $0x48] sm:$0xff]  ;;  %s4856_s17 = sld [smem:[#allocation59_spill]] }
 0x153   :  { %4787 = vst [vmem:[#allocation71_spill] sm:$0xff] %v3262_v4  ;;  %v3282_v14 = vld [vmem:[#allocation13 + $0x50] sm:$0xff]  ;;  %v3284_v15 = vld [vmem:[#allocation13 + $0x58] sm:$0xff]  ;;  %v3286_v16 = vld [vmem:[#allocation13 + $0x60] sm:$0xff]  ;;  %s4986_s18 = sld [smem:[#allocation61_spill]] }
 0x154   :  { %4788 = vst [vmem:[#allocation72_spill] sm:$0xff] %v3264_v5  ;;  %v3288_v17 = vld [vmem:[#allocation13 + $0x68] sm:$0xff]  ;;  %v3290_v18 = vld [vmem:[#allocation13 + $0x70] sm:$0xff]  ;;  %v3292_v19 = vld [vmem:[#allocation13 + $0x78] sm:$0xff]  ;;  %s5176_s19 = sld [smem:[#allocation63_spill]] }
 0x155   :  { %4789 = vst [vmem:[#allocation73_spill] sm:$0xff] %v3266_v6  ;;  %v3294_v20 = vld [vmem:[#allocation14] sm:$0x1]  ;;  %v3296_v21 = vld [vmem:[#allocation16] sm:$0xff]  ;;  %v3298_v22 = vld [vmem:[#allocation16 + $0x8] sm:$0xff] }
 0x156   :  { %4790 = vst [vmem:[#allocation74_spill] sm:$0xff] %v3268_v7  ;;  %v3300_v23 = vld [vmem:[#allocation16 + $0x10] sm:$0xff]  ;;  %v3302_v24 = vld [vmem:[#allocation16 + $0x18] sm:$0xff]  ;;  %v3304_v25 = vld [vmem:[#allocation16 + $0x20] sm:$0xff] }
 0x157   :  { %4791 = vst [vmem:[#allocation75_spill] sm:$0xff] %v3270_v8  ;;  %v3306_v26 = vld [vmem:[#allocation16 + $0x28] sm:$0xff]  ;;  %v3308_v27 = vld [vmem:[#allocation16 + $0x30] sm:$0xff]  ;;  %v3310_v28 = vld [vmem:[#allocation16 + $0x38] sm:$0xff] }
 0x158   :  { %4792 = vst [vmem:[#allocation76_spill] sm:$0xff] %v3272_v9  ;;  %v3312_v29 = vld [vmem:[#allocation16 + $0x40] sm:$0xff]  ;;  %v3314_v30 = vld [vmem:[#allocation16 + $0x48] sm:$0xff]  ;;  %v3316_v31 = vld [vmem:[#allocation16 + $0x50] sm:$0xff] }
 0x159   :  { %4793 = vst [vmem:[#allocation77_spill] sm:$0xff] %v3274_v10  ;;  %v3318_v32 = vld [vmem:[#allocation16 + $0x58] sm:$0xff]  ;;  %v3320_v33 = vld [vmem:[#allocation16 + $0x60] sm:$0xff]  ;;  %v3322_v34 = vld [vmem:[#allocation16 + $0x68] sm:$0xff] }
 0x15a   :  { %4794 = vst [vmem:[#allocation78_spill] sm:$0xff] %v3276_v11  ;;  %v3324_v35 = vld [vmem:[#allocation16 + $0x70] sm:$0xff]  ;;  %v3326_v36 = vld [vmem:[#allocation16 + $0x78] sm:$0xff]  ;;  %v3328_v37 = vld [vmem:[#allocation17] sm:$0x1] }
 0x15b   :  { %4795 = vst [vmem:[#allocation79_spill] sm:$0xff] %v3278_v12  ;;  %v3330_v38 = vld [vmem:[#allocation19] sm:$0xff]  ;;  %v3332_v39 = vld [vmem:[#allocation19 + $0x8] sm:$0xff]  ;;  %v3334_v40 = vld [vmem:[#allocation19 + $0x10] sm:$0xff] }
 0x15c   :  { %4796 = vst [vmem:[#allocation80_spill] sm:$0xff] %v3280_v13  ;;  %v3336_v41 = vld [vmem:[#allocation19 + $0x18] sm:$0xff]  ;;  %v3338_v42 = vld [vmem:[#allocation19 + $0x20] sm:$0xff]  ;;  %v3340_v43 = vld [vmem:[#allocation19 + $0x28] sm:$0xff] }
 0x15d   :  { %4797 = vst [vmem:[#allocation81_spill] sm:$0xff] %v3282_v14  ;;  %v3342_v44 = vld [vmem:[#allocation19 + $0x30] sm:$0xff]  ;;  %v3344_v45 = vld [vmem:[#allocation19 + $0x38] sm:$0xff]  ;;  %v3346_v46 = vld [vmem:[#allocation19 + $0x40] sm:$0xff] }
 0x15e   :  { %4798 = vst [vmem:[#allocation82_spill] sm:$0xff] %v3284_v15  ;;  %v3348_v47 = vld [vmem:[#allocation19 + $0x48] sm:$0xff]  ;;  %v3350_v48 = vld [vmem:[#allocation19 + $0x50] sm:$0xff]  ;;  %v3352_v49 = vld [vmem:[#allocation19 + $0x58] sm:$0xff] }
 0x15f   :  { %4799 = vst [vmem:[#allocation83_spill] sm:$0xff] %v3286_v16  ;;  %v3354_v50 = vld [vmem:[#allocation19 + $0x60] sm:$0xff]  ;;  %v3356_v51 = vld [vmem:[#allocation19 + $0x68] sm:$0xff]  ;;  %v3358_v52 = vld [vmem:[#allocation19 + $0x70] sm:$0xff] }
 0x160   :  { %4800 = vst [vmem:[#allocation84_spill] sm:$0xff] %v3288_v17  ;;  %v3360_v53 = vld [vmem:[#allocation19 + $0x78] sm:$0xff]  ;;  %v3362_v54 = vld [vmem:[#allocation20] sm:$0x1]  ;;  %v3364_v55 = vld [vmem:[#allocation22] sm:$0xff] }
 0x161   :  { %4801 = vst [vmem:[#allocation85_spill] sm:$0xff] %v3290_v18  ;;  %v3366_v56 = vld [vmem:[#allocation22 + $0x8] sm:$0xff]  ;;  %v3368_v57 = vld [vmem:[#allocation22 + $0x10] sm:$0xff]  ;;  %v3370_v58 = vld [vmem:[#allocation22 + $0x18] sm:$0xff] }
 0x162   :  { %4802 = vst [vmem:[#allocation86_spill] sm:$0xff] %v3292_v19  ;;  %v3372_v59 = vld [vmem:[#allocation22 + $0x20] sm:$0xff]  ;;  %v3374_v60 = vld [vmem:[#allocation22 + $0x28] sm:$0xff]  ;;  %v3376_v61 = vld [vmem:[#allocation22 + $0x30] sm:$0xff] }
 0x163   :  { %4803 = vst [vmem:[#allocation87_spill] sm:$0xff] %v3294_v20  ;;  %v3378_v62 = vld [vmem:[#allocation22 + $0x38] sm:$0xff]  ;;  %v3380_v63 = vld [vmem:[#allocation22 + $0x40] sm:$0xff]  ;;  %v3382_v1 = vld [vmem:[#allocation22 + $0x48] sm:$0xff] }
 0x164   :  { %4804 = vst [vmem:[#allocation88_spill] sm:$0xff] %v3296_v21  ;;  %v3384_v0 = vld [vmem:[#allocation22 + $0x50] sm:$0xff]  ;;  %v3493_v3 = vld [vmem:[#allocation26 + $0x60] sm:$0xff]  ;;  %v3495_v2 = vld [vmem:[#allocation26 + $0x68] sm:$0xff] }
 0x165   :  { %4805 = vst [vmem:[#allocation89_spill] sm:$0xff] %v3298_v22  ;;  %v3525_v20 = vld [vmem:[#allocation26 + $0xe0] sm:$0xff] }
 0x166   :  { %4806 = vst [vmem:[#allocation90_spill] sm:$0xff] %v3300_v23 }
 0x167   :  { %4807 = vst [vmem:[#allocation91_spill] sm:$0xff] %v3302_v24 }
 0x168   :  { %4808 = vst [vmem:[#allocation92_spill] sm:$0xff] %v3304_v25 }
 0x169   :  { %4809 = vst [vmem:[#allocation93_spill] sm:$0xff] %v3306_v26 }
 0x16a   :  { %4810 = vst [vmem:[#allocation94_spill] sm:$0xff] %v3308_v27 }
 0x16b   :  { %4811 = vst [vmem:[#allocation95_spill] sm:$0xff] %v3310_v28 }
 0x16c   :  { %4812 = vst [vmem:[#allocation96_spill] sm:$0xff] %v3312_v29 }
 0x16d   :  { %4813 = vst [vmem:[#allocation97_spill] sm:$0xff] %v3314_v30 }
 0x16e   :  { %4814 = vst [vmem:[#allocation98_spill] sm:$0xff] %v3316_v31 }
 0x16f   :  { %4815 = vst [vmem:[#allocation99_spill] sm:$0xff] %v3318_v32 }
 0x170   :  { %4816 = vst [vmem:[#allocation100_spill] sm:$0xff] %v3320_v33 }
 0x171   :  { %4817 = vst [vmem:[#allocation101_spill] sm:$0xff] %v3328_v37  ;;  %v3503_v37 = vld [vmem:[#allocation26 + $0x88] sm:$0xff] }
 0x172   :  { %4818 = vst [vmem:[#allocation102_spill] sm:$0xff] %v3362_v54  ;;  %v3497_v54 = vld [vmem:[#allocation26 + $0x70] sm:$0xff] }
 0x173   :  { %4819 = vst [vmem:[#allocation103_spill] sm:$0xff] %v3364_v55  ;;  %v3386_v55 = vld [vmem:[#allocation22 + $0x58] sm:$0xff] }
 0x174   :  { %4821 = vst [vmem:[#allocation104_spill] sm:$0xff] %v3366_v56  ;;  %v3388_v56 = vld [vmem:[#allocation22 + $0x60] sm:$0xff] }
 0x175   :  { %4822 = vst [vmem:[#allocation105_spill] sm:$0xff] %v3368_v57  ;;  %v3390_v57 = vld [vmem:[#allocation22 + $0x68] sm:$0xff] }
 0x176   :  { %4823 = vst [vmem:[#allocation106_spill] sm:$0xff] %v3370_v58  ;;  %v3392_v58 = vld [vmem:[#allocation22 + $0x70] sm:$0xff] }
 0x177   :  { %4824 = vst [vmem:[#allocation107_spill] sm:$0xff] %v3372_v59  ;;  %v3394_v59 = vld [vmem:[#allocation22 + $0x78] sm:$0xff] }
 0x178   :  { %4825 = vst [vmem:[#allocation108_spill] sm:$0xff] %v3374_v60  ;;  %v3397_v60 = vld [vmem:[%s4820_s12] sm:$0x1] }
 0x179   :  { %4826 = vst [vmem:[#allocation109_spill] sm:$0xff] %v3376_v61  ;;  %v3399_v61 = vld [vmem:[#allocation23] sm:$0xff] }
 0x17a   :  { %4827 = vst [vmem:[#allocation110_spill] sm:$0xff] %v3378_v62  ;;  %v3401_v62 = vld [vmem:[#allocation23 + $0x8] sm:$0xff] }
 0x17b   :  { %4828 = vst [vmem:[#allocation111_spill] sm:$0xff] %v3380_v63  ;;  %v3403_v63 = vld [vmem:[#allocation23 + $0x10] sm:$0xff] }
 0x17c   :  { %4829 = vst [vmem:[#allocation112_spill] sm:$0xff] %v3382_v1  ;;  %v3405_v1 = vld [vmem:[#allocation23 + $0x18] sm:$0xff] }
 0x17d   :  { %4830 = vst [vmem:[#allocation113_spill] sm:$0xff] %v3384_v0  ;;  %v3407_v0 = vld [vmem:[#allocation23 + $0x20] sm:$0xff] }
 0x17e   :  { %4831 = vst [vmem:[#allocation114_spill] sm:$0xff] %v3386_v55  ;;  %v3409_v55 = vld [vmem:[#allocation23 + $0x28] sm:$0xff] }
 0x17f   :  { %4832 = vst [vmem:[#allocation115_spill] sm:$0xff] %v3388_v56  ;;  %v3411_v56 = vld [vmem:[#allocation23 + $0x30] sm:$0xff] }
 0x180   :  { %4833 = vst [vmem:[#allocation116_spill] sm:$0xff] %v3390_v57  ;;  %v3413_v57 = vld [vmem:[#allocation23 + $0x38] sm:$0xff] }
 0x181   :  { %4834 = vst [vmem:[#allocation117_spill] sm:$0xff] %v3392_v58  ;;  %v3415_v58 = vld [vmem:[#allocation23 + $0x40] sm:$0xff] }
 0x182   :  { %4835 = vst [vmem:[#allocation118_spill] sm:$0xff] %v3394_v59  ;;  %v3419_v59 = vld [vmem:[#allocation23 + $0x50] sm:$0xff] }
 0x183   :  { %4836 = vst [vmem:[#allocation119_spill] sm:$0xff] %v3397_v60  ;;  %v3417_v60 = vld [vmem:[#allocation23 + $0x48] sm:$0xff] }
 0x184   :  { %4837 = vst [vmem:[#allocation120_spill] sm:$0xff] %v3399_v61  ;;  %v3421_v61 = vld [vmem:[#allocation23 + $0x58] sm:$0xff] }
 0x185   :  { %4839 = vst [vmem:[#allocation121_spill] sm:$0xff] %v3401_v62  ;;  %v3423_v62 = vld [vmem:[#allocation23 + $0x60] sm:$0xff] }
 0x186   :  { %4840 = vst [vmem:[#allocation122_spill] sm:$0xff] %v3403_v63  ;;  %v3425_v63 = vld [vmem:[#allocation23 + $0x68] sm:$0xff] }
 0x187   :  { %4841 = vst [vmem:[#allocation123_spill] sm:$0xff] %v3405_v1  ;;  %v3427_v1 = vld [vmem:[#allocation23 + $0x70] sm:$0xff] }
 0x188   :  { %4842 = vst [vmem:[#allocation124_spill] sm:$0xff] %v3407_v0  ;;  %v3429_v0 = vld [vmem:[#allocation23 + $0x78] sm:$0xff] }
 0x189   :  { %4843 = vst [vmem:[#allocation125_spill] sm:$0xff] %v3409_v55  ;;  %v3432_v55 = vld [vmem:[%s4838_s27] sm:$0x1] }
 0x18a   :  { %4844 = vst [vmem:[#allocation126_spill] sm:$0xff] %v3411_v56  ;;  %v3434_v56 = vld [vmem:[#allocation25] sm:$0xff] }
 0x18b   :  { %4845 = vst [vmem:[#allocation127_spill] sm:$0xff] %v3413_v57  ;;  %v3436_v57 = vld [vmem:[#allocation25 + $0x8] sm:$0xff] }
 0x18c   :  { %4846 = vst [vmem:[#allocation128_spill] sm:$0xff] %v3415_v58  ;;  %v3438_v58 = vld [vmem:[#allocation25 + $0x10] sm:$0xff] }
 0x18d   :  { %4847 = vst [vmem:[#allocation129_spill] sm:$0xff] %v3417_v60  ;;  %v3440_v60 = vld [vmem:[#allocation25 + $0x18] sm:$0xff] }
 0x18e   :  { %4848 = vst [vmem:[#allocation130_spill] sm:$0xff] %v3419_v59  ;;  %v3442_v59 = vld [vmem:[#allocation25 + $0x20] sm:$0xff] }
 0x18f   :  { %4849 = vst [vmem:[#allocation131_spill] sm:$0xff] %v3421_v61  ;;  %v3444_v61 = vld [vmem:[#allocation25 + $0x28] sm:$0xff] }
 0x190   :  { %4850 = vst [vmem:[#allocation132_spill] sm:$0xff] %v3423_v62  ;;  %v3446_v62 = vld [vmem:[#allocation25 + $0x30] sm:$0xff] }
 0x191   :  { %4851 = vst [vmem:[#allocation133_spill] sm:$0xff] %v3425_v63  ;;  %v3448_v63 = vld [vmem:[#allocation25 + $0x38] sm:$0xff] }
 0x192   :  { %4852 = vst [vmem:[#allocation134_spill] sm:$0xff] %v3427_v1  ;;  %v3450_v1 = vld [vmem:[#allocation25 + $0x40] sm:$0xff] }
 0x193   :  { %4853 = vst [vmem:[#allocation135_spill] sm:$0xff] %v3429_v0  ;;  %v3456_v0 = vld [vmem:[#allocation25 + $0x58] sm:$0xff] }
 0x194   :  { %4854 = vst [vmem:[#allocation136_spill] sm:$0xff] %v3432_v55  ;;  %v3452_v55 = vld [vmem:[#allocation25 + $0x48] sm:$0xff] }
 0x195   :  { %4855 = vst [vmem:[#allocation137_spill] sm:$0xff] %v3434_v56  ;;  %v3454_v56 = vld [vmem:[#allocation25 + $0x50] sm:$0xff] }
 0x196   :  { %4857 = vst [vmem:[#allocation138_spill] sm:$0xff] %v3436_v57  ;;  %v3458_v57 = vld [vmem:[#allocation25 + $0x60] sm:$0xff] }
 0x197   :  { %4858 = vst [vmem:[#allocation139_spill] sm:$0xff] %v3438_v58  ;;  %v3460_v58 = vld [vmem:[#allocation25 + $0x68] sm:$0xff] }
 0x198   :  { %4859 = vst [vmem:[#allocation140_spill] sm:$0xff] %v3440_v60  ;;  %v3462_v60 = vld [vmem:[#allocation25 + $0x70] sm:$0xff] }
 0x199   :  { %4860 = vst [vmem:[#allocation141_spill] sm:$0xff] %v3442_v59  ;;  %v3464_v59 = vld [vmem:[#allocation25 + $0x78] sm:$0xff] }
 0x19a   :  { %4861 = vst [vmem:[#allocation142_spill] sm:$0xff] %v3444_v61  ;;  %v3467_v61 = vld [vmem:[%s4856_s17] sm:$0x1] }
 0x19b   :  { %4862 = vst [vmem:[#allocation143_spill] sm:$0xff] %v3446_v62  ;;  %v3469_v62 = vld [vmem:[#allocation26] sm:$0xff] }
 0x19c   :  { %4863 = vst [vmem:[#allocation144_spill] sm:$0xff] %v3448_v63  ;;  %v3471_v63 = vld [vmem:[#allocation26 + $0x8] sm:$0xff] }
 0x19d   :  { %4864 = vst [vmem:[#allocation145_spill] sm:$0xff] %v3450_v1  ;;  %v3473_v1 = vld [vmem:[#allocation26 + $0x10] sm:$0xff] }
 0x19e   :  { %4865 = vst [vmem:[#allocation146_spill] sm:$0xff] %v3452_v55  ;;  %v3475_v55 = vld [vmem:[#allocation26 + $0x18] sm:$0xff] }
 0x19f   :  { %4866 = vst [vmem:[#allocation147_spill] sm:$0xff] %v3454_v56  ;;  %v3477_v56 = vld [vmem:[#allocation26 + $0x20] sm:$0xff] }
 0x1a0   :  { %4867 = vst [vmem:[#allocation148_spill] sm:$0xff] %v3456_v0  ;;  %v3479_v0 = vld [vmem:[#allocation26 + $0x28] sm:$0xff] }
 0x1a1   :  { %4868 = vst [vmem:[#allocation149_spill] sm:$0xff] %v3458_v57  ;;  %v3481_v57 = vld [vmem:[#allocation26 + $0x30] sm:$0xff] }
 0x1a2   :  { %4869 = vst [vmem:[#allocation150_spill] sm:$0xff] %v3460_v58  ;;  %v3483_v58 = vld [vmem:[#allocation26 + $0x38] sm:$0xff] }
 0x1a3   :  { %4870 = vst [vmem:[#allocation151_spill] sm:$0xff] %v3462_v60  ;;  %v3485_v60 = vld [vmem:[#allocation26 + $0x40] sm:$0xff] }
 0x1a4   :  { %4871 = vst [vmem:[#allocation152_spill] sm:$0xff] %v3464_v59  ;;  %v3487_v59 = vld [vmem:[#allocation26 + $0x48] sm:$0xff] }
 0x1a5   :  { %4872 = vst [vmem:[#allocation153_spill] sm:$0xff] %v3467_v61  ;;  %v3489_v61 = vld [vmem:[#allocation26 + $0x50] sm:$0xff] }
 0x1a6   :  { %4873 = vst [vmem:[#allocation154_spill] sm:$0xff] %v3469_v62  ;;  %v3491_v62 = vld [vmem:[#allocation26 + $0x58] sm:$0xff] }
 0x1a7   :  { %4874 = vst [vmem:[#allocation155_spill] sm:$0xff] %v3471_v63  ;;  %v3533_v63 = vld [vmem:[#allocation26 + $0x100] sm:$0xff] }
 0x1a8   :  { %4875 = vst [vmem:[#allocation156_spill] sm:$0xff] %v3473_v1  ;;  %v3509_v1 = vld [vmem:[#allocation26 + $0xa0] sm:$0xff] }
 0x1a9   :  { %4876 = vst [vmem:[#allocation157_spill] sm:$0xff] %v3475_v55  ;;  %v3501_v55 = vld [vmem:[#allocation26 + $0x80] sm:$0xff] }
 0x1aa   :  { %4877 = vst [vmem:[#allocation158_spill] sm:$0xff] %v3477_v56  ;;  %v3499_v56 = vld [vmem:[#allocation26 + $0x78] sm:$0xff] }
 0x1ab   :  { %4878 = vst [vmem:[#allocation159_spill] sm:$0xff] %v3479_v0  ;;  %v3541_v0 = vld [vmem:[#allocation26 + $0x120] sm:$0xff] }
 0x1ac   :  { %4879 = vst [vmem:[#allocation160_spill] sm:$0xff] %v3481_v57  ;;  %v3511_v57 = vld [vmem:[#allocation26 + $0xa8] sm:$0xff] }
 0x1ad   :  { %4880 = vst [vmem:[#allocation161_spill] sm:$0xff] %v3483_v58  ;;  %v3505_v58 = vld [vmem:[#allocation26 + $0x90] sm:$0xff] }
 0x1ae   :  { %4881 = vst [vmem:[#allocation162_spill] sm:$0xff] %v3485_v60  ;;  %v3507_v60 = vld [vmem:[#allocation26 + $0x98] sm:$0xff] }
 0x1af   :  { %4882 = vst [vmem:[#allocation163_spill] sm:$0xff] %v3487_v59  ;;  %v3549_v59 = vld [vmem:[#allocation26 + $0x140] sm:$0xff] }
 0x1b0   :  { %4883 = vst [vmem:[#allocation164_spill] sm:$0xff] %v3489_v61  ;;  %v3517_v61 = vld [vmem:[#allocation26 + $0xc0] sm:$0xff] }
 0x1b1   :  { %4884 = vst [vmem:[#allocation165_spill] sm:$0xff] %v3491_v62  ;;  %v3513_v62 = vld [vmem:[#allocation26 + $0xb0] sm:$0xff] }
 0x1b2   :  { %4885 = vst [vmem:[#allocation166_spill] sm:$0xff] %v3493_v3  ;;  %v3515_v3 = vld [vmem:[#allocation26 + $0xb8] sm:$0xff] }
 0x1b3   :  { %4886 = vst [vmem:[#allocation167_spill] sm:$0xff] %v3495_v2  ;;  %v3557_v2 = vld [vmem:[#allocation26 + $0x160] sm:$0xff] }
 0x1b4   :  { %4887 = vst [vmem:[#allocation168_spill] sm:$0xff] %v3497_v54  ;;  %v3519_v54 = vld [vmem:[#allocation26 + $0xc8] sm:$0xff] }
 0x1b5   :  { %4888 = vst [vmem:[#allocation169_spill] sm:$0xff] %v3499_v56  ;;  %v3521_v56 = vld [vmem:[#allocation26 + $0xd0] sm:$0xff] }
 0x1b6   :  { %4889 = vst [vmem:[#allocation170_spill] sm:$0xff] %v3501_v55  ;;  %v3523_v55 = vld [vmem:[#allocation26 + $0xd8] sm:$0xff] }
 0x1b7   :  { %4890 = vst [vmem:[#allocation171_spill] sm:$0xff] %v3503_v37  ;;  %v3565_v37 = vld [vmem:[#allocation26 + $0x180] sm:$0xff] }
 0x1b8   :  { %4891 = vst [vmem:[#allocation172_spill] sm:$0xff] %v3505_v58  ;;  %v3527_v58 = vld [vmem:[#allocation26 + $0xe8] sm:$0xff] }
 0x1b9   :  { %4892 = vst [vmem:[#allocation173_spill] sm:$0xff] %v3507_v60  ;;  %v3529_v60 = vld [vmem:[#allocation26 + $0xf0] sm:$0xff] }
 0x1ba   :  { %4893 = vst [vmem:[#allocation174_spill] sm:$0xff] %v3509_v1  ;;  %v3531_v1 = vld [vmem:[#allocation26 + $0xf8] sm:$0xff] }
 0x1bb   :  { %4894 = vst [vmem:[#allocation175_spill] sm:$0xff] %v3511_v57  ;;  %v3573_v57 = vld [vmem:[#allocation26 + $0x1a0] sm:$0xff] }
 0x1bc   :  { %4895 = vst [vmem:[#allocation176_spill] sm:$0xff] %v3513_v62  ;;  %v3535_v62 = vld [vmem:[#allocation26 + $0x108] sm:$0xff] }
 0x1bd   :  { %4896 = vst [vmem:[#allocation177_spill] sm:$0xff] %v3515_v3  ;;  %v3537_v3 = vld [vmem:[#allocation26 + $0x110] sm:$0xff] }
 0x1be   :  { %4897 = vst [vmem:[#allocation178_spill] sm:$0xff] %v3517_v61  ;;  %v3539_v61 = vld [vmem:[#allocation26 + $0x118] sm:$0xff] }
 0x1bf   :  { %4898 = vst [vmem:[#allocation179_spill] sm:$0xff] %v3519_v54  ;;  %v3581_v54 = vld [vmem:[#allocation26 + $0x1c0] sm:$0xff] }
 0x1c0   :  { %4899 = vst [vmem:[#allocation180_spill] sm:$0xff] %v3521_v56  ;;  %v3543_v56 = vld [vmem:[#allocation26 + $0x128] sm:$0xff] }
 0x1c1   :  { %4900 = vst [vmem:[#allocation181_spill] sm:$0xff] %v3523_v55  ;;  %v3545_v55 = vld [vmem:[#allocation26 + $0x130] sm:$0xff] }
 0x1c2   :  { %4901 = vst [vmem:[#allocation182_spill] sm:$0xff] %v3525_v20  ;;  %v3547_v20 = vld [vmem:[#allocation26 + $0x138] sm:$0xff] }
 0x1c3   :  { %4902 = vst [vmem:[#allocation183_spill] sm:$0xff] %v3527_v58  ;;  %v3589_v58 = vld [vmem:[#allocation26 + $0x1e0] sm:$0xff] }
 0x1c4   :  { %4903 = vst [vmem:[#allocation184_spill] sm:$0xff] %v3529_v60  ;;  %v3551_v60 = vld [vmem:[#allocation26 + $0x148] sm:$0xff] }
 0x1c5   :  { %4904 = vst [vmem:[#allocation185_spill] sm:$0xff] %v3531_v1  ;;  %v3553_v1 = vld [vmem:[#allocation26 + $0x150] sm:$0xff] }
 0x1c6   :  { %4905 = vst [vmem:[#allocation186_spill] sm:$0xff] %v3533_v63  ;;  %v3555_v63 = vld [vmem:[#allocation26 + $0x158] sm:$0xff] }
 0x1c7   :  { %4906 = vst [vmem:[#allocation187_spill] sm:$0xff] %v3535_v62  ;;  %v3597_v62 = vld [vmem:[#allocation28] sm:$0xff] }
 0x1c8   :  { %4907 = vst [vmem:[#allocation188_spill] sm:$0xff] %v3537_v3  ;;  %v3559_v3 = vld [vmem:[#allocation26 + $0x168] sm:$0xff] }
 0x1c9   :  { %4908 = vst [vmem:[#allocation189_spill] sm:$0xff] %v3539_v61  ;;  %v3561_v61 = vld [vmem:[#allocation26 + $0x170] sm:$0xff] }
 0x1ca   :  { %4909 = vst [vmem:[#allocation190_spill] sm:$0xff] %v3541_v0  ;;  %v3563_v0 = vld [vmem:[#allocation26 + $0x178] sm:$0xff] }
 0x1cb   :  { %4910 = vst [vmem:[#allocation191_spill] sm:$0xff] %v3543_v56  ;;  %v3605_v56 = vld [vmem:[#allocation28 + $0x20] sm:$0xff] }
 0x1cc   :  { %4911 = vst [vmem:[#allocation192_spill] sm:$0xff] %v3545_v55  ;;  %v3567_v55 = vld [vmem:[#allocation26 + $0x188] sm:$0xff] }
 0x1cd   :  { %4912 = vst [vmem:[#allocation193_spill] sm:$0xff] %v3547_v20  ;;  %v3569_v20 = vld [vmem:[#allocation26 + $0x190] sm:$0xff] }
 0x1ce   :  { %4913 = vst [vmem:[#allocation194_spill] sm:$0xff] %v3549_v59  ;;  %v3571_v59 = vld [vmem:[#allocation26 + $0x198] sm:$0xff] }
 0x1cf   :  { %4914 = vst [vmem:[#allocation195_spill] sm:$0xff] %v3551_v60  ;;  %v3613_v60 = vld [vmem:[#allocation28 + $0x40] sm:$0xff] }
 0x1d0   :  { %4915 = vst [vmem:[#allocation196_spill] sm:$0xff] %v3553_v1  ;;  %v3575_v1 = vld [vmem:[#allocation26 + $0x1a8] sm:$0xff] }
 0x1d1   :  { %4916 = vst [vmem:[#allocation197_spill] sm:$0xff] %v3555_v63  ;;  %v3577_v63 = vld [vmem:[#allocation26 + $0x1b0] sm:$0xff] }
 0x1d2   :  { %4917 = vst [vmem:[#allocation198_spill] sm:$0xff] %v3557_v2  ;;  %v3579_v2 = vld [vmem:[#allocation26 + $0x1b8] sm:$0xff] }
 0x1d3   :  { %4918 = vst [vmem:[#allocation199_spill] sm:$0xff] %v3559_v3  ;;  %v3621_v3 = vld [vmem:[#allocation28 + $0x60] sm:$0xff] }
 0x1d4   :  { %4919 = vst [vmem:[#allocation200_spill] sm:$0xff] %v3561_v61  ;;  %v3583_v61 = vld [vmem:[#allocation26 + $0x1c8] sm:$0xff] }
 0x1d5   :  { %4920 = vst [vmem:[#allocation201_spill] sm:$0xff] %v3563_v0  ;;  %v3585_v0 = vld [vmem:[#allocation26 + $0x1d0] sm:$0xff] }
 0x1d6   :  { %4921 = vst [vmem:[#allocation202_spill] sm:$0xff] %v3565_v37  ;;  %v3587_v37 = vld [vmem:[#allocation26 + $0x1d8] sm:$0xff] }
 0x1d7   :  { %4922 = vst [vmem:[#allocation203_spill] sm:$0xff] %v3567_v55  ;;  %v3623_v55 = vld [vmem:[#allocation28 + $0x68] sm:$0xff] }
 0x1d8   :  { %4923 = vst [vmem:[#allocation204_spill] sm:$0xff] %v3569_v20  ;;  %v3591_v20 = vld [vmem:[#allocation26 + $0x1e8] sm:$0xff] }
 0x1d9   :  { %4924 = vst [vmem:[#allocation205_spill] sm:$0xff] %v3571_v59  ;;  %v3593_v59 = vld [vmem:[#allocation26 + $0x1f0] sm:$0xff] }
 0x1da   :  { %4925 = vst [vmem:[#allocation206_spill] sm:$0xff] %v3573_v57  ;;  %v3595_v57 = vld [vmem:[#allocation26 + $0x1f8] sm:$0xff] }
 0x1db   :  { %4926 = vst [vmem:[#allocation207_spill] sm:$0xff] %v3575_v1  ;;  %v3625_v1 = vld [vmem:[#allocation28 + $0x70] sm:$0xff] }
 0x1dc   :  { %4927 = vst [vmem:[#allocation208_spill] sm:$0xff] %v3577_v63  ;;  %v3599_v63 = vld [vmem:[#allocation28 + $0x8] sm:$0xff] }
 0x1dd   :  { %4928 = vst [vmem:[#allocation209_spill] sm:$0xff] %v3579_v2  ;;  %v3601_v2 = vld [vmem:[#allocation28 + $0x10] sm:$0xff] }
 0x1de   :  { %4929 = vst [vmem:[#allocation210_spill] sm:$0xff] %v3581_v54  ;;  %v3603_v54 = vld [vmem:[#allocation28 + $0x18] sm:$0xff] }
 0x1df   :  { %4930 = vst [vmem:[#allocation211_spill] sm:$0xff] %v3583_v61  ;;  %v3629_v61 = vld [vmem:[#allocation28 + $0x80] sm:$0xff] }
 0x1e0   :  { %4931 = vst [vmem:[#allocation212_spill] sm:$0xff] %v3585_v0  ;;  %v3607_v0 = vld [vmem:[#allocation28 + $0x28] sm:$0xff] }
 0x1e1   :  { %4932 = vst [vmem:[#allocation213_spill] sm:$0xff] %v3587_v37  ;;  %v3609_v37 = vld [vmem:[#allocation28 + $0x30] sm:$0xff] }
 0x1e2   :  { %4933 = vst [vmem:[#allocation214_spill] sm:$0xff] %v3589_v58  ;;  %v3611_v58 = vld [vmem:[#allocation28 + $0x38] sm:$0xff] }
 0x1e3   :  { %4934 = vst [vmem:[#allocation215_spill] sm:$0xff] %v3591_v20  ;;  %v3631_v20 = vld [vmem:[#allocation28 + $0x88] sm:$0xff] }
 0x1e4   :  { %4935 = vst [vmem:[#allocation216_spill] sm:$0xff] %v3593_v59  ;;  %v3615_v59 = vld [vmem:[#allocation28 + $0x48] sm:$0xff] }
 0x1e5   :  { %4936 = vst [vmem:[#allocation217_spill] sm:$0xff] %v3595_v57  ;;  %v3617_v57 = vld [vmem:[#allocation28 + $0x50] sm:$0xff] }
 0x1e6   :  { %4937 = vst [vmem:[#allocation218_spill] sm:$0xff] %v3597_v62  ;;  %v3619_v62 = vld [vmem:[#allocation28 + $0x58] sm:$0xff] }
 0x1e7   :  { %4938 = vst [vmem:[#allocation219_spill] sm:$0xff] %v3599_v63  ;;  %v3639_v63 = vld [vmem:[#allocation28 + $0xa8] sm:$0xff] }
 0x1e8   :  { %4939 = vst [vmem:[#allocation220_spill] sm:$0xff] %v3601_v2  ;;  %v3637_v2 = vld [vmem:[#allocation28 + $0xa0] sm:$0xff] }
 0x1e9   :  { %4940 = vst [vmem:[#allocation221_spill] sm:$0xff] %v3603_v54  ;;  %v3633_v54 = vld [vmem:[#allocation28 + $0x90] sm:$0xff] }
 0x1ea   :  { %4941 = vst [vmem:[#allocation222_spill] sm:$0xff] %v3605_v56  ;;  %v3627_v56 = vld [vmem:[#allocation28 + $0x78] sm:$0xff] }
 0x1eb   :  { %4942 = vst [vmem:[#allocation223_spill] sm:$0xff] %v3607_v0  ;;  %v3647_v0 = vld [vmem:[#allocation28 + $0xc8] sm:$0xff] }
 0x1ec   :  { %4943 = vst [vmem:[#allocation224_spill] sm:$0xff] %v3609_v37  ;;  %v3645_v37 = vld [vmem:[#allocation28 + $0xc0] sm:$0xff] }
 0x1ed   :  { %4944 = vst [vmem:[#allocation225_spill] sm:$0xff] %v3611_v58  ;;  %v3641_v58 = vld [vmem:[#allocation28 + $0xb0] sm:$0xff] }
 0x1ee   :  { %4945 = vst [vmem:[#allocation226_spill] sm:$0xff] %v3613_v60  ;;  %v3635_v60 = vld [vmem:[#allocation28 + $0x98] sm:$0xff] }
 0x1ef   :  { %4946 = vst [vmem:[#allocation227_spill] sm:$0xff] %v3615_v59  ;;  %v3655_v59 = vld [vmem:[#allocation28 + $0xe8] sm:$0xff] }
 0x1f0   :  { %4947 = vst [vmem:[#allocation228_spill] sm:$0xff] %v3617_v57  ;;  %v3653_v57 = vld [vmem:[#allocation28 + $0xe0] sm:$0xff] }
 0x1f1   :  { %4948 = vst [vmem:[#allocation229_spill] sm:$0xff] %v3619_v62  ;;  %v3649_v62 = vld [vmem:[#allocation28 + $0xd0] sm:$0xff] }
 0x1f2   :  { %4949 = vst [vmem:[#allocation230_spill] sm:$0xff] %v3621_v3  ;;  %v3643_v3 = vld [vmem:[#allocation28 + $0xb8] sm:$0xff] }
 0x1f3   :  { %4950 = vst [vmem:[#allocation231_spill] sm:$0xff] %v3623_v55  ;;  %v3663_v55 = vld [vmem:[#allocation28 + $0x108] sm:$0xff] }
 0x1f4   :  { %4951 = vst [vmem:[#allocation232_spill] sm:$0xff] %v3625_v1  ;;  %v3661_v1 = vld [vmem:[#allocation28 + $0x100] sm:$0xff] }
 0x1f5   :  { %4952 = vst [vmem:[#allocation233_spill] sm:$0xff] %v3627_v56  ;;  %v3657_v56 = vld [vmem:[#allocation28 + $0xf0] sm:$0xff] }
 0x1f6   :  { %4953 = vst [vmem:[#allocation234_spill] sm:$0xff] %v3629_v61  ;;  %v3651_v61 = vld [vmem:[#allocation28 + $0xd8] sm:$0xff] }
 0x1f7   :  { %4954 = vst [vmem:[#allocation235_spill] sm:$0xff] %v3631_v20  ;;  %v3671_v20 = vld [vmem:[#allocation28 + $0x128] sm:$0xff] }
 0x1f8   :  { %4955 = vst [vmem:[#allocation236_spill] sm:$0xff] %v3633_v54  ;;  %v3669_v54 = vld [vmem:[#allocation28 + $0x120] sm:$0xff] }
 0x1f9   :  { %4956 = vst [vmem:[#allocation237_spill] sm:$0xff] %v3635_v60  ;;  %v3665_v60 = vld [vmem:[#allocation28 + $0x110] sm:$0xff] }
 0x1fa   :  { %4957 = vst [vmem:[#allocation238_spill] sm:$0xff] %v3637_v2  ;;  %v3659_v2 = vld [vmem:[#allocation28 + $0xf8] sm:$0xff] }
 0x1fb   :  { %4958 = vst [vmem:[#allocation239_spill] sm:$0xff] %v3639_v63  ;;  %v3679_v63 = vld [vmem:[#allocation28 + $0x148] sm:$0xff] }
 0x1fc   :  { %4959 = vst [vmem:[#allocation240_spill] sm:$0xff] %v3641_v58  ;;  %v3677_v58 = vld [vmem:[#allocation28 + $0x140] sm:$0xff] }
 0x1fd   :  { %4960 = vst [vmem:[#allocation241_spill] sm:$0xff] %v3643_v3  ;;  %v3673_v3 = vld [vmem:[#allocation28 + $0x130] sm:$0xff] }
 0x1fe   :  { %4961 = vst [vmem:[#allocation242_spill] sm:$0xff] %v3645_v37  ;;  %v3667_v37 = vld [vmem:[#allocation28 + $0x118] sm:$0xff] }
 0x1ff   :  { %4962 = vst [vmem:[#allocation243_spill] sm:$0xff] %v3647_v0  ;;  %v3687_v0 = vld [vmem:[#allocation28 + $0x168] sm:$0xff] }
 0x200   :  { %4963 = vst [vmem:[#allocation244_spill] sm:$0xff] %v3649_v62  ;;  %v3685_v62 = vld [vmem:[#allocation28 + $0x160] sm:$0xff] }
 0x201   :  { %4964 = vst [vmem:[#allocation245_spill] sm:$0xff] %v3651_v61  ;;  %v3681_v61 = vld [vmem:[#allocation28 + $0x150] sm:$0xff] }
 0x202   :  { %4965 = vst [vmem:[#allocation246_spill] sm:$0xff] %v3653_v57  ;;  %v3675_v57 = vld [vmem:[#allocation28 + $0x138] sm:$0xff] }
 0x203   :  { %4966 = vst [vmem:[#allocation247_spill] sm:$0xff] %v3655_v59  ;;  %v3695_v59 = vld [vmem:[#allocation28 + $0x188] sm:$0xff] }
 0x204   :  { %4967 = vst [vmem:[#allocation248_spill] sm:$0xff] %v3657_v56  ;;  %v3693_v56 = vld [vmem:[#allocation28 + $0x180] sm:$0xff] }
 0x205   :  { %4968 = vst [vmem:[#allocation249_spill] sm:$0xff] %v3659_v2  ;;  %v3689_v2 = vld [vmem:[#allocation28 + $0x170] sm:$0xff] }
 0x206   :  { %4969 = vst [vmem:[#allocation250_spill] sm:$0xff] %v3661_v1  ;;  %v3683_v1 = vld [vmem:[#allocation28 + $0x158] sm:$0xff] }
 0x207   :  { %4970 = vst [vmem:[#allocation251_spill] sm:$0xff] %v3663_v55  ;;  %v3703_v55 = vld [vmem:[#allocation28 + $0x1a8] sm:$0xff] }
 0x208   :  { %4971 = vst [vmem:[#allocation252_spill] sm:$0xff] %v3665_v60  ;;  %v3701_v60 = vld [vmem:[#allocation28 + $0x1a0] sm:$0xff] }
 0x209   :  { %4972 = vst [vmem:[#allocation253_spill] sm:$0xff] %v3667_v37  ;;  %v3699_v37 = vld [vmem:[#allocation28 + $0x198] sm:$0xff] }
 0x20a   :  { %4973 = vst [vmem:[#allocation254_spill] sm:$0xff] %v3669_v54  ;;  %v3691_v54 = vld [vmem:[#allocation28 + $0x178] sm:$0xff] }
 0x20b   :  { %4974 = vst [vmem:[#allocation255_spill] sm:$0xff] %v3671_v20  ;;  %v3711_v20 = vld [vmem:[#allocation28 + $0x1c8] sm:$0xff] }
 0x20c   :  { %4975 = vst [vmem:[#allocation256_spill] sm:$0xff] %v3673_v3  ;;  %v3709_v3 = vld [vmem:[#allocation28 + $0x1c0] sm:$0xff] }
 0x20d   :  { %4976 = vst [vmem:[#allocation257_spill] sm:$0xff] %v3675_v57  ;;  %v3707_v57 = vld [vmem:[#allocation28 + $0x1b8] sm:$0xff] }
 0x20e   :  { %4977 = vst [vmem:[#allocation258_spill] sm:$0xff] %v3677_v58  ;;  %v3697_v58 = vld [vmem:[#allocation28 + $0x190] sm:$0xff] }
 0x20f   :  { %4978 = vst [vmem:[#allocation259_spill] sm:$0xff] %v3679_v63  ;;  %v3719_v63 = vld [vmem:[#allocation28 + $0x1e8] sm:$0xff] }
 0x210   :  { %4979 = vst [vmem:[#allocation260_spill] sm:$0xff] %v3681_v61  ;;  %v3717_v61 = vld [vmem:[#allocation28 + $0x1e0] sm:$0xff] }
 0x211   :  { %4980 = vst [vmem:[#allocation261_spill] sm:$0xff] %v3683_v1  ;;  %v3715_v1 = vld [vmem:[#allocation28 + $0x1d8] sm:$0xff] }
 0x212   :  { %4981 = vst [vmem:[#allocation262_spill] sm:$0xff] %v3685_v62  ;;  %v3705_v62 = vld [vmem:[#allocation28 + $0x1b0] sm:$0xff] }
 0x213   :  { %4982 = vst [vmem:[#allocation263_spill] sm:$0xff] %v3687_v0  ;;  %v3728_v0 = vld [vmem:[#allocation29] sm:$0xff] }
 0x214   :  { %4983 = vst [vmem:[#allocation264_spill] sm:$0xff] %v3689_v2  ;;  %v3726_v2 = vld [vmem:[%s4986_s18] sm:$0xf] }
 0x215   :  { %4984 = vst [vmem:[#allocation265_spill] sm:$0xff] %v3691_v54  ;;  %v3721_v54 = vld [vmem:[#allocation28 + $0x1f0] sm:$0xff] }
 0x216   :  { %4985 = vst [vmem:[#allocation266_spill] sm:$0xff] %v3693_v56  ;;  %v3713_v56 = vld [vmem:[#allocation28 + $0x1d0] sm:$0xff] }
 0x217   :  { %4987 = vst [vmem:[#allocation267_spill] sm:$0xff] %v3695_v59  ;;  %v3736_v59 = vld [vmem:[#allocation29 + $0x20] sm:$0xff] }
 0x218   :  { %4988 = vst [vmem:[#allocation268_spill] sm:$0xff] %v3697_v58  ;;  %v3734_v58 = vld [vmem:[#allocation29 + $0x18] sm:$0xff] }
 0x219   :  { %4989 = vst [vmem:[#allocation269_spill] sm:$0xff] %v3699_v37  ;;  %v3730_v37 = vld [vmem:[#allocation29 + $0x8] sm:$0xff] }
 0x21a   :  { %4990 = vst [vmem:[#allocation270_spill] sm:$0xff] %v3701_v60  ;;  %v3723_v60 = vld [vmem:[#allocation28 + $0x1f8] sm:$0xff] }
 0x21b   :  { %4991 = vst [vmem:[#allocation271_spill] sm:$0xff] %v3703_v55  ;;  %v3744_v55 = vld [vmem:[#allocation29 + $0x40] sm:$0xff] }
 0x21c   :  { %4992 = vst [vmem:[#allocation272_spill] sm:$0xff] %v3705_v62  ;;  %v3742_v62 = vld [vmem:[#allocation29 + $0x38] sm:$0xff] }
 0x21d   :  { %4993 = vst [vmem:[#allocation273_spill] sm:$0xff] %v3707_v57  ;;  %v3738_v57 = vld [vmem:[#allocation29 + $0x28] sm:$0xff] }
 0x21e   :  { %4994 = vst [vmem:[#allocation274_spill] sm:$0xff] %v3709_v3  ;;  %v3732_v3 = vld [vmem:[#allocation29 + $0x10] sm:$0xff] }
 0x21f   :  { %4995 = vst [vmem:[#allocation275_spill] sm:$0xff] %v3711_v20 }
 0x220   :  { %4996 = vst [vmem:[#allocation276_spill] sm:$0xff] %v3715_v1  ;;  %v3746_v1 = vld [vmem:[#allocation29 + $0x48] sm:$0xff] }
 0x221   :  { %4997 = vst [vmem:[#allocation277_spill] sm:$0xff] %v3717_v61  ;;  %v3740_v61 = vld [vmem:[#allocation29 + $0x30] sm:$0xff] }
 0x222   :  { %4998 = vst [vmem:[#allocation278_spill] sm:$0xff] %v3726_v2  ;;  %v3748_v2 = vld [vmem:[#allocation29 + $0x50] sm:$0xff] }
 0x223   :  { %4999 = vst [vmem:[#allocation279_spill] sm:$0xff] %v3728_v0  ;;  %v3750_v0 = vld [vmem:[#allocation29 + $0x58] sm:$0xff] }
 0x224   :  { %5000 = vst [vmem:[#allocation280_spill] sm:$0xff] %v3730_v37  ;;  %v3752_v37 = vld [vmem:[#allocation29 + $0x60] sm:$0xff] }
 0x225   :  { %5001 = vst [vmem:[#allocation281_spill] sm:$0xff] %v3732_v3  ;;  %v3754_v3 = vld [vmem:[#allocation29 + $0x68] sm:$0xff] }
 0x226   :  { %5002 = vst [vmem:[#allocation282_spill] sm:$0xff] %v3734_v58  ;;  %v3756_v58 = vld [vmem:[#allocation29 + $0x70] sm:$0xff] }
 0x227   :  { %5003 = vst [vmem:[#allocation283_spill] sm:$0xff] %v3736_v59  ;;  %v3758_v59 = vld [vmem:[#allocation29 + $0x78] sm:$0xff] }
 0x228   :  { %5004 = vst [vmem:[#allocation284_spill] sm:$0xff] %v3738_v57  ;;  %v3760_v57 = vld [vmem:[#allocation29 + $0x80] sm:$0xff] }
 0x229   :  { %5005 = vst [vmem:[#allocation285_spill] sm:$0xff] %v3740_v61  ;;  %v3762_v61 = vld [vmem:[#allocation29 + $0x88] sm:$0xff] }
 0x22a   :  { %5006 = vst [vmem:[#allocation286_spill] sm:$0xff] %v3742_v62  ;;  %v3764_v62 = vld [vmem:[#allocation29 + $0x90] sm:$0xff] }
 0x22b   :  { %5007 = vst [vmem:[#allocation287_spill] sm:$0xff] %v3744_v55  ;;  %v3766_v55 = vld [vmem:[#allocation29 + $0x98] sm:$0xff] }
 0x22c   :  { %5008 = vst [vmem:[#allocation288_spill] sm:$0xff] %v3746_v1  ;;  %v3768_v1 = vld [vmem:[#allocation29 + $0xa0] sm:$0xff] }
 0x22d   :  { %5009 = vst [vmem:[#allocation289_spill] sm:$0xff] %v3748_v2  ;;  %v3770_v2 = vld [vmem:[#allocation29 + $0xa8] sm:$0xff] }
 0x22e   :  { %5010 = vst [vmem:[#allocation290_spill] sm:$0xff] %v3750_v0  ;;  %v3772_v0 = vld [vmem:[#allocation29 + $0xb0] sm:$0xff] }
 0x22f   :  { %5011 = vst [vmem:[#allocation291_spill] sm:$0xff] %v3752_v37  ;;  %v3774_v37 = vld [vmem:[#allocation29 + $0xb8] sm:$0xff] }
 0x230   :  { %5012 = vst [vmem:[#allocation292_spill] sm:$0xff] %v3754_v3  ;;  %v3776_v3 = vld [vmem:[#allocation29 + $0xc0] sm:$0xff] }
 0x231   :  { %5013 = vst [vmem:[#allocation293_spill] sm:$0xff] %v3756_v58  ;;  %v3778_v58 = vld [vmem:[#allocation29 + $0xc8] sm:$0xff] }
 0x232   :  { %5014 = vst [vmem:[#allocation294_spill] sm:$0xff] %v3758_v59  ;;  %v3780_v59 = vld [vmem:[#allocation29 + $0xd0] sm:$0xff] }
 0x233   :  { %5015 = vst [vmem:[#allocation295_spill] sm:$0xff] %v3760_v57  ;;  %v3782_v57 = vld [vmem:[#allocation29 + $0xd8] sm:$0xff] }
 0x234   :  { %5016 = vst [vmem:[#allocation296_spill] sm:$0xff] %v3762_v61  ;;  %v3784_v61 = vld [vmem:[#allocation29 + $0xe0] sm:$0xff] }
 0x235   :  { %5017 = vst [vmem:[#allocation297_spill] sm:$0xff] %v3764_v62  ;;  %v3786_v62 = vld [vmem:[#allocation29 + $0xe8] sm:$0xff] }
 0x236   :  { %5018 = vst [vmem:[#allocation298_spill] sm:$0xff] %v3766_v55  ;;  %v3788_v55 = vld [vmem:[#allocation29 + $0xf0] sm:$0xff] }
 0x237   :  { %5019 = vst [vmem:[#allocation299_spill] sm:$0xff] %v3768_v1  ;;  %v3790_v1 = vld [vmem:[#allocation29 + $0xf8] sm:$0xff] }
 0x238   :  { %5020 = vst [vmem:[#allocation300_spill] sm:$0xff] %v3770_v2  ;;  %v3792_v2 = vld [vmem:[#allocation29 + $0x100] sm:$0xff] }
 0x239   :  { %5021 = vst [vmem:[#allocation301_spill] sm:$0xff] %v3772_v0  ;;  %v3794_v0 = vld [vmem:[#allocation29 + $0x108] sm:$0xff] }
 0x23a   :  { %5022 = vst [vmem:[#allocation302_spill] sm:$0xff] %v3774_v37  ;;  %v3796_v37 = vld [vmem:[#allocation29 + $0x110] sm:$0xff] }
 0x23b   :  { %5023 = vst [vmem:[#allocation303_spill] sm:$0xff] %v3776_v3  ;;  %v3798_v3 = vld [vmem:[#allocation29 + $0x118] sm:$0xff] }
 0x23c   :  { %5024 = vst [vmem:[#allocation304_spill] sm:$0xff] %v3778_v58  ;;  %v3800_v58 = vld [vmem:[#allocation29 + $0x120] sm:$0xff] }
 0x23d   :  { %5025 = vst [vmem:[#allocation305_spill] sm:$0xff] %v3780_v59  ;;  %v3802_v59 = vld [vmem:[#allocation29 + $0x128] sm:$0xff] }
 0x23e   :  { %5026 = vst [vmem:[#allocation306_spill] sm:$0xff] %v3782_v57  ;;  %v3804_v57 = vld [vmem:[#allocation29 + $0x130] sm:$0xff] }
 0x23f   :  { %5027 = vst [vmem:[#allocation307_spill] sm:$0xff] %v3784_v61  ;;  %v3806_v61 = vld [vmem:[#allocation29 + $0x138] sm:$0xff] }
 0x240   :  { %5028 = vst [vmem:[#allocation308_spill] sm:$0xff] %v3786_v62  ;;  %v3808_v62 = vld [vmem:[#allocation29 + $0x140] sm:$0xff] }
 0x241   :  { %5029 = vst [vmem:[#allocation309_spill] sm:$0xff] %v3788_v55  ;;  %v3810_v55 = vld [vmem:[#allocation29 + $0x148] sm:$0xff] }
 0x242   :  { %5030 = vst [vmem:[#allocation310_spill] sm:$0xff] %v3790_v1  ;;  %v3812_v1 = vld [vmem:[#allocation29 + $0x150] sm:$0xff] }
 0x243   :  { %5031 = vst [vmem:[#allocation311_spill] sm:$0xff] %v3792_v2  ;;  %v3814_v2 = vld [vmem:[#allocation29 + $0x158] sm:$0xff] }
 0x244   :  { %5032 = vst [vmem:[#allocation312_spill] sm:$0xff] %v3794_v0  ;;  %v3816_v0 = vld [vmem:[#allocation29 + $0x160] sm:$0xff] }
 0x245   :  { %5033 = vst [vmem:[#allocation313_spill] sm:$0xff] %v3796_v37  ;;  %v3818_v37 = vld [vmem:[#allocation29 + $0x168] sm:$0xff] }
 0x246   :  { %5034 = vst [vmem:[#allocation314_spill] sm:$0xff] %v3798_v3  ;;  %v3820_v3 = vld [vmem:[#allocation29 + $0x170] sm:$0xff] }
 0x247   :  { %5035 = vst [vmem:[#allocation315_spill] sm:$0xff] %v3800_v58  ;;  %v3822_v58 = vld [vmem:[#allocation29 + $0x178] sm:$0xff] }
 0x248   :  { %5036 = vst [vmem:[#allocation316_spill] sm:$0xff] %v3802_v59  ;;  %v3824_v59 = vld [vmem:[#allocation29 + $0x180] sm:$0xff] }
 0x249   :  { %5037 = vst [vmem:[#allocation317_spill] sm:$0xff] %v3804_v57  ;;  %v3826_v57 = vld [vmem:[#allocation29 + $0x188] sm:$0xff] }
 0x24a   :  { %5038 = vst [vmem:[#allocation318_spill] sm:$0xff] %v3806_v61  ;;  %v3828_v61 = vld [vmem:[#allocation29 + $0x190] sm:$0xff] }
 0x24b   :  { %5039 = vst [vmem:[#allocation319_spill] sm:$0xff] %v3808_v62  ;;  %v3830_v62 = vld [vmem:[#allocation29 + $0x198] sm:$0xff] }
 0x24c   :  { %5040 = vst [vmem:[#allocation320_spill] sm:$0xff] %v3810_v55  ;;  %v3832_v55 = vld [vmem:[#allocation29 + $0x1a0] sm:$0xff] }
 0x24d   :  { %5041 = vst [vmem:[#allocation321_spill] sm:$0xff] %v3812_v1  ;;  %v3834_v1 = vld [vmem:[#allocation29 + $0x1a8] sm:$0xff] }
 0x24e   :  { %5042 = vst [vmem:[#allocation322_spill] sm:$0xff] %v3814_v2  ;;  %v3836_v2 = vld [vmem:[#allocation29 + $0x1b0] sm:$0xff] }
 0x24f   :  { %5043 = vst [vmem:[#allocation323_spill] sm:$0xff] %v3816_v0  ;;  %v3838_v0 = vld [vmem:[#allocation29 + $0x1b8] sm:$0xff] }
 0x250   :  { %5044 = vst [vmem:[#allocation324_spill] sm:$0xff] %v3818_v37  ;;  %v3840_v37 = vld [vmem:[#allocation29 + $0x1c0] sm:$0xff] }
 0x251   :  { %5045 = vst [vmem:[#allocation325_spill] sm:$0xff] %v3820_v3  ;;  %v3842_v3 = vld [vmem:[#allocation29 + $0x1c8] sm:$0xff] }
 0x252   :  { %5046 = vst [vmem:[#allocation326_spill] sm:$0xff] %v3822_v58  ;;  %v3844_v58 = vld [vmem:[#allocation29 + $0x1d0] sm:$0xff] }
 0x253   :  { %5047 = vst [vmem:[#allocation327_spill] sm:$0xff] %v3824_v59  ;;  %v3846_v59 = vld [vmem:[#allocation29 + $0x1d8] sm:$0xff] }
 0x254   :  { %5048 = vst [vmem:[#allocation328_spill] sm:$0xff] %v3826_v57  ;;  %v3848_v57 = vld [vmem:[#allocation29 + $0x1e0] sm:$0xff] }
 0x255   :  { %5049 = vst [vmem:[#allocation329_spill] sm:$0xff] %v3828_v61  ;;  %v3850_v61 = vld [vmem:[#allocation29 + $0x1e8] sm:$0xff] }
 0x256   :  { %5050 = vst [vmem:[#allocation330_spill] sm:$0xff] %v3830_v62  ;;  %v3852_v62 = vld [vmem:[#allocation29 + $0x1f0] sm:$0xff] }
 0x257   :  { %5051 = vst [vmem:[#allocation331_spill] sm:$0xff] %v3832_v55  ;;  %v3854_v55 = vld [vmem:[#allocation29 + $0x1f8] sm:$0xff] }
 0x258   :  { %5052 = vst [vmem:[#allocation332_spill] sm:$0xff] %v3834_v1  ;;  %v3856_v1 = vld [vmem:[#allocation31] sm:$0xff] }
 0x259   :  { %5053 = vst [vmem:[#allocation333_spill] sm:$0xff] %v3836_v2  ;;  %v3858_v2 = vld [vmem:[#allocation31 + $0x8] sm:$0xff] }
 0x25a   :  { %5054 = vst [vmem:[#allocation334_spill] sm:$0xff] %v3838_v0  ;;  %v3860_v0 = vld [vmem:[#allocation31 + $0x10] sm:$0xff] }
 0x25b   :  { %5055 = vst [vmem:[#allocation335_spill] sm:$0xff] %v3840_v37  ;;  %v3862_v37 = vld [vmem:[#allocation31 + $0x18] sm:$0xff] }
 0x25c   :  { %5056 = vst [vmem:[#allocation336_spill] sm:$0xff] %v3842_v3  ;;  %v3864_v3 = vld [vmem:[#allocation31 + $0x20] sm:$0xff] }
 0x25d   :  { %5057 = vst [vmem:[#allocation337_spill] sm:$0xff] %v3844_v58  ;;  %v3866_v58 = vld [vmem:[#allocation31 + $0x28] sm:$0xff] }
 0x25e   :  { %5058 = vst [vmem:[#allocation338_spill] sm:$0xff] %v3846_v59  ;;  %v3868_v59 = vld [vmem:[#allocation31 + $0x30] sm:$0xff] }
 0x25f   :  { %5059 = vst [vmem:[#allocation339_spill] sm:$0xff] %v3848_v57  ;;  %v3870_v57 = vld [vmem:[#allocation31 + $0x38] sm:$0xff] }
 0x260   :  { %5060 = vst [vmem:[#allocation340_spill] sm:$0xff] %v3850_v61  ;;  %v3872_v61 = vld [vmem:[#allocation31 + $0x40] sm:$0xff] }
 0x261   :  { %5061 = vst [vmem:[#allocation341_spill] sm:$0xff] %v3852_v62  ;;  %v3874_v62 = vld [vmem:[#allocation31 + $0x48] sm:$0xff] }
 0x262   :  { %5062 = vst [vmem:[#allocation342_spill] sm:$0xff] %v3854_v55  ;;  %v3876_v55 = vld [vmem:[#allocation31 + $0x50] sm:$0xff] }
 0x263   :  { %5063 = vst [vmem:[#allocation343_spill] sm:$0xff] %v3856_v1  ;;  %v3878_v1 = vld [vmem:[#allocation31 + $0x58] sm:$0xff] }
 0x264   :  { %5064 = vst [vmem:[#allocation344_spill] sm:$0xff] %v3858_v2  ;;  %v3880_v2 = vld [vmem:[#allocation31 + $0x60] sm:$0xff] }
 0x265   :  { %5065 = vst [vmem:[#allocation345_spill] sm:$0xff] %v3860_v0  ;;  %v3882_v0 = vld [vmem:[#allocation31 + $0x68] sm:$0xff] }
 0x266   :  { %5066 = vst [vmem:[#allocation346_spill] sm:$0xff] %v3862_v37  ;;  %v3884_v37 = vld [vmem:[#allocation31 + $0x70] sm:$0xff] }
 0x267   :  { %5067 = vst [vmem:[#allocation347_spill] sm:$0xff] %v3864_v3  ;;  %v3886_v3 = vld [vmem:[#allocation31 + $0x78] sm:$0xff] }
 0x268   :  { %5068 = vst [vmem:[#allocation348_spill] sm:$0xff] %v3866_v58  ;;  %v3888_v58 = vld [vmem:[#allocation31 + $0x80] sm:$0xff] }
 0x269   :  { %5069 = vst [vmem:[#allocation349_spill] sm:$0xff] %v3868_v59  ;;  %v3890_v59 = vld [vmem:[#allocation31 + $0x88] sm:$0xff] }
 0x26a   :  { %5070 = vst [vmem:[#allocation350_spill] sm:$0xff] %v3870_v57  ;;  %v3892_v57 = vld [vmem:[#allocation31 + $0x90] sm:$0xff] }
 0x26b   :  { %5071 = vst [vmem:[#allocation351_spill] sm:$0xff] %v3872_v61  ;;  %v3894_v61 = vld [vmem:[#allocation31 + $0x98] sm:$0xff] }
 0x26c   :  { %5072 = vst [vmem:[#allocation352_spill] sm:$0xff] %v3874_v62  ;;  %v3896_v62 = vld [vmem:[#allocation31 + $0xa0] sm:$0xff] }
 0x26d   :  { %5073 = vst [vmem:[#allocation353_spill] sm:$0xff] %v3876_v55  ;;  %v3898_v55 = vld [vmem:[#allocation31 + $0xa8] sm:$0xff] }
 0x26e   :  { %5074 = vst [vmem:[#allocation354_spill] sm:$0xff] %v3878_v1  ;;  %v3900_v1 = vld [vmem:[#allocation31 + $0xb0] sm:$0xff] }
 0x26f   :  { %5075 = vst [vmem:[#allocation355_spill] sm:$0xff] %v3880_v2  ;;  %v3902_v2 = vld [vmem:[#allocation31 + $0xb8] sm:$0xff] }
 0x270   :  { %5076 = vst [vmem:[#allocation356_spill] sm:$0xff] %v3882_v0  ;;  %v3904_v0 = vld [vmem:[#allocation31 + $0xc0] sm:$0xff] }
 0x271   :  { %5077 = vst [vmem:[#allocation357_spill] sm:$0xff] %v3884_v37  ;;  %v3906_v37 = vld [vmem:[#allocation31 + $0xc8] sm:$0xff] }
 0x272   :  { %5078 = vst [vmem:[#allocation358_spill] sm:$0xff] %v3886_v3  ;;  %v3908_v3 = vld [vmem:[#allocation31 + $0xd0] sm:$0xff] }
 0x273   :  { %5079 = vst [vmem:[#allocation359_spill] sm:$0xff] %v3888_v58  ;;  %v3910_v58 = vld [vmem:[#allocation31 + $0xd8] sm:$0xff] }
 0x274   :  { %5080 = vst [vmem:[#allocation360_spill] sm:$0xff] %v3890_v59  ;;  %v3912_v59 = vld [vmem:[#allocation31 + $0xe0] sm:$0xff] }
 0x275   :  { %5081 = vst [vmem:[#allocation361_spill] sm:$0xff] %v3892_v57  ;;  %v3914_v57 = vld [vmem:[#allocation31 + $0xe8] sm:$0xff] }
 0x276   :  { %5082 = vst [vmem:[#allocation362_spill] sm:$0xff] %v3894_v61  ;;  %v3916_v61 = vld [vmem:[#allocation31 + $0xf0] sm:$0xff] }
 0x277   :  { %5083 = vst [vmem:[#allocation363_spill] sm:$0xff] %v3896_v62  ;;  %v3918_v62 = vld [vmem:[#allocation31 + $0xf8] sm:$0xff] }
 0x278   :  { %5084 = vst [vmem:[#allocation364_spill] sm:$0xff] %v3898_v55  ;;  %v3920_v55 = vld [vmem:[#allocation31 + $0x100] sm:$0xff] }
 0x279   :  { %5085 = vst [vmem:[#allocation365_spill] sm:$0xff] %v3900_v1  ;;  %v3922_v1 = vld [vmem:[#allocation31 + $0x108] sm:$0xff] }
 0x27a   :  { %5086 = vst [vmem:[#allocation366_spill] sm:$0xff] %v3902_v2  ;;  %v3924_v2 = vld [vmem:[#allocation31 + $0x110] sm:$0xff] }
 0x27b   :  { %5087 = vst [vmem:[#allocation367_spill] sm:$0xff] %v3904_v0  ;;  %v3926_v0 = vld [vmem:[#allocation31 + $0x118] sm:$0xff] }
 0x27c   :  { %5088 = vst [vmem:[#allocation368_spill] sm:$0xff] %v3906_v37  ;;  %v3928_v37 = vld [vmem:[#allocation31 + $0x120] sm:$0xff] }
 0x27d   :  { %5089 = vst [vmem:[#allocation369_spill] sm:$0xff] %v3908_v3  ;;  %v3930_v3 = vld [vmem:[#allocation31 + $0x128] sm:$0xff] }
 0x27e   :  { %5090 = vst [vmem:[#allocation370_spill] sm:$0xff] %v3910_v58  ;;  %v3932_v58 = vld [vmem:[#allocation31 + $0x130] sm:$0xff] }
 0x27f   :  { %5091 = vst [vmem:[#allocation371_spill] sm:$0xff] %v3912_v59  ;;  %v3934_v59 = vld [vmem:[#allocation31 + $0x138] sm:$0xff] }
 0x280   :  { %5092 = vst [vmem:[#allocation372_spill] sm:$0xff] %v3914_v57  ;;  %v3936_v57 = vld [vmem:[#allocation31 + $0x140] sm:$0xff] }
 0x281   :  { %5093 = vst [vmem:[#allocation373_spill] sm:$0xff] %v3916_v61  ;;  %v3938_v61 = vld [vmem:[#allocation31 + $0x148] sm:$0xff] }
 0x282   :  { %5094 = vst [vmem:[#allocation374_spill] sm:$0xff] %v3918_v62  ;;  %v3940_v62 = vld [vmem:[#allocation31 + $0x150] sm:$0xff] }
 0x283   :  { %5095 = vst [vmem:[#allocation375_spill] sm:$0xff] %v3920_v55  ;;  %v3942_v55 = vld [vmem:[#allocation31 + $0x158] sm:$0xff] }
 0x284   :  { %5096 = vst [vmem:[#allocation376_spill] sm:$0xff] %v3922_v1  ;;  %v3944_v1 = vld [vmem:[#allocation31 + $0x160] sm:$0xff] }
 0x285   :  { %5097 = vst [vmem:[#allocation377_spill] sm:$0xff] %v3924_v2  ;;  %v3946_v2 = vld [vmem:[#allocation31 + $0x168] sm:$0xff] }
 0x286   :  { %5098 = vst [vmem:[#allocation378_spill] sm:$0xff] %v3926_v0  ;;  %v2932_v0 = vmov 0.0  }
 0x287   :  { %5099 = vst [vmem:[#allocation379_spill] sm:$0xff] %v3928_v37  ;;  %v3948_v37 = vld [vmem:[#allocation31 + $0x170] sm:$0xff] }
 0x288   :  { %5100 = vst [vmem:[#allocation380_spill] sm:$0xff] %v3930_v3  ;;  %v3950_v3 = vld [vmem:[#allocation31 + $0x178] sm:$0xff] }
 0x289   :  { %5101 = vst [vmem:[#allocation381_spill] sm:$0xff] %v3932_v58  ;;  %v3952_v58 = vld [vmem:[#allocation31 + $0x180] sm:$0xff] }
 0x28a   :  { %5102 = vst [vmem:[#allocation382_spill] sm:$0xff] %v3934_v59  ;;  %v3954_v59 = vld [vmem:[#allocation31 + $0x188] sm:$0xff] }
 0x28b   :  { %5103 = vst [vmem:[#allocation383_spill] sm:$0xff] %v3936_v57  ;;  %v3962_v57 = vld [vmem:[#allocation31 + $0x1a8] sm:$0xff] }
 0x28c   :  { %5104 = vst [vmem:[#allocation384_spill] sm:$0xff] %v3938_v61  ;;  %v3956_v61 = vld [vmem:[#allocation31 + $0x190] sm:$0xff] }
 0x28d   :  { %5105 = vst [vmem:[#allocation385_spill] sm:$0xff] %v3940_v62  ;;  %v3958_v62 = vld [vmem:[#allocation31 + $0x198] sm:$0xff] }
 0x28e   :  { %5106 = vst [vmem:[#allocation386_spill] sm:$0xff] %v3942_v55  ;;  %v3960_v55 = vld [vmem:[#allocation31 + $0x1a0] sm:$0xff] }
 0x28f   :  { %5107 = vst [vmem:[#allocation387_spill] sm:$0xff] %v3944_v1  ;;  %v3970_v1 = vld [vmem:[#allocation31 + $0x1c8] sm:$0xff] }
 0x290   :  { %5108 = vst [vmem:[#allocation388_spill] sm:$0xff] %v3946_v2  ;;  %v3964_v2 = vld [vmem:[#allocation31 + $0x1b0] sm:$0xff] }
 0x291   :  { %878 = vst [vmem:[#allocation2] sm:$0xff] %v2932_v0 }
 0x292   :  { %5109 = vst [vmem:[#allocation389_spill] sm:$0xff] %v3948_v37  ;;  %v3966_v37 = vld [vmem:[#allocation31 + $0x1b8] sm:$0xff] }
 0x293   :  { %5110 = vst [vmem:[#allocation390_spill] sm:$0xff] %v3950_v3  ;;  %v3968_v3 = vld [vmem:[#allocation31 + $0x1c0] sm:$0xff] }
 0x294   :  { %5111 = vst [vmem:[#allocation391_spill] sm:$0xff] %v3952_v58  ;;  %v3972_v58 = vld [vmem:[#allocation31 + $0x1d0] sm:$0xff] }
 0x295   :  { %879 = vst [vmem:[#allocation2 + $0x8] sm:$0xff] %v2932_v0 }
 0x296   :  { %5112 = vst [vmem:[#allocation392_spill] sm:$0xff] %v3954_v59  ;;  %v3974_v59 = vld [vmem:[#allocation31 + $0x1d8] sm:$0xff] }
 0x297   :  { %5113 = vst [vmem:[#allocation393_spill] sm:$0xff] %v3956_v61  ;;  %v3976_v61 = vld [vmem:[#allocation31 + $0x1e0] sm:$0xff] }
 0x298   :  { %5114 = vst [vmem:[#allocation394_spill] sm:$0xff] %v3958_v62  ;;  %v3978_v62 = vld [vmem:[#allocation31 + $0x1e8] sm:$0xff] }
 0x299   :  { %886 = vst [vmem:[#allocation4 + $0x8] sm:$0xff] %v2932_v0 }
 0x29a   :  { %5115 = vst [vmem:[#allocation395_spill] sm:$0xff] %v3960_v55  ;;  %v3980_v55 = vld [vmem:[#allocation31 + $0x1f0] sm:$0xff] }
 0x29b   :  { %5116 = vst [vmem:[#allocation396_spill] sm:$0xff] %v3962_v57  ;;  %v3982_v57 = vld [vmem:[#allocation31 + $0x1f8] sm:$0xff] }
 0x29c   :  { %5117 = vst [vmem:[#allocation397_spill] sm:$0xff] %v3964_v2  ;;  %v3984_v2 = vld [vmem:[#allocation32] sm:$0xff] }
 0x29d   :  { %887 = vst [vmem:[#allocation4] sm:$0xff] %v2932_v0  ;;  %v3986_v0 = vld [vmem:[#allocation32 + $0x8] sm:$0xff] }
 0x29e   :  { %5118 = vst [vmem:[#allocation398_spill] sm:$0xff] %v3966_v37  ;;  %v3988_v37 = vld [vmem:[#allocation32 + $0x10] sm:$0xff] }
 0x29f   :  { %5119 = vst [vmem:[#allocation399_spill] sm:$0xff] %v3968_v3  ;;  %v3990_v3 = vld [vmem:[#allocation32 + $0x18] sm:$0xff] }
 0x2a0   :  { %5120 = vst [vmem:[#allocation400_spill] sm:$0xff] %v3970_v1  ;;  %v3992_v1 = vld [vmem:[#allocation32 + $0x20] sm:$0xff] }
 0x2a1   :  { %5121 = vst [vmem:[#allocation401_spill] sm:$0xff] %v3972_v58  ;;  %v3994_v58 = vld [vmem:[#allocation32 + $0x28] sm:$0xff] }
 0x2a2   :  { %5122 = vst [vmem:[#allocation402_spill] sm:$0xff] %v3974_v59  ;;  %v3996_v59 = vld [vmem:[#allocation32 + $0x30] sm:$0xff] }
 0x2a3   :  { %5123 = vst [vmem:[#allocation403_spill] sm:$0xff] %v3976_v61  ;;  %v3998_v61 = vld [vmem:[#allocation32 + $0x38] sm:$0xff] }
 0x2a4   :  { %5124 = vst [vmem:[#allocation404_spill] sm:$0xff] %v3978_v62  ;;  %v4000_v62 = vld [vmem:[#allocation32 + $0x40] sm:$0xff] }
 0x2a5   :  { %5125 = vst [vmem:[#allocation405_spill] sm:$0xff] %v3980_v55  ;;  %v4002_v55 = vld [vmem:[#allocation32 + $0x48] sm:$0xff] }
 0x2a6   :  { %5126 = vst [vmem:[#allocation406_spill] sm:$0xff] %v3982_v57  ;;  %v4004_v57 = vld [vmem:[#allocation32 + $0x50] sm:$0xff] }
 0x2a7   :  { %5127 = vst [vmem:[#allocation407_spill] sm:$0xff] %v3984_v2  ;;  %v4006_v2 = vld [vmem:[#allocation32 + $0x58] sm:$0xff] }
 0x2a8   :  { %5128 = vst [vmem:[#allocation408_spill] sm:$0xff] %v3986_v0  ;;  %v4008_v0 = vld [vmem:[#allocation32 + $0x60] sm:$0xff] }
 0x2a9   :  { %5129 = vst [vmem:[#allocation409_spill] sm:$0xff] %v3988_v37  ;;  %v4010_v37 = vld [vmem:[#allocation32 + $0x68] sm:$0xff] }
 0x2aa   :  { %5130 = vst [vmem:[#allocation410_spill] sm:$0xff] %v3990_v3  ;;  %v4012_v3 = vld [vmem:[#allocation32 + $0x70] sm:$0xff] }
 0x2ab   :  { %5131 = vst [vmem:[#allocation411_spill] sm:$0xff] %v3992_v1  ;;  %v4014_v1 = vld [vmem:[#allocation32 + $0x78] sm:$0xff] }
 0x2ac   :  { %5132 = vst [vmem:[#allocation412_spill] sm:$0xff] %v3994_v58  ;;  %v4016_v58 = vld [vmem:[#allocation32 + $0x80] sm:$0xff] }
 0x2ad   :  { %5133 = vst [vmem:[#allocation413_spill] sm:$0xff] %v3996_v59  ;;  %v4018_v59 = vld [vmem:[#allocation32 + $0x88] sm:$0xff] }
 0x2ae   :  { %5134 = vst [vmem:[#allocation414_spill] sm:$0xff] %v3998_v61  ;;  %v4020_v61 = vld [vmem:[#allocation32 + $0x90] sm:$0xff] }
 0x2af   :  { %5135 = vst [vmem:[#allocation415_spill] sm:$0xff] %v4000_v62  ;;  %v4022_v62 = vld [vmem:[#allocation32 + $0x98] sm:$0xff] }
 0x2b0   :  { %5136 = vst [vmem:[#allocation416_spill] sm:$0xff] %v4002_v55  ;;  %v4024_v55 = vld [vmem:[#allocation32 + $0xa0] sm:$0xff] }
 0x2b1   :  { %5137 = vst [vmem:[#allocation417_spill] sm:$0xff] %v4004_v57  ;;  %v4026_v57 = vld [vmem:[#allocation32 + $0xa8] sm:$0xff] }
 0x2b2   :  { %5138 = vst [vmem:[#allocation418_spill] sm:$0xff] %v4006_v2  ;;  %v4028_v2 = vld [vmem:[#allocation32 + $0xb0] sm:$0xff] }
 0x2b3   :  { %5139 = vst [vmem:[#allocation419_spill] sm:$0xff] %v4008_v0  ;;  %v4030_v0 = vld [vmem:[#allocation32 + $0xb8] sm:$0xff] }
 0x2b4   :  { %5140 = vst [vmem:[#allocation420_spill] sm:$0xff] %v4010_v37  ;;  %v4032_v37 = vld [vmem:[#allocation32 + $0xc0] sm:$0xff] }
 0x2b5   :  { %5141 = vst [vmem:[#allocation421_spill] sm:$0xff] %v4012_v3  ;;  %v4034_v3 = vld [vmem:[#allocation32 + $0xc8] sm:$0xff] }
 0x2b6   :  { %5142 = vst [vmem:[#allocation422_spill] sm:$0xff] %v4014_v1  ;;  %v4036_v1 = vld [vmem:[#allocation32 + $0xd0] sm:$0xff] }
 0x2b7   :  { %5143 = vst [vmem:[#allocation423_spill] sm:$0xff] %v4016_v58  ;;  %v4038_v58 = vld [vmem:[#allocation32 + $0xd8] sm:$0xff] }
 0x2b8   :  { %5144 = vst [vmem:[#allocation424_spill] sm:$0xff] %v4018_v59  ;;  %v4040_v59 = vld [vmem:[#allocation32 + $0xe0] sm:$0xff] }
 0x2b9   :  { %5145 = vst [vmem:[#allocation425_spill] sm:$0xff] %v4020_v61  ;;  %v4042_v61 = vld [vmem:[#allocation32 + $0xe8] sm:$0xff] }
 0x2ba   :  { %5146 = vst [vmem:[#allocation426_spill] sm:$0xff] %v4022_v62  ;;  %v4044_v62 = vld [vmem:[#allocation32 + $0xf0] sm:$0xff] }
 0x2bb   :  { %5147 = vst [vmem:[#allocation427_spill] sm:$0xff] %v4024_v55  ;;  %v4046_v55 = vld [vmem:[#allocation32 + $0xf8] sm:$0xff] }
 0x2bc   :  { %5148 = vst [vmem:[#allocation428_spill] sm:$0xff] %v4026_v57  ;;  %v4048_v57 = vld [vmem:[#allocation32 + $0x100] sm:$0xff] }
 0x2bd   :  { %5149 = vst [vmem:[#allocation429_spill] sm:$0xff] %v4028_v2  ;;  %v4050_v2 = vld [vmem:[#allocation32 + $0x108] sm:$0xff] }
 0x2be   :  { %5150 = vst [vmem:[#allocation430_spill] sm:$0xff] %v4030_v0  ;;  %v4052_v0 = vld [vmem:[#allocation32 + $0x110] sm:$0xff] }
 0x2bf   :  { %5151 = vst [vmem:[#allocation431_spill] sm:$0xff] %v4032_v37  ;;  %v4054_v37 = vld [vmem:[#allocation32 + $0x118] sm:$0xff] }
 0x2c0   :  { %5152 = vst [vmem:[#allocation432_spill] sm:$0xff] %v4034_v3  ;;  %v4056_v3 = vld [vmem:[#allocation32 + $0x120] sm:$0xff] }
 0x2c1   :  { %5153 = vst [vmem:[#allocation433_spill] sm:$0xff] %v4036_v1  ;;  %v4058_v1 = vld [vmem:[#allocation32 + $0x128] sm:$0xff] }
 0x2c2   :  { %5154 = vst [vmem:[#allocation434_spill] sm:$0xff] %v4038_v58  ;;  %v4060_v58 = vld [vmem:[#allocation32 + $0x130] sm:$0xff] }
 0x2c3   :  { %5155 = vst [vmem:[#allocation435_spill] sm:$0xff] %v4040_v59  ;;  %v4062_v59 = vld [vmem:[#allocation32 + $0x138] sm:$0xff] }
 0x2c4   :  { %5156 = vst [vmem:[#allocation436_spill] sm:$0xff] %v4042_v61  ;;  %v4064_v61 = vld [vmem:[#allocation32 + $0x140] sm:$0xff] }
 0x2c5   :  { %5157 = vst [vmem:[#allocation437_spill] sm:$0xff] %v4044_v62  ;;  %v4066_v62 = vld [vmem:[#allocation32 + $0x148] sm:$0xff] }
 0x2c6   :  { %5158 = vst [vmem:[#allocation438_spill] sm:$0xff] %v4046_v55  ;;  %v4068_v55 = vld [vmem:[#allocation32 + $0x150] sm:$0xff] }
 0x2c7   :  { %5159 = vst [vmem:[#allocation439_spill] sm:$0xff] %v4048_v57  ;;  %v4070_v57 = vld [vmem:[#allocation32 + $0x158] sm:$0xff] }
 0x2c8   :  { %5160 = vst [vmem:[#allocation440_spill] sm:$0xff] %v4050_v2  ;;  %v4072_v2 = vld [vmem:[#allocation32 + $0x160] sm:$0xff] }
 0x2c9   :  { %5161 = vst [vmem:[#allocation441_spill] sm:$0xff] %v4052_v0  ;;  %v4074_v0 = vld [vmem:[#allocation32 + $0x168] sm:$0xff] }
 0x2ca   :  { %5162 = vst [vmem:[#allocation442_spill] sm:$0xff] %v4054_v37  ;;  %v4076_v37 = vld [vmem:[#allocation32 + $0x170] sm:$0xff] }
 0x2cb   :  { %5163 = vst [vmem:[#allocation443_spill] sm:$0xff] %v4056_v3  ;;  %v4078_v3 = vld [vmem:[#allocation32 + $0x178] sm:$0xff] }
 0x2cc   :  { %5164 = vst [vmem:[#allocation444_spill] sm:$0xff] %v4058_v1  ;;  %v4080_v1 = vld [vmem:[#allocation32 + $0x180] sm:$0xff] }
 0x2cd   :  { %5165 = vst [vmem:[#allocation445_spill] sm:$0xff] %v4060_v58  ;;  %v4084_v58 = vld [vmem:[#allocation32 + $0x190] sm:$0xff] }
 0x2ce   :  { %5166 = vst [vmem:[#allocation446_spill] sm:$0xff] %v4062_v59  ;;  %v4082_v59 = vld [vmem:[#allocation32 + $0x188] sm:$0xff] }
 0x2cf   :  { %5167 = vst [vmem:[#allocation447_spill] sm:$0xff] %v4064_v61  ;;  %v4092_v61 = vld [vmem:[#allocation32 + $0x1b0] sm:$0xff] }
 0x2d0   :  { %5168 = vst [vmem:[#allocation448_spill] sm:$0xff] %v4066_v62  ;;  %v4086_v62 = vld [vmem:[#allocation32 + $0x198] sm:$0xff] }
 0x2d1   :  { %5169 = vst [vmem:[#allocation449_spill] sm:$0xff] %v4068_v55  ;;  %v4088_v55 = vld [vmem:[#allocation32 + $0x1a0] sm:$0xff] }
 0x2d2   :  { %5170 = vst [vmem:[#allocation450_spill] sm:$0xff] %v4070_v57  ;;  %v4090_v57 = vld [vmem:[#allocation32 + $0x1a8] sm:$0xff] }
 0x2d3   :  { %5171 = vst [vmem:[#allocation451_spill] sm:$0xff] %v4072_v2  ;;  %v4100_v2 = vld [vmem:[#allocation32 + $0x1d0] sm:$0xff] }
 0x2d4   :  { %5172 = vst [vmem:[#allocation452_spill] sm:$0xff] %v4074_v0  ;;  %v4094_v0 = vld [vmem:[#allocation32 + $0x1b8] sm:$0xff] }
 0x2d5   :  { %5173 = vst [vmem:[#allocation453_spill] sm:$0xff] %v4076_v37  ;;  %v4096_v37 = vld [vmem:[#allocation32 + $0x1c0] sm:$0xff] }
 0x2d6   :  { %5174 = vst [vmem:[#allocation454_spill] sm:$0xff] %v4078_v3  ;;  %v4098_v3 = vld [vmem:[#allocation32 + $0x1c8] sm:$0xff] }
 0x2d7   :  { %5175 = vst [vmem:[#allocation455_spill] sm:$0xff] %v4080_v1  ;;  %v4102_v1 = vld [vmem:[#allocation32 + $0x1d8] sm:$0xff] }
 0x2d8   :  { %5177 = vst [vmem:[#allocation456_spill] sm:$0xff] %v4082_v59  ;;  %v4104_v59 = vld [vmem:[#allocation32 + $0x1e0] sm:$0xff] }
 0x2d9   :  { %5178 = vst [vmem:[#allocation457_spill] sm:$0xff] %v4084_v58  ;;  %v4106_v58 = vld [vmem:[#allocation32 + $0x1e8] sm:$0xff] }
 0x2da   :  { %5179 = vst [vmem:[#allocation458_spill] sm:$0xff] %v4086_v62  ;;  %v4108_v62 = vld [vmem:[#allocation32 + $0x1f0] sm:$0xff] }
 0x2db   :  { %5180 = vst [vmem:[#allocation459_spill] sm:$0xff] %v4088_v55  ;;  %v4110_v55 = vld [vmem:[#allocation32 + $0x1f8] sm:$0xff] }
 0x2dc   :  { %5181 = vst [vmem:[#allocation460_spill] sm:$0xff] %v4090_v57  ;;  %v4113_v57 = vld [vmem:[%s5176_s19] sm:$0xf] }
 0x2dd   :  { %5182 = vst [vmem:[#allocation461_spill] sm:$0xff] %v4092_v61  ;;  %v2218_v61 = vld [vmem:[#allocation10] ss:$0 sm:$0xff] }
 0x2de   :  { %5183 = vst [vmem:[#allocation462_spill] sm:$0xff] %v4094_v0  ;;  %v2219_v0 = vld [vmem:[#allocation11] ss:$0 sm:$0xff] }
 0x2df   :  { %5184 = vst [vmem:[#allocation463_spill] sm:$0xff] %v4098_v3 }
 0x2e0   :  { %5185 = vst [vmem:[#allocation464_spill] sm:$0xff] %v4100_v2 }
 0x2e1   :  { %5186 = vst [vmem:[#allocation465_spill] sm:$0xff] %v4102_v1 }
 0x2e2   :  { %876 = vst [vmem:[#allocation39] sm:$0xff] %v2218_v61 }
 0x2e3   :  { %877 = vst [vmem:[#allocation39 + $0x8] sm:$0xff] %v2218_v61 }
 0x2e4   :  { %884 = vst [vmem:[#allocation3 + $0x8] sm:$0xff] %v2219_v0 }
 0x2e5   :  { %885 = vst [vmem:[#allocation3] sm:$0xff] %v2219_v0 }
 0x2e6 LB: > { %v5188_v19 = vld [vmem:[#allocation86_spill] sm:$0xff]  ;;  %927 = vmatpush.msra.mxu1 %v3326_v36  ;;  %955 = vmatpush.msra.mxu2 %v3360_v53  ;;  %v5189_v18 = vld [vmem:[#allocation85_spill] sm:$0xff]  ;;  %v5190_v17 = vld [vmem:[#allocation84_spill] sm:$0xff]  ;;  %vm984_vm0 = vcmask 130048   ;;  %s893_s14 = sadd.s32 1, %s2873_s14   ;;  %s2873_s14 = sphi %s4115_s14, %s893_s14  }
 0x2e7   : > { %v5187_v2 = vld [vmem:[#allocation464_spill] sm:$0xff]  ;;  %899 = vmatpush.msra.mxu0 %v5188_v19  ;;  %v5191_v16 = vld [vmem:[#allocation83_spill] sm:$0xff]  ;;  %v5193_v15 = vld [vmem:[#allocation82_spill] sm:$0xff]  ;;  %p890_p7 = scmp.ge.s32.totalorder %s893_s14, 26  }
 0x2e8   : > { %928 = vmatpush.msra.mxu1 %v3324_v35  ;;  %956 = vmatpush.msra.mxu2 %v3358_v52  ;;  %v5192_v33 = vld [vmem:[#allocation100_spill] sm:$0xff]  ;;  %v5194_v32 = vld [vmem:[#allocation99_spill] sm:$0xff]  ;;  %v5195_v14 = vld [vmem:[#allocation81_spill] sm:$0xff]  ;;  %s5592_s2 = sld [smem:[#allocation65_spill]] (%p890_p7)  ;;  %s2933_s11 = smov (%p890_p7), [#allocation39]  }
 0x2e9   : > { %900 = vmatpush.msra.mxu0 %v5189_v18  ;;  %v5196_v31 = vld [vmem:[#allocation98_spill] sm:$0xff]  ;;  %v5197_v13 = vld [vmem:[#allocation80_spill] sm:$0xff]  ;;  %v5198_v30 = vld [vmem:[#allocation97_spill] sm:$0xff]  ;;  %s5593_s29 = sld [smem:[#allocation66_spill]] (%p890_p7)  ;;  %s2029_s0 = sshll.u32 (%p890_p7), %s2933_s11, 4  ;;  %s2030_s0 = int_to_ptr.vmem [resolvable:$true] %s2029_s0 }
 0x2ea   : > { %929 = vmatpush.msra.mxu1 %v3322_v34  ;;  %957 = vmatpush.msra.mxu2 %v3356_v51  ;;  %v5199_v12 = vld [vmem:[#allocation79_spill] sm:$0xff]  ;;  %v5200_v29 = vld [vmem:[#allocation96_spill] sm:$0xff]  ;;  %v5201_v11 = vld [vmem:[#allocation78_spill] sm:$0xff]  ;;  %s2031_s20 = sshll.u32 (%p890_p7), %s3093_s6, 4  ;;  %s2809_s28 = scalar_lea.hbm (%p890_p7), %s3093_s6, 16  ;;  %s2032_s20 = int_to_ptr.hbm [resolvable:$true] %s2031_s20 }
 0x2eb   : > { %901 = vmatpush.msra.mxu0 %v5190_v17  ;;  %v5202_v28 = vld [vmem:[#allocation95_spill] sm:$0xff]  ;;  %v5203_v10 = vld [vmem:[#allocation77_spill] sm:$0xff]  ;;  %v5204_v27 = vld [vmem:[#allocation94_spill] sm:$0xff]  ;;  %s2805_s5 = sshra.s32 (%p890_p7), %s2032_s20, 4  ;;  %s2806_s5 = int_to_ptr.hbm [resolvable:$true] %s2805_s5 }
 0x2ec   : > { %930 = vmatpush.msra.mxu1 %v5192_v33  ;;  %958 = vmatpush.msra.mxu2 %v3354_v50  ;;  %v5205_v9 = vld [vmem:[#allocation76_spill] sm:$0xff]  ;;  %v5206_v26 = vld [vmem:[#allocation93_spill] sm:$0xff]  ;;  %v5207_v8 = vld [vmem:[#allocation75_spill] sm:$0xff]  ;;  %s2807_s10 = scalar_lea.hbm (%p890_p7), %s2806_s5, 16  ;;  %p2810_p9 = scmp.lt.s32.totalorder (%p890_p7), %s2806_s5, %s3093_s6 }
 0x2ed   : > { %902 = vmatpush.msra.mxu0 %v5191_v16  ;;  %v5208_v25 = vld [vmem:[#allocation92_spill] sm:$0xff]  ;;  %v5209_v7 = vld [vmem:[#allocation74_spill] sm:$0xff]  ;;  %v5210_v24 = vld [vmem:[#allocation91_spill] sm:$0xff]  ;;  %p2808_p8 = scmp.ne.s32.totalorder (%p890_p7), %s2806_s5, %s2807_s10  ;;  %p2811_p10 = scmp.lt.s32.totalorder (%p890_p7), %s2809_s28, %s2807_s10 }
 0x2ee   : > { %931 = vmatpush.msra.mxu1 %v5194_v32  ;;  %959 = vmatpush.msra.mxu2 %v3352_v49  ;;  %v5211_v6 = vld [vmem:[#allocation73_spill] sm:$0xff]  ;;  %v5212_v23 = vld [vmem:[#allocation90_spill] sm:$0xff]  ;;  %v5213_v5 = vld [vmem:[#allocation72_spill] sm:$0xff] }
 0x2ef   : > { %903 = vmatpush.msra.mxu0 %v5193_v15  ;;  %v4163_v61 = vld [vmem:[#allocation39] sm:$0xff]  ;;  %v5215_v4 = vld [vmem:[#allocation71_spill] sm:$0xff]  ;;  %v5216_v21 = vld [vmem:[#allocation88_spill] sm:$0xff]  ;;  %p2812_p11 = por (%p890_p7), %p2811_p10, %p2810_p9 }
 0x2f0   : > { %932 = vmatpush.msra.mxu1 %v5196_v31  ;;  %960 = vmatpush.msra.mxu2 %v3350_v48  ;;  %v5214_v22 = vld [vmem:[#allocation89_spill] sm:$0xff]  ;;  %v5217_v20 = vld [vmem:[#allocation275_spill] sm:$0xff]  ;;  %v5218_v0 = vld [vmem:[#allocation276_spill] sm:$0xff] }
 0x2f1   : > { %904 = vmatpush.msra.mxu0 %v5195_v14  ;;  %v5234_v14 = vld [vmem:[#allocation251_spill] sm:$0xff]  ;;  %v5280_v17 = vld [vmem:[#allocation208_spill] sm:$0xff]  ;;  %v5313_v18 = vld [vmem:[#allocation70_spill] sm:$0xff]  ;;  %p2813_p12 = pnand (%p890_p7), %p2812_p11, %p2808_p8 }
 0x2f2   : > { %933 = vmatpush.msra.mxu1 %v5198_v30  ;;  %961 = vmatpush.msra.mxu2 %v3348_v47  ;;  %v5525_v1 = vld [vmem:[#allocation465_spill] sm:$0xff]  ;;  %v5575_v3 = vld [vmem:[#allocation463_spill] sm:$0xff]  ;;  %v1886_v34 = vld [vmem:[#allocation34 + $0x48] sm:$0xff] (%p890_p7) }
 0x2f3   : > { %905 = vmatpush.msra.mxu0 %v5197_v13  ;;  %v5228_v13 = vld [vmem:[#allocation259_spill] sm:$0xff]  ;;  %v1900_v47 = vld [vmem:[#allocation35 + $0x30] sm:$0xff] (%p890_p7)  ;;  %v1899_v49 = vld [vmem:[#allocation35 + $0x28] sm:$0xff] (%p890_p7) }
 0x2f4   : > { %934 = vmatpush.msra.mxu1 %v5200_v29  ;;  %962 = vmatpush.msra.mxu2 %v3346_v46  ;;  %v1906_v35 = vld [vmem:[#allocation35 + $0x60] sm:$0xff] (%p890_p7)  ;;  %v1880_v46 = vld [vmem:[#allocation34 + $0x18] sm:$0xff] (%p890_p7)  ;;  %v1879_v48 = vld [vmem:[#allocation34 + $0x10] sm:$0xff] (%p890_p7) }
 0x2f5   : > { %906 = vmatpush.msra.mxu0 %v5199_v12  ;;  %v5226_v12 = vld [vmem:[#allocation264_spill] sm:$0xff]  ;;  %v1885_v36 = vld [vmem:[#allocation34 + $0x40] sm:$0xff] (%p890_p7) }
 0x2f6   : > { %935 = vmatpush.msra.mxu1 %v5202_v28  ;;  %963 = vmatpush.msra.mxu2 %v3344_v45  ;;  %v1901_v45 = vld [vmem:[#allocation35 + $0x38] sm:$0xff] (%p890_p7)  ;;  %v1878_v50 = vld [vmem:[#allocation34 + $0x8] sm:$0xff] (%p890_p7)  ;;  %v1898_v51 = vld [vmem:[#allocation35 + $0x20] sm:$0xff] (%p890_p7) }
 0x2f7   : > { %907 = vmatpush.msra.mxu0 %v5201_v11  ;;  %v5225_v11 = vld [vmem:[#allocation263_spill] sm:$0xff] }
 0x2f8   : > { %936 = vmatpush.msra.mxu1 %v5204_v27  ;;  %964 = vmatpush.msra.mxu2 %v3342_v44  ;;  %v1881_v44 = vld [vmem:[#allocation34 + $0x20] sm:$0xff] (%p890_p7) }
 0x2f9   : > { %908 = vmatpush.msra.mxu0 %v5203_v10  ;;  %v5224_v10 = vld [vmem:[#allocation269_spill] sm:$0xff]  ;;  %v1877_v52 = vld [vmem:[#allocation34] sm:$0xff] (%p890_p7) }
 0x2fa   : > { %937 = vmatpush.msra.mxu1 %v5206_v26  ;;  %965 = vmatpush.msra.mxu2 %v3340_v43  ;;  %v1902_v43 = vld [vmem:[#allocation35 + $0x40] sm:$0xff] (%p890_p7) }
 0x2fb   : > { %909 = vmatpush.msra.mxu0 %v5205_v9  ;;  %v5223_v9 = vld [vmem:[#allocation268_spill] sm:$0xff] }
 0x2fc   : > { %938 = vmatpush.msra.mxu1 %v5208_v25  ;;  %966 = vmatpush.msra.mxu2 %v3338_v42  ;;  %v1882_v42 = vld [vmem:[#allocation34 + $0x28] sm:$0xff] (%p890_p7) }
 0x2fd   : > { %910 = vmatpush.msra.mxu0 %v5207_v8  ;;  %v5222_v8 = vld [vmem:[#allocation267_spill] sm:$0xff] }
 0x2fe   : > { %939 = vmatpush.msra.mxu1 %v5210_v24  ;;  %967 = vmatpush.msra.mxu2 %v3336_v41  ;;  %v1903_v41 = vld [vmem:[#allocation35 + $0x48] sm:$0xff] (%p890_p7) }
 0x2ff   : > { %911 = vmatpush.msra.mxu0 %v5209_v7  ;;  %v5221_v7 = vld [vmem:[#allocation273_spill] sm:$0xff] }
 0x300   : > { %940 = vmatpush.msra.mxu1 %v5212_v23  ;;  %968 = vmatpush.msra.mxu2 %v3334_v40  ;;  %v1883_v40 = vld [vmem:[#allocation34 + $0x30] sm:$0xff] (%p890_p7) }
 0x301   : > { %912 = vmatpush.msra.mxu0 %v5211_v6  ;;  %v5220_v6 = vld [vmem:[#allocation272_spill] sm:$0xff] }
 0x302   : > { %941 = vmatpush.msra.mxu1 %v5214_v22  ;;  %969 = vmatpush.msra.mxu2 %v3332_v39  ;;  %v1904_v39 = vld [vmem:[#allocation35 + $0x50] sm:$0xff] (%p890_p7) }
 0x303   : > { %913 = vmatpush.msra.mxu0 %v5213_v5  ;;  %v4177_v5 = vld [vmem:[#allocation39 + $0x8] sm:$0xff] }
 0x304   : > { %942 = vmatpush.msra.mxu1 %v5216_v21  ;;  %970 = vmatpush.msra.mxu2 %v3330_v38  ;;  %v1884_v38 = vld [vmem:[#allocation34 + $0x38] sm:$0xff] (%p890_p7) }
 0x305   : > { %914 = vmatpush.msra.mxu0 %v5215_v4  ;;  %v5219_v4 = vld [vmem:[#allocation271_spill] sm:$0xff] }
 0x306   : > { %915 = vmatmul.f32.vlgmr.msra.gmra.mxu0 %v4163_v61  ;;  %1050 = vmatpush.msrb.mxu1 %v3721_v54 }
 0x307   : > { %1027 = vmatpush.msrb.mxu0 %v3719_v63  ;;  %1073 = vmatpush.msrb.mxu2 %v3723_v60  ;;  %v1925_v60 = vld [vmem:[#allocation37 + $0x70] sm:$0xff] (%p890_p7)  ;;  %v1923_v63 = vld [vmem:[#allocation37 + $0x60] sm:$0xff] (%p890_p7) }
 0x308   : > { %1051 = vmatpush.msrb.mxu1 %v3713_v56  ;;  %v1896_v56 = vld [vmem:[#allocation35 + $0x10] sm:$0xff] (%p890_p7) }
 0x309   : > { %1028 = vmatpush.msrb.mxu0 %v5217_v20  ;;  %1074 = vmatpush.msrb.mxu2 %v5218_v0  ;;  %v5227_v0 = vld [vmem:[#allocation265_spill] sm:$0xff] }
 0x30a   : > { %1052 = vmatpush.msrb.mxu1 %v5220_v6  ;;  %v5230_v6 = vld [vmem:[#allocation261_spill] sm:$0xff] }
 0x30b   : > { %1029 = vmatpush.msrb.mxu0 %v5219_v4  ;;  %1075 = vmatpush.msrb.mxu2 %v5221_v7  ;;  %v5229_v4 = vld [vmem:[#allocation260_spill] sm:$0xff]  ;;  %v5231_v7 = vld [vmem:[#allocation255_spill] sm:$0xff] }
 0x30c   : > { %1053 = vmatpush.msrb.mxu1 %v5223_v9  ;;  %v5233_v9 = vld [vmem:[#allocation257_spill] sm:$0xff] }
 0x30d   : > { %1030 = vmatpush.msrb.mxu0 %v5222_v8  ;;  %1076 = vmatpush.msrb.mxu2 %v5224_v10  ;;  %v5232_v8 = vld [vmem:[#allocation256_spill] sm:$0xff] }
 0x30e   : > { %918 = vmatmul.f32.gmra.mxu0 %v4177_v5  ;;  %1054 = vmatpush.msrb.mxu1 %v5226_v12  ;;  %v5235_v10 = vld [vmem:[#allocation252_spill] sm:$0xff]  ;;  %v5237_v12 = vld [vmem:[#allocation247_spill] sm:$0xff] }
 0x30f   : > { %1031 = vmatpush.msrb.mxu0 %v5225_v11  ;;  %1077 = vmatpush.msrb.mxu2 %v5227_v0  ;;  %v5236_v11 = vld [vmem:[#allocation253_spill] sm:$0xff]  ;;  %v5238_v0 = vld [vmem:[#allocation248_spill] sm:$0xff] }
 0x310   : > { %1055 = vmatpush.msrb.mxu1 %v5229_v4  ;;  %v5240_v4 = vld [vmem:[#allocation243_spill] sm:$0xff] }
 0x311   : > { %1032 = vmatpush.msrb.mxu0 %v5228_v13  ;;  %1078 = vmatpush.msrb.mxu2 %v5230_v6  ;;  %v5239_v13 = vld [vmem:[#allocation249_spill] sm:$0xff]  ;;  %v5241_v6 = vld [vmem:[#allocation244_spill] sm:$0xff] }
 0x312   : > { %1056 = vmatpush.msrb.mxu1 %v5232_v8  ;;  %v5243_v8 = vld [vmem:[#allocation239_spill] sm:$0xff] }
 0x313   : > { %1033 = vmatpush.msrb.mxu0 %v5231_v7  ;;  %1079 = vmatpush.msrb.mxu2 %v5233_v9  ;;  %v5242_v7 = vld [vmem:[#allocation245_spill] sm:$0xff]  ;;  %v5244_v9 = vld [vmem:[#allocation240_spill] sm:$0xff] }
 0x314   : > { %1057 = vmatpush.msrb.mxu1 %v5235_v10  ;;  %v5246_v10 = vld [vmem:[#allocation235_spill] sm:$0xff] }
 0x315   : > { %1034 = vmatpush.msrb.mxu0 %v5234_v14  ;;  %1080 = vmatpush.msrb.mxu2 %v5236_v11  ;;  %v5245_v14 = vld [vmem:[#allocation241_spill] sm:$0xff]  ;;  %v5247_v11 = vld [vmem:[#allocation236_spill] sm:$0xff] }
 0x316   : > { %1058 = vmatpush.msrb.mxu1 %v5238_v0  ;;  %v5249_v0 = vld [vmem:[#allocation231_spill] sm:$0xff] }
 0x317   : > { %1035 = vmatpush.msrb.mxu0 %v5237_v12  ;;  %1081 = vmatpush.msrb.mxu2 %v5239_v13  ;;  %v5248_v12 = vld [vmem:[#allocation237_spill] sm:$0xff]  ;;  %v5250_v13 = vld [vmem:[#allocation232_spill] sm:$0xff] }
 0x318   : > { %1059 = vmatpush.msrb.mxu1 %v5241_v6  ;;  %v5252_v6 = vld [vmem:[#allocation227_spill] sm:$0xff] }
 0x319   : > { %1036 = vmatpush.msrb.mxu0 %v5240_v4  ;;  %1082 = vmatpush.msrb.mxu2 %v5242_v7  ;;  %v5251_v4 = vld [vmem:[#allocation233_spill] sm:$0xff]  ;;  %v5253_v7 = vld [vmem:[#allocation228_spill] sm:$0xff] }
 0x31a   : > { %1060 = vmatpush.msrb.mxu1 %v5244_v9  ;;  %v5255_v9 = vld [vmem:[#allocation223_spill] sm:$0xff] }
 0x31b   : > { %1037 = vmatpush.msrb.mxu0 %v5243_v8  ;;  %1083 = vmatpush.msrb.mxu2 %v5245_v14  ;;  %v5254_v8 = vld [vmem:[#allocation229_spill] sm:$0xff]  ;;  %v5256_v14 = vld [vmem:[#allocation224_spill] sm:$0xff] }
 0x31c   : > { %1061 = vmatpush.msrb.mxu1 %v5247_v11  ;;  %v5258_v11 = vld [vmem:[#allocation219_spill] sm:$0xff] }
 0x31d   : > { %1038 = vmatpush.msrb.mxu0 %v5246_v10  ;;  %1084 = vmatpush.msrb.mxu2 %v5248_v12  ;;  %v5257_v10 = vld [vmem:[#allocation225_spill] sm:$0xff]  ;;  %v5259_v12 = vld [vmem:[#allocation220_spill] sm:$0xff] }
 0x31e   : > { %1062 = vmatpush.msrb.mxu1 %v5250_v13  ;;  %v5261_v13 = vld [vmem:[#allocation215_spill] sm:$0xff] }
 0x31f   : > { %1039 = vmatpush.msrb.mxu0 %v5249_v0  ;;  %1085 = vmatpush.msrb.mxu2 %v5251_v4  ;;  %v5260_v0 = vld [vmem:[#allocation221_spill] sm:$0xff]  ;;  %v5262_v4 = vld [vmem:[#allocation211_spill] sm:$0xff] }
 0x320   : > { %1063 = vmatpush.msrb.mxu1 %v5253_v7  ;;  %v5264_v7 = vld [vmem:[#allocation203_spill] sm:$0xff] }
 0x321   : > { %1040 = vmatpush.msrb.mxu0 %v5252_v6  ;;  %1086 = vmatpush.msrb.mxu2 %v5254_v8  ;;  %v5263_v6 = vld [vmem:[#allocation207_spill] sm:$0xff] }
 0x322   : > { %1064 = vmatpush.msrb.mxu1 %v5256_v14  ;;  %v5265_v8 = vld [vmem:[#allocation199_spill] sm:$0xff] }
 0x323   : > { %1041 = vmatpush.msrb.mxu0 %v5255_v9  ;;  %1087 = vmatpush.msrb.mxu2 %v5257_v10  ;;  %v5266_v9 = vld [vmem:[#allocation195_spill] sm:$0xff] }
 0x324   : > { %1065 = vmatpush.msrb.mxu1 %v5259_v12  ;;  %v5267_v14 = vld [vmem:[#allocation191_spill] sm:$0xff] }
 0x325   : > { %1042 = vmatpush.msrb.mxu0 %v5258_v11  ;;  %1088 = vmatpush.msrb.mxu2 %v5260_v0  ;;  %v5268_v10 = vld [vmem:[#allocation187_spill] sm:$0xff] }
 0x326   : > { %v5269_v11 = vld [vmem:[#allocation183_spill] sm:$0xff] }
 0x327   : > { %1119 = vmatpush.msra.mxu0 %v5261_v13  ;;  %v5270_v12 = vld [vmem:[#allocation179_spill] sm:$0xff] }
 0x328   : > { %v5271_v0 = vld [vmem:[#allocation175_spill] sm:$0xff] }
 0x329   : > { %1120 = vmatpush.msra.mxu0 %v5262_v4  ;;  %v5272_v13 = vld [vmem:[#allocation171_spill] sm:$0xff] }
 0x32a   : > { %v5273_v4 = vld [vmem:[#allocation167_spill] sm:$0xff] }
 0x32b   : > { %1121 = vmatpush.msra.mxu0 %v5263_v6  ;;  %v5274_v6 = vld [vmem:[#allocation163_spill] sm:$0xff] }
 0x32d   : > { %1122 = vmatpush.msra.mxu0 %v5264_v7  ;;  %v5275_v7 = vld [vmem:[#allocation159_spill] sm:$0xff] }
 0x32f   : > { %1123 = vmatpush.msra.mxu0 %v5265_v8  ;;  %v5276_v8 = vld [vmem:[#allocation155_spill] sm:$0xff] }
 0x331   : > { %1124 = vmatpush.msra.mxu0 %v5266_v9  ;;  %v5277_v9 = vld [vmem:[#allocation87_spill] sm:$0xff] }
 0x333   : > { %1125 = vmatpush.msra.mxu0 %v5267_v14  ;;  %v897_v14 = vperm.slane %v5277_v9, 0  ;;  %v5284_v9 = vld [vmem:[#allocation192_spill] sm:$0xff] }
 0x335   : > { %1126 = vmatpush.msra.mxu0 %v5268_v10 }
 0x337   : > { %1127 = vmatpush.msra.mxu0 %v5269_v11  ;;  %v5278_v11 = vld [vmem:[#allocation216_spill] sm:$0xff] }
 0x339   : > { %1128 = vmatpush.msra.mxu0 %v5270_v12 }
 0x33b   : > { %1129 = vmatpush.msra.mxu0 %v5271_v0  ;;  %v5279_v0 = vld [vmem:[#allocation212_spill] sm:$0xff] }
 0x33d   : > { %1130 = vmatpush.msra.mxu0 %v5272_v13 }
 0x33f   : > { %1131 = vmatpush.msra.mxu0 %v5273_v4 }
 0x341   : > { %1132 = vmatpush.msra.mxu0 %v5274_v6  ;;  %v5281_v6 = vld [vmem:[#allocation204_spill] sm:$0xff] }
 0x343   : > { %1133 = vmatpush.msra.mxu0 %v5275_v7  ;;  %v5282_v7 = vld [vmem:[#allocation200_spill] sm:$0xff] }
 0x345   : > { %1134 = vmatpush.msra.mxu0 %v5276_v8  ;;  %v5283_v8 = vld [vmem:[#allocation196_spill] sm:$0xff] }
 0x383   : > { %v916_v15 = vpop.f32.mrf.mxu0 }
 0x384   : > { %v917_v10 = vadd.f32 %v916_v15, %v897_v14  ;;  %v5285_v15 = vld [vmem:[#allocation188_spill] sm:$0xff] }
 0x386   : > { %v922_v16 = vmax.f32 %v917_v10, 0.0  ;;  %v5287_v10 = vld [vmem:[#allocation180_spill] sm:$0xff] }
 0x388   : > { %943 = vmatmul.f32.vlgmr.msra.gmra.mxu1 %v922_v16  ;;  %v5286_v16 = vld [vmem:[#allocation184_spill] sm:$0xff] }
 0x389   : > { %1142 = vmatpush.msra.mxu1 %v5278_v11  ;;  %v5288_v11 = vld [vmem:[#allocation176_spill] sm:$0xff] }
 0x38b   : > { %v919_v12 = vpop.f32.mrf.mxu0  ;;  %1143 = vmatpush.msra.mxu1 %v5279_v0  ;;  %v5292_v0 = vld [vmem:[#allocation160_spill] sm:$0xff] }
 0x38c   : > { %v920_v13 = vadd.f32 %v919_v12, %v897_v14  ;;  %v5289_v14 = vld [vmem:[#allocation172_spill] sm:$0xff] }
 0x38d   : > { %1144 = vmatpush.msra.mxu1 %v5280_v17  ;;  %v5290_v17 = vld [vmem:[#allocation168_spill] sm:$0xff] }
 0x38e   : > { %v923_v4 = vmax.f32 %v920_v13, 0.0  ;;  %v5291_v12 = vld [vmem:[#allocation164_spill] sm:$0xff] }
 0x38f   : > { %1145 = vmatpush.msra.mxu1 %v5281_v6  ;;  %v5293_v13 = vld [vmem:[#allocation156_spill] sm:$0xff] }
 0x390   : > { %946 = vmatmul.f32.gmra.mxu1 %v923_v4  ;;  %v5294_v4 = vld [vmem:[#allocation101_spill] sm:$0xff] }
 0x391   : > { %1146 = vmatpush.msra.mxu1 %v5282_v7  ;;  %v925_v6 = vperm.slane %v5294_v4, 0  ;;  %v5301_v4 = vld [vmem:[#allocation193_spill] sm:$0xff] }
 0x393   : > { %1147 = vmatpush.msra.mxu1 %v5283_v8 }
 0x395   : > { %1148 = vmatpush.msra.mxu1 %v5284_v9 }
 0x397   : > { %1149 = vmatpush.msra.mxu1 %v5285_v15  ;;  %v5295_v15 = vld [vmem:[#allocation217_spill] sm:$0xff] }
 0x399   : > { %1150 = vmatpush.msra.mxu1 %v5286_v16 }
 0x39b   : > { %1151 = vmatpush.msra.mxu1 %v5287_v10  ;;  %v5296_v10 = vld [vmem:[#allocation213_spill] sm:$0xff] }
 0x39d   : > { %1152 = vmatpush.msra.mxu1 %v5288_v11 }
 0x39f   : > { %1153 = vmatpush.msra.mxu1 %v5289_v14  ;;  %v5297_v14 = vld [vmem:[#allocation209_spill] sm:$0xff] }
 0x3a1   : > { %1154 = vmatpush.msra.mxu1 %v5290_v17 }
 0x3a3   : > { %1155 = vmatpush.msra.mxu1 %v5291_v12  ;;  %v5298_v12 = vld [vmem:[#allocation205_spill] sm:$0xff] }
 0x3a5   : > { %1156 = vmatpush.msra.mxu1 %v5292_v0  ;;  %v5299_v0 = vld [vmem:[#allocation201_spill] sm:$0xff] }
 0x3a7   : > { %1157 = vmatpush.msra.mxu1 %v5293_v13  ;;  %v5300_v13 = vld [vmem:[#allocation197_spill] sm:$0xff] }
 0x405   : > { %v944_v7 = vpop.f32.mrf.mxu1 }
 0x406   : > { %v945_v8 = vadd.f32 %v944_v7, %v925_v6  ;;  %v5302_v7 = vld [vmem:[#allocation189_spill] sm:$0xff] }
 0x408   : > { %v950_v9 = vmax.f32 %v945_v8, 0.0  ;;  %v5303_v8 = vld [vmem:[#allocation185_spill] sm:$0xff] }
 0x40a   : > { %971 = vmatmul.f32.vlgmr.msra.gmra.mxu2 %v950_v9  ;;  %v5304_v9 = vld [vmem:[#allocation181_spill] sm:$0xff] }
 0x40b   : > { %1165 = vmatpush.msra.mxu2 %v5295_v15  ;;  %v5305_v15 = vld [vmem:[#allocation177_spill] sm:$0xff] }
 0x40d   : > { %v947_v16 = vpop.f32.mrf.mxu1  ;;  %1166 = vmatpush.msra.mxu2 %v5296_v10  ;;  %v5308_v10 = vld [vmem:[#allocation165_spill] sm:$0xff] }
 0x40e   : > { %v948_v11 = vadd.f32 %v947_v16, %v925_v6  ;;  %v5306_v6 = vld [vmem:[#allocation173_spill] sm:$0xff] }
 0x40f   : > { %1167 = vmatpush.msra.mxu2 %v5297_v14  ;;  %v5307_v16 = vld [vmem:[#allocation169_spill] sm:$0xff] }
 0x410   : > { %v951_v17 = vmax.f32 %v948_v11, 0.0  ;;  %v5309_v11 = vld [vmem:[#allocation161_spill] sm:$0xff] }
 0x411   : > { %1168 = vmatpush.msra.mxu2 %v5298_v12  ;;  %v5310_v14 = vld [vmem:[#allocation157_spill] sm:$0xff]  ;;  %v5311_v12 = vld [vmem:[#allocation102_spill] sm:$0xff] }
 0x412   : > { %974 = vmatmul.f32.gmra.mxu2 %v951_v17 }
 0x413   : > { %1169 = vmatpush.msra.mxu2 %v5299_v0  ;;  %v953_v0 = vperm.slane %v5311_v12, 0  ;;  %v5320_v12 = vld [vmem:[#allocation254_spill] sm:$0xff] }
 0x415   : > { %1170 = vmatpush.msra.mxu2 %v5300_v13 }
 0x417   : > { %1171 = vmatpush.msra.mxu2 %v5301_v4 }
 0x419   : > { %1172 = vmatpush.msra.mxu2 %v5302_v7 }
 0x41b   : > { %1173 = vmatpush.msra.mxu2 %v5303_v8 }
 0x41d   : > { %1174 = vmatpush.msra.mxu2 %v5304_v9  ;;  %v5312_v9 = vld [vmem:[#allocation69_spill] sm:$0xff] }
 0x41f   : > { %1175 = vmatpush.msra.mxu2 %v5305_v15  ;;  %v2097_v15 = vor.u32 %v5313_v18, %v5312_v9  ;;  %v5321_v18 = vld [vmem:[#allocation250_spill] sm:$0xff] }
 0x420   : > { %v5326_v9 = vld [vmem:[#allocation134_spill] sm:$0xff] }
 0x421   : > { %1176 = vmatpush.msra.mxu2 %v5306_v6  ;;  %v5314_v6 = vld [vmem:[#allocation277_spill] sm:$0xff] }
 0x423   : > { %1177 = vmatpush.msra.mxu2 %v5307_v16  ;;  %v5315_v16 = vld [vmem:[#allocation274_spill] sm:$0xff] }
 0x425   : > { %1178 = vmatpush.msra.mxu2 %v5308_v10  ;;  %v5316_v10 = vld [vmem:[#allocation270_spill] sm:$0xff] }
 0x427   : > { %1179 = vmatpush.msra.mxu2 %v5309_v11  ;;  %v5317_v11 = vld [vmem:[#allocation266_spill] sm:$0xff] }
 0x429   : > { %1180 = vmatpush.msra.mxu2 %v5310_v14  ;;  %v5318_v14 = vld [vmem:[#allocation262_spill] sm:$0xff] }
 0x48d   : > { %v972_v17 = vpop.f32.mrf.mxu2 }
 0x48e   : > { %v973_v4 = vadd.f32 %v972_v17, %v953_v0  ;;  %v5319_v17 = vld [vmem:[#allocation258_spill] sm:$0xff] }
 0x495   : > { %v975_v13 = vpop.f32.mrf.mxu2 }
 0x496   : > { %v976_v7 = vadd.f32 %v975_v13, %v953_v0  ;;  %v1002_v0 = vld [vmem:[#allocation3 + $0x8] sm:$0xff]  ;;  %v5322_v13 = vld [vmem:[#allocation246_spill] sm:$0xff] }
 0x497   : > { %1043 = vmatmul.f32.vlgmr.msrb.gmra.mxu0 %v1002_v0  ;;  %1066 = vmatmul.f32.vlgmr.msrb.gmra.mxu1 %v1002_v0 }
 0x498   : > { %v978_v8 = vpack.c.bf16 %v976_v7, %v973_v4  ;;  %1089 = vmatmul.f32.vlgmr.msrb.gmra.mxu2 %v1002_v0  ;;  %v5323_v4 = vld [vmem:[#allocation135_spill] sm:$0xff]  ;;  %v5324_v7 = vld [vmem:[#allocation152_spill] sm:$0xff] }
 0x499   : > { %1368 = vmatpush.msrb.mxu0 %v5323_v4  ;;  %1396 = vmatpush.msrb.mxu1 %v5324_v7  ;;  %v5336_v4 = vld [vmem:[#allocation131_spill] sm:$0xff]  ;;  %v5337_v7 = vld [vmem:[#allocation148_spill] sm:$0xff] }
 0x49a   : > { %995 = vmatpush.bf16.msra.mxu3 %v978_v8  ;;  %v5325_v8 = vld [vmem:[#allocation242_spill] sm:$0xff] }
 0x49b   : > { %1369 = vmatpush.msrb.mxu0 %v5326_v9  ;;  %v5339_v9 = vld [vmem:[#allocation130_spill] sm:$0xff] }
 0x49d   : > { %2098 = vmatmul.msk.bf16.vlgmr.msra.gmra.mxu3 %vm984_vm0, %v2097_v15  ;;  %v5327_v15 = vld [vmem:[#allocation151_spill] sm:$0xff] }
 0x49e   : > { %1004 = vmatpush.msrb.mxu3 %v5314_v6  ;;  %1397 = vmatpush.msrb.mxu1 %v5327_v15  ;;  %v5328_v6 = vld [vmem:[#allocation238_spill] sm:$0xff]  ;;  %v5340_v15 = vld [vmem:[#allocation147_spill] sm:$0xff] }
 0x4a0   : > { %1005 = vmatpush.msrb.mxu3 %v5315_v16  ;;  %v5329_v16 = vld [vmem:[#allocation133_spill] sm:$0xff] }
 0x4a1   : > { %1370 = vmatpush.msrb.mxu0 %v5329_v16  ;;  %v5342_v16 = vld [vmem:[#allocation129_spill] sm:$0xff] }
 0x4a2   : > { %1006 = vmatpush.msrb.mxu3 %v5316_v10  ;;  %v1003_v10 = vld [vmem:[#allocation3] sm:$0xff] }
 0x4a3   : > { %1046 = vmatmul.f32.gmra.mxu0 %v1003_v10  ;;  %1069 = vmatmul.f32.gmra.mxu1 %v1003_v10 }
 0x4a4   : > { %1007 = vmatpush.msrb.mxu3 %v5317_v11  ;;  %v5330_v11 = vld [vmem:[#allocation150_spill] sm:$0xff]  ;;  %1092 = vmatmul.f32.gmra.mxu2 %v1003_v10 }
 0x4a5   : > { %1398 = vmatpush.msrb.mxu1 %v5330_v11  ;;  %v5343_v11 = vld [vmem:[#allocation214_spill] sm:$0xff] }
 0x4a6   : > { %1008 = vmatpush.msrb.mxu3 %v5318_v14  ;;  %v5331_v14 = vld [vmem:[#allocation234_spill] sm:$0xff] }
 0x4a8   : > { %1009 = vmatpush.msrb.mxu3 %v5319_v17  ;;  %v5332_v17 = vld [vmem:[#allocation230_spill] sm:$0xff] }
 0x4aa   : > { %1010 = vmatpush.msrb.mxu3 %v5320_v12  ;;  %v5333_v12 = vld [vmem:[#allocation132_spill] sm:$0xff] }
 0x4ab   : > { %1371 = vmatpush.msrb.mxu0 %v5333_v12  ;;  %v5346_v12 = vld [vmem:[#allocation210_spill] sm:$0xff] }
 0x4ac   : > { %1011 = vmatpush.msrb.mxu3 %v5321_v18  ;;  %v5334_v18 = vld [vmem:[#allocation149_spill] sm:$0xff] }
 0x4ad   : > { %1399 = vmatpush.msrb.mxu1 %v5334_v18  ;;  %1372 = vmatpush.msrb.mxu0 %v5336_v4  ;;  %v5347_v18 = vld [vmem:[#allocation145_spill] sm:$0xff]  ;;  %v5349_v4 = vld [vmem:[#allocation206_spill] sm:$0xff] }
 0x4ae   : > { %1012 = vmatpush.msrb.mxu3 %v5322_v13  ;;  %v5335_v13 = vld [vmem:[#allocation226_spill] sm:$0xff] }
 0x4af   : > { %1400 = vmatpush.msrb.mxu1 %v5337_v7  ;;  %1373 = vmatpush.msrb.mxu0 %v5339_v9  ;;  %v5350_v7 = vld [vmem:[#allocation144_spill] sm:$0xff]  ;;  %v5352_v9 = vld [vmem:[#allocation202_spill] sm:$0xff] }
 0x4b0   : > { %1013 = vmatpush.msrb.mxu3 %v5325_v8  ;;  %v5338_v8 = vld [vmem:[#allocation222_spill] sm:$0xff] }
 0x4b1   : > { %1401 = vmatpush.msrb.mxu1 %v5340_v15  ;;  %1374 = vmatpush.msrb.mxu0 %v5342_v16  ;;  %v5353_v15 = vld [vmem:[#allocation143_spill] sm:$0xff]  ;;  %v5356_v16 = vld [vmem:[#allocation142_spill] sm:$0xff] }
 0x4b2   : > { %1014 = vmatpush.msrb.mxu3 %v5328_v6  ;;  %v5341_v6 = vld [vmem:[#allocation218_spill] sm:$0xff] }
 0x4b4   : > { %1015 = vmatpush.msrb.mxu3 %v5331_v14  ;;  %v5344_v14 = vld [vmem:[#allocation146_spill] sm:$0xff] }
 0x4b5   : > { %1402 = vmatpush.msrb.mxu1 %v5344_v14  ;;  %v5358_v14 = vld [vmem:[#allocation194_spill] sm:$0xff] }
 0x4b6   : > { %1016 = vmatpush.msrb.mxu3 %v5332_v17  ;;  %v5345_v17 = vld [vmem:[#allocation128_spill] sm:$0xff] }
 0x4b7   : > { %1375 = vmatpush.msrb.mxu0 %v5345_v17  ;;  %1403 = vmatpush.msrb.mxu1 %v5347_v18  ;;  %v5359_v17 = vld [vmem:[#allocation141_spill] sm:$0xff]  ;;  %v5361_v18 = vld [vmem:[#allocation190_spill] sm:$0xff] }
 0x4b8   : > { %1017 = vmatpush.msrb.mxu3 %v5335_v13  ;;  %v5348_v13 = vld [vmem:[#allocation127_spill] sm:$0xff] }
 0x4b9   : > { %1376 = vmatpush.msrb.mxu0 %v5348_v13  ;;  %1404 = vmatpush.msrb.mxu1 %v5350_v7  ;;  %v5362_v13 = vld [vmem:[#allocation140_spill] sm:$0xff]  ;;  %v5364_v7 = vld [vmem:[#allocation186_spill] sm:$0xff] }
 0x4ba   : > { %1018 = vmatpush.msrb.mxu3 %v5338_v8  ;;  %v5351_v8 = vld [vmem:[#allocation126_spill] sm:$0xff] }
 0x4bb   : > { %1377 = vmatpush.msrb.mxu0 %v5351_v8  ;;  %1405 = vmatpush.msrb.mxu1 %v5353_v15  ;;  %v5365_v8 = vld [vmem:[#allocation139_spill] sm:$0xff]  ;;  %v5368_v15 = vld [vmem:[#allocation138_spill] sm:$0xff] }
 0x4bc   : > { %1019 = vmatpush.msrb.mxu3 %v5341_v6  ;;  %v5354_v6 = vld [vmem:[#allocation125_spill] sm:$0xff] }
 0x4bd   : > { %1020 = vmatmul.f32.vlgmr.msrb.gmra.mxu3 %v1002_v0  ;;  %1378 = vmatpush.msrb.mxu0 %v5354_v6  ;;  %v5355_v0 = vld [vmem:[#allocation198_spill] sm:$0xff]  ;;  %v5369_v6 = vld [vmem:[#allocation120_spill] sm:$0xff] }
 0x4be   : > { %1096 = vmatpush.msra.mxu3 %v5343_v11  ;;  %1406 = vmatpush.msrb.mxu1 %v5356_v16  ;;  %v5357_v11 = vld [vmem:[#allocation124_spill] sm:$0xff]  ;;  %v5371_v16 = vld [vmem:[#allocation137_spill] sm:$0xff] }
 0x4bf   : > { %1379 = vmatpush.msrb.mxu0 %v5357_v11  ;;  %v5372_v11 = vld [vmem:[#allocation174_spill] sm:$0xff] }
 0x4c0   : > { %1097 = vmatpush.msra.mxu3 %v5346_v12  ;;  %1407 = vmatpush.msrb.mxu1 %v5359_v17  ;;  %v5360_v12 = vld [vmem:[#allocation123_spill] sm:$0xff]  ;;  %v5374_v17 = vld [vmem:[#allocation166_spill] sm:$0xff] }
 0x4c1   : > { %1380 = vmatpush.msrb.mxu0 %v5360_v12  ;;  %v5375_v12 = vld [vmem:[#allocation162_spill] sm:$0xff] }
 0x4c2   : > { %1098 = vmatpush.msra.mxu3 %v5349_v4  ;;  %1408 = vmatpush.msrb.mxu1 %v5362_v13  ;;  %v5363_v4 = vld [vmem:[#allocation122_spill] sm:$0xff] }
 0x4c3   : > { %1381 = vmatpush.msrb.mxu0 %v5363_v4  ;;  %v5377_v13 = vld [vmem:[#allocation154_spill] sm:$0xff] }
 0x4c4   : > { %1099 = vmatpush.msra.mxu3 %v5352_v9  ;;  %1409 = vmatpush.msrb.mxu1 %v5365_v8  ;;  %v5366_v9 = vld [vmem:[#allocation121_spill] sm:$0xff]  ;;  %v5378_v4 = vld [vmem:[#allocation118_spill] sm:$0xff]  ;;  %v5380_v8 = vld [vmem:[#allocation116_spill] sm:$0xff] }
 0x4c5   : > { %1023 = vmatmul.f32.gmra.mxu3 %v1003_v10  ;;  %1382 = vmatpush.msrb.mxu0 %v5366_v9  ;;  %v5367_v10 = vld [vmem:[#allocation182_spill] sm:$0xff]  ;;  %v5381_v9 = vld [vmem:[#allocation115_spill] sm:$0xff] }
 0x4c6   : > { %1100 = vmatpush.msra.mxu3 %v5355_v0  ;;  %1410 = vmatpush.msrb.mxu1 %v5368_v15  ;;  %v5370_v0 = vld [vmem:[#allocation178_spill] sm:$0xff]  ;;  %v5383_v15 = vld [vmem:[#allocation113_spill] sm:$0xff] }
 0x4c7   : > { %1383 = vmatpush.msrb.mxu0 %v5369_v6  ;;  %v5384_v6 = vld [vmem:[#allocation112_spill] sm:$0xff] }
 0x4c8   : > { %1101 = vmatpush.msra.mxu3 %v5358_v14  ;;  %1411 = vmatpush.msrb.mxu1 %v5371_v16  ;;  %v5373_v14 = vld [vmem:[#allocation170_spill] sm:$0xff] }
 0x4c9   : > { %v5386_v16 = vld [vmem:[#allocation110_spill] sm:$0xff] }
 0x4ca   : > { %1102 = vmatpush.msra.mxu3 %v5361_v18  ;;  %v5376_v18 = vld [vmem:[#allocation158_spill] sm:$0xff] }
 0x4cc   : > { %1103 = vmatpush.msra.mxu3 %v5364_v7  ;;  %v5379_v7 = vld [vmem:[#allocation117_spill] sm:$0xff] }
 0x4ce   : > { %1104 = vmatpush.msra.mxu3 %v5367_v10  ;;  %v5382_v10 = vld [vmem:[#allocation114_spill] sm:$0xff] }
 0x4d0   : > { %1105 = vmatpush.msra.mxu3 %v5370_v0  ;;  %v5385_v0 = vld [vmem:[#allocation111_spill] sm:$0xff] }
 0x4d2   : > { %1106 = vmatpush.msra.mxu3 %v5372_v11  ;;  %v5387_v11 = vld [vmem:[#allocation109_spill] sm:$0xff] }
 0x4d4   : > { %1107 = vmatpush.msra.mxu3 %v5373_v14  ;;  %v5388_v14 = vld [vmem:[#allocation108_spill] sm:$0xff] }
 0x4d6   : > { %1108 = vmatpush.msra.mxu3 %v5374_v17  ;;  %v5389_v17 = vld [vmem:[#allocation107_spill] sm:$0xff] }
 0x4d8   : > { %1109 = vmatpush.msra.mxu3 %v5375_v12  ;;  %v5390_v12 = vld [vmem:[#allocation106_spill] sm:$0xff] }
 0x4da   : > { %1110 = vmatpush.msra.mxu3 %v5376_v18  ;;  %v5391_v18 = vld [vmem:[#allocation105_spill] sm:$0xff] }
 0x4dc   : > { %1111 = vmatpush.msra.mxu3 %v5377_v13  ;;  %v5392_v13 = vld [vmem:[#allocation104_spill] sm:$0xff] }
 0x4de   : > { %1340 = vmatpush.msrb.mxu3 %v5378_v4  ;;  %v5393_v4 = vld [vmem:[#allocation103_spill] sm:$0xff] }
 0x4e0   : > { %1341 = vmatpush.msrb.mxu3 %v5379_v7 }
 0x4e2   : > { %1342 = vmatpush.msrb.mxu3 %v5380_v8  ;;  %v5394_v8 = vld [vmem:[#allocation403_spill] sm:$0xff] }
 0x4e4   : > { %1343 = vmatpush.msrb.mxu3 %v5381_v9  ;;  %v5395_v9 = vld [vmem:[#allocation405_spill] sm:$0xff] }
 0x4e6   : > { %1344 = vmatpush.msrb.mxu3 %v5382_v10  ;;  %v5396_v10 = vld [vmem:[#allocation406_spill] sm:$0xff] }
 0x4e8   : > { %1345 = vmatpush.msrb.mxu3 %v5383_v15  ;;  %v5397_v15 = vld [vmem:[#allocation399_spill] sm:$0xff] }
 0x4ea   : > { %1346 = vmatpush.msrb.mxu3 %v5384_v6  ;;  %v5398_v6 = vld [vmem:[#allocation401_spill] sm:$0xff] }
 0x4ec   : > { %1347 = vmatpush.msrb.mxu3 %v5385_v0  ;;  %v5399_v0 = vld [vmem:[#allocation402_spill] sm:$0xff] }
 0x4ee   : > { %1348 = vmatpush.msrb.mxu3 %v5386_v16  ;;  %v5400_v16 = vld [vmem:[#allocation395_spill] sm:$0xff] }
 0x4f0   : > { %1349 = vmatpush.msrb.mxu3 %v5387_v11  ;;  %v5401_v11 = vld [vmem:[#allocation397_spill] sm:$0xff] }
 0x4f2   : > { %1350 = vmatpush.msrb.mxu3 %v5388_v14 }
 0x4f4   : > { %1351 = vmatpush.msrb.mxu3 %v5389_v17  ;;  %v5402_v17 = vld [vmem:[#allocation398_spill] sm:$0xff] }
 0x4f6   : > { %1352 = vmatpush.msrb.mxu3 %v5390_v12  ;;  %v5403_v12 = vld [vmem:[#allocation391_spill] sm:$0xff] }
 0x4f8   : > { %1353 = vmatpush.msrb.mxu3 %v5391_v18  ;;  %v5404_v18 = vld [vmem:[#allocation393_spill] sm:$0xff] }
 0x4fa   : > { %1354 = vmatpush.msrb.mxu3 %v5392_v13  ;;  %v5405_v13 = vld [vmem:[#allocation394_spill] sm:$0xff] }
 0x4fc   : > { %1355 = vmatpush.msrb.mxu3 %v5393_v4  ;;  %v5406_v4 = vld [vmem:[#allocation387_spill] sm:$0xff] }
 0x520   : > { %v997_v7 = vpop.f32.mrf.mxu3 }
 0x521   : > { %1112 = vmatmul.f32.vlgmr.msra.gmra.mxu3 %v997_v7  ;;  %1135 = vmatmul.f32.vlgmr.msra.gmra.mxu0 %v997_v7 }
 0x522   : > { %1158 = vmatmul.f32.vlgmr.msra.gmra.mxu1 %v997_v7  ;;  %1181 = vmatmul.f32.vlgmr.msra.gmra.mxu2 %v997_v7  ;;  %v5407_v7 = vld [vmem:[#allocation389_spill] sm:$0xff] }
 0x523   : > { %1442 = vmatpush.msra.mxu3 %v5394_v8  ;;  %1488 = vmatpush.msra.mxu0 %v5395_v9  ;;  %v5408_v8 = vld [vmem:[#allocation390_spill] sm:$0xff]  ;;  %v5409_v9 = vld [vmem:[#allocation383_spill] sm:$0xff] }
 0x524   : > { %1511 = vmatpush.msra.mxu1 %v5396_v10  ;;  %v5410_v10 = vld [vmem:[#allocation385_spill] sm:$0xff] }
 0x525   : > { %1443 = vmatpush.msra.mxu3 %v5397_v15  ;;  %1489 = vmatpush.msra.mxu0 %v5398_v6  ;;  %v5411_v15 = vld [vmem:[#allocation386_spill] sm:$0xff]  ;;  %v5412_v6 = vld [vmem:[#allocation379_spill] sm:$0xff] }
 0x526   : > { %1512 = vmatpush.msra.mxu1 %v5399_v0  ;;  %v5413_v0 = vld [vmem:[#allocation381_spill] sm:$0xff] }
 0x527   : > { %1444 = vmatpush.msra.mxu3 %v5400_v16  ;;  %1490 = vmatpush.msra.mxu0 %v5401_v11  ;;  %v5414_v16 = vld [vmem:[#allocation382_spill] sm:$0xff]  ;;  %v5415_v11 = vld [vmem:[#allocation375_spill] sm:$0xff] }
 0x528   : > { %v999_v14 = vpop.f32.mrf.mxu3  ;;  %1513 = vmatpush.msra.mxu1 %v5402_v17  ;;  %v5417_v17 = vld [vmem:[#allocation378_spill] sm:$0xff] }
 0x529   : > { %1115 = vmatmul.f32.gmra.mxu3 %v999_v14  ;;  %1138 = vmatmul.f32.gmra.mxu0 %v999_v14 }
 0x52a   : > { %1161 = vmatmul.f32.gmra.mxu1 %v999_v14  ;;  %1184 = vmatmul.f32.gmra.mxu2 %v999_v14  ;;  %v5416_v14 = vld [vmem:[#allocation377_spill] sm:$0xff] }
 0x52b   : > { %1445 = vmatpush.msra.mxu3 %v5403_v12  ;;  %1491 = vmatpush.msra.mxu0 %v5404_v18  ;;  %v5418_v12 = vld [vmem:[#allocation371_spill] sm:$0xff]  ;;  %v5419_v18 = vld [vmem:[#allocation373_spill] sm:$0xff] }
 0x52c   : > { %1514 = vmatpush.msra.mxu1 %v5405_v13  ;;  %v5420_v13 = vld [vmem:[#allocation374_spill] sm:$0xff] }
 0x52d   : > { %1446 = vmatpush.msra.mxu3 %v5406_v4  ;;  %1492 = vmatpush.msra.mxu0 %v5407_v7  ;;  %v5421_v4 = vld [vmem:[#allocation367_spill] sm:$0xff]  ;;  %v5422_v7 = vld [vmem:[#allocation369_spill] sm:$0xff] }
 0x52e   : > { %1515 = vmatpush.msra.mxu1 %v5408_v8  ;;  %v5423_v8 = vld [vmem:[#allocation370_spill] sm:$0xff] }
 0x52f   : > { %1447 = vmatpush.msra.mxu3 %v5409_v9  ;;  %1493 = vmatpush.msra.mxu0 %v5410_v10  ;;  %v5424_v9 = vld [vmem:[#allocation363_spill] sm:$0xff]  ;;  %v5425_v10 = vld [vmem:[#allocation365_spill] sm:$0xff] }
 0x530   : > { %1516 = vmatpush.msra.mxu1 %v5411_v15  ;;  %v5426_v15 = vld [vmem:[#allocation366_spill] sm:$0xff] }
 0x531   : > { %1448 = vmatpush.msra.mxu3 %v5412_v6  ;;  %1494 = vmatpush.msra.mxu0 %v5413_v0  ;;  %v5427_v6 = vld [vmem:[#allocation359_spill] sm:$0xff]  ;;  %v5428_v0 = vld [vmem:[#allocation361_spill] sm:$0xff] }
 0x532   : > { %1517 = vmatpush.msra.mxu1 %v5414_v16  ;;  %v5429_v16 = vld [vmem:[#allocation362_spill] sm:$0xff] }
 0x533   : > { %1449 = vmatpush.msra.mxu3 %v5415_v11  ;;  %1495 = vmatpush.msra.mxu0 %v5416_v14  ;;  %v5430_v11 = vld [vmem:[#allocation355_spill] sm:$0xff]  ;;  %v5431_v14 = vld [vmem:[#allocation357_spill] sm:$0xff] }
 0x534   : > { %1518 = vmatpush.msra.mxu1 %v5417_v17  ;;  %v5432_v17 = vld [vmem:[#allocation358_spill] sm:$0xff] }
 0x535   : > { %1450 = vmatpush.msra.mxu3 %v5418_v12  ;;  %1496 = vmatpush.msra.mxu0 %v5419_v18  ;;  %v5433_v12 = vld [vmem:[#allocation351_spill] sm:$0xff]  ;;  %v5434_v18 = vld [vmem:[#allocation353_spill] sm:$0xff] }
 0x536   : > { %1519 = vmatpush.msra.mxu1 %v5420_v13  ;;  %v5435_v13 = vld [vmem:[#allocation354_spill] sm:$0xff] }
 0x537   : > { %1451 = vmatpush.msra.mxu3 %v5421_v4  ;;  %1497 = vmatpush.msra.mxu0 %v5422_v7  ;;  %v5436_v4 = vld [vmem:[#allocation347_spill] sm:$0xff]  ;;  %v5437_v7 = vld [vmem:[#allocation349_spill] sm:$0xff] }
 0x538   : > { %1520 = vmatpush.msra.mxu1 %v5423_v8  ;;  %v5438_v8 = vld [vmem:[#allocation350_spill] sm:$0xff] }
 0x539   : > { %1452 = vmatpush.msra.mxu3 %v5424_v9  ;;  %1498 = vmatpush.msra.mxu0 %v5425_v10  ;;  %v5439_v9 = vld [vmem:[#allocation343_spill] sm:$0xff]  ;;  %v5440_v10 = vld [vmem:[#allocation345_spill] sm:$0xff] }
 0x53a   : > { %1521 = vmatpush.msra.mxu1 %v5426_v15  ;;  %v5441_v15 = vld [vmem:[#allocation346_spill] sm:$0xff] }
 0x53b   : > { %1453 = vmatpush.msra.mxu3 %v5427_v6  ;;  %1499 = vmatpush.msra.mxu0 %v5428_v0  ;;  %v1044_v6 = vpop.f32.mrf.mxu0 }
 0x53c   : > { %1522 = vmatpush.msra.mxu1 %v5429_v16  ;;  %v1090_v16 = vpop.f32.mrf.mxu2 }
 0x53d   : > { %1454 = vmatpush.msra.mxu3 %v5430_v11  ;;  %1500 = vmatpush.msra.mxu0 %v5431_v14  ;;  %v1067_v14 = vpop.f32.mrf.mxu1 }
 0x53e   : > { %1523 = vmatpush.msra.mxu1 %v5432_v17 }
 0x53f   : > { %1455 = vmatpush.msra.mxu3 %v5433_v12  ;;  %1501 = vmatpush.msra.mxu0 %v5434_v18  ;;  %v5442_v18 = vld [vmem:[#allocation278_spill] sm:$0xff] }
 0x540   : > { %1524 = vmatpush.msra.mxu1 %v5435_v13  ;;  %v1021_v0 = vpop.f32.mrf.mxu3  ;;  %v1190_v13 = vperm.slane %v5442_v18, 1 }
 0x541   : > { %1456 = vmatpush.msra.mxu3 %v5436_v4  ;;  %1502 = vmatpush.msra.mxu0 %v5437_v7 }
 0x542   : > { %1525 = vmatpush.msra.mxu1 %v5438_v8 }
 0x543   : > { %1457 = vmatpush.msra.mxu3 %v5439_v9  ;;  %1503 = vmatpush.msra.mxu0 %v5440_v10  ;;  %v1047_v11 = vpop.f32.mrf.mxu0  ;;  %v1189_v9 = vperm.slane %v5442_v18, 0  ;;  %v1192_v10 = vperm.slane %v5442_v18, 3 }
 0x544   : > { %1526 = vmatpush.msra.mxu1 %v5441_v15  ;;  %v1093_v12 = vpop.f32.mrf.mxu2 }
 0x545   : > { %v1070_v7 = vpop.f32.mrf.mxu1 }
 0x548   : > { %v1024_v17 = vpop.f32.mrf.mxu3 }
 0x59e   : > { %v1136_v4 = vpop.f32.mrf.mxu0 }
 0x59f   : > { %v1137_v19 = vadd.f32 %v1136_v4, %v1044_v6  ;;  %v1159_v4 = vpop.f32.mrf.mxu1 }
 0x5a1   : > { %v1198_v20 = vadd.f32 %v1190_v13, %v1137_v19 }
 0x5a3   : > { %v2101_v8 = vmul.f32 -1.442695, %v1198_v20 }
 0x5a4   : > { %v1113_v21 = vpop.f32.mrf.mxu3 }
 0x5a5   : > { %2220 = vpow2.f32 %v2101_v8  ;;  %v1114_v15 = vadd.f32 %v1113_v21, %v1021_v0  ;;  %v1182_v22 = vpop.f32.mrf.mxu2 }
 0x5a6   : > { %v1183_v23 = vadd.f32 %v1182_v22, %v1090_v16  ;;  %v1139_v24 = vpop.f32.mrf.mxu0 }
 0x5a7   : > { %v1197_v25 = vadd.f32 %v1189_v9, %v1114_v15  ;;  %v1140_v26 = vadd.f32 %v1139_v24, %v1047_v11  ;;  %v1162_v11 = vpop.f32.mrf.mxu1 }
 0x5a8   : > { %v1200_v27 = vadd.f32 %v1192_v10, %v1183_v23 }
 0x5a9   : > { %v2099_v28 = vmul.f32 -1.442695, %v1197_v25  ;;  %v1202_v29 = vadd.f32 %v1190_v13, %v1140_v26  ;;  %v1163_v13 = vadd.f32 %v1162_v11, %v1070_v7 }
 0x5aa   : > { %v2103_v30 = vmul.f32 -1.442695, %v1200_v27 }
 0x5ab   : > { %v2221_v6 = vpop.eup %2220  ;;  %2222 = vpow2.f32 %v2099_v28  ;;  %v2102_v19 = vmul.f32 -1.442695, %v1202_v29 }
 0x5ac   : > { %v1251_v20 = vadd.f32 1.0, %v2221_v6  ;;  %2224 = vpow2.f32 %v2103_v30  ;;  %v1116_v31 = vpop.f32.mrf.mxu3 }
 0x5ad   : > { %2226 = vpow2.f32 %v2102_v19  ;;  %v1117_v32 = vadd.f32 %v1116_v31, %v1024_v17  ;;  %v1185_v8 = vpop.f32.mrf.mxu2  ;;  %v1191_v17 = vperm.slane %v5442_v18, 2  ;;  %v1205_v18 = vld [vmem:[#allocation4 + $0x8] sm:$0xff] }
 0x5ae   : > { %2228 = vrcp.f32 %v1251_v20  ;;  %v1186_v22 = vadd.f32 %v1185_v8, %v1093_v12  ;;  %vm1258_vm2 = vweird.f32 %v1251_v20 }
 0x5af   : > { %v1201_v21 = vadd.f32 %v1189_v9, %v1117_v32  ;;  %v1160_v32 = vadd.f32 %v1159_v4, %v1067_v14  ;;  %v1264_v14 = vand.u32 2147483648, %v1251_v20 }
 0x5b0   : > { %v1204_v24 = vadd.f32 %v1192_v10, %v1186_v22 }
 0x5b1   : > { %v2223_v0 = vpop.eup %2222  ;;  %v2100_v16 = vmul.f32 -1.442695, %v1201_v21  ;;  %v1199_v6 = vadd.f32 %v1191_v17, %v1160_v32 }
 0x5b2   : > { %v2225_v23 = vpop.eup %2224  ;;  %v1213_v25 = vadd.f32 1.0, %v2223_v0  ;;  %v2104_v28 = vmul.f32 -1.442695, %v1204_v24  ;;  %v1262_v24 = vand.u32 2147483647, %v1251_v20 }
 0x5b3   : > { %v2227_v26 = vpop.eup %2226  ;;  %v4407_v27 = vadd.f32 1.0, %v2225_v23  ;;  %2230 = vpow2.f32 %v2100_v16  ;;  %v1203_v16 = vadd.f32 %v1191_v17, %v1163_v13 }
 0x5b4   : > { %v2229_v29 = vpop.eup %2228  ;;  %2232 = vrcp.f32 %v1213_v25  ;;  %v4410_v31 = vadd.f32 1.0, %v2227_v26  ;;  %v1226_v11 = vand.u32 2147483648, %v1213_v25  ;;  %vm1263_vm5 = vcmp.eq.f32.partialorder %v1262_v24, 8.507059e+37 }
 0x5b5   : > { %v1254_v30 = vmul.f32 %v2229_v29, %v1251_v20  ;;  %2234 = vrcp.f32 %v4407_v27  ;;  %vm1259_vm1 = vweird.f32 %v2229_v29  ;;  %v1265_v20 = vor.u32 1.1754944e-38, %v1264_v14 }
 0x5b6   : > { %2236 = vpow2.f32 %v2104_v28  ;;  %vm4425_vm3 = vmor %vm1258_vm2, %vm1259_vm1  ;;  %vm1220_vm6 = vweird.f32 %v1213_v25  ;;  %vm1273_vm9 = vweird.f32 %v4410_v31  ;;  %vm1298_vm1 = vweird.f32 %v4407_v27 }
 0x5b7   : > { %v1255_v12 = vsub.f32 1.0, %v1254_v30  ;;  %2238 = vrcp.f32 %v4410_v31  ;;  %v1224_v30 = vand.u32 2147483647, %v1213_v25 }
 0x5b9   : > { %v2231_v9 = vpop.eup %2230  ;;  %v1256_v10 = vmul.f32 %v2229_v29, %v1255_v12  ;;  %vm1225_vm8 = vcmp.eq.f32.partialorder %v1224_v30, 8.507059e+37 }
 0x5ba   : > { %v2233_v15 = vpop.eup %2232  ;;  %v4414_v19 = vadd.f32 1.0, %v2231_v9 }
 0x5bb   : > { %v4416_v8 = vpop.eup %2234  ;;  %v1257_v21 = vadd.f32 %v2229_v29, %v1256_v10  ;;  %v1216_v22 = vmul.f32 %v2233_v15, %v1213_v25  ;;  %vm1221_vm4 = vweird.f32 %v2233_v15 }
 0x5bc   : > { %v2237_v0 = vpop.eup %2236  ;;  %v1294_v4 = vmul.f32 %v4416_v8, %v4407_v27  ;;  %2240 = vrcp.f32 %v4414_v19  ;;  %vm1222_vm7 = vmor %vm1220_vm6, %vm1221_vm4  ;;  %vm1299_vm13 = vweird.f32 %v4416_v8  ;;  %vm1235_vm14 = vweird.f32 %v4414_v19 }
 0x5bd   : > { %v4421_v7 = vpop.eup %2238  ;;  %v1217_v23 = vsub.f32 1.0, %v1216_v22  ;;  %v4423_v26 = vadd.f32 1.0, %v2237_v0  ;;  %2242 = vtanh.f32 %v1199_v6  ;;  %v1261_v17 = vsel %vm4425_vm3, %v2229_v29, %v1257_v21  ;;  %vm1300_vm3 = vmor %vm1298_vm1, %vm1299_vm13 }
 0x5be   : > { %v1269_v32 = vmul.f32 %v4421_v7, %v4410_v31  ;;  %v1295_v13 = vsub.f32 1.0, %v1294_v4  ;;  %v1227_v22 = vor.u32 1.1754944e-38, %v1226_v11  ;;  %v1266_v28 = vsel %vm1263_vm5, %v1265_v20, %v1261_v17 }
 0x5bf   : > { %v1218_v12 = vmul.f32 %v2233_v15, %v1217_v23  ;;  %2244 = vrcp.f32 %v4423_v26  ;;  %vm1274_vm10 = vweird.f32 %v4421_v7  ;;  %v1279_v4 = vand.u32 2147483648, %v4410_v31 }
 0x5c0   : > { %v1270_v9 = vsub.f32 1.0, %v1269_v32  ;;  %2246 = vtanh.f32 %v1203_v16  ;;  %v1296_v16 = vmul.f32 %v4416_v8, %v1295_v13  ;;  %v1323_v11 = vmul.f32 %v1266_v28, %v1205_v18  ;;  %vm4447_vm11 = vmor %vm1273_vm9, %vm1274_vm10 }
 0x5c1   : > { %v1219_v10 = vadd.f32 %v2233_v15, %v1218_v12  ;;  %v1241_v17 = vand.u32 2147483648, %v4414_v19  ;;  %v1304_v12 = vand.u32 2147483648, %v4407_v27  ;;  %v1239_v20 = vand.u32 2147483647, %v4414_v19 }
 0x5c2   : > { %v2241_v6 = vpop.eup %2240  ;;  %v1271_v0 = vmul.f32 %v4421_v7, %v1270_v9  ;;  %v1297_v28 = vadd.f32 %v4416_v8, %v1296_v16 }
 0x5c3   : > { %v1223_v29 = vsel %vm1222_vm7, %v2233_v15, %v1219_v10  ;;  %v1231_v21 = vmul.f32 %v2241_v6, %v4414_v19  ;;  %v2243_v14 = vpop.eup %2242  ;;  %v1277_v15 = vand.u32 2147483647, %v4410_v31  ;;  %vm1236_vm12 = vweird.f32 %v2241_v6 }
 0x5c4   : > { %v1228_v25 = vsel %vm1225_vm8, %v1227_v22, %v1223_v29  ;;  %v1272_v24 = vadd.f32 %v4421_v7, %v1271_v0  ;;  %v1280_v29 = vor.u32 1.1754944e-38, %v1279_v4  ;;  %vm1237_vm2 = vmor %vm1235_vm14, %vm1236_vm12  ;;  %vm1240_vm4 = vcmp.eq.f32.partialorder %v1239_v20, 8.507059e+37 }
 0x5c5   : > { %v2245_v23 = vpop.eup %2244  ;;  %v1232_v30 = vsub.f32 1.0, %v1231_v21  ;;  %v1325_v32 = vmul.f32 %v2243_v14, %v1228_v25  ;;  %vm1278_vm15 = vcmp.eq.f32.partialorder %v1277_v15, 8.507059e+37  ;;  %v1302_v14 = vand.u32 2147483647, %v4407_v27  ;;  %v1206_v25 = vld [vmem:[#allocation4] sm:$0xff] }
 0x5c6   : > { %v1309_v13 = vmul.f32 %v2245_v23, %v4423_v26  ;;  %v2247_v10 = vpop.eup %2246  ;;  %v1276_v0 = vsel %vm4447_vm11, %v4421_v7, %v1272_v24  ;;  %v1301_v4 = vsel %vm1300_vm3, %v4416_v8, %v1297_v28  ;;  %v1305_v19 = vor.u32 1.1754944e-38, %v1304_v12 }
 0x5c7   : > { %v1233_v22 = vmul.f32 %v2241_v6, %v1232_v30  ;;  %v1327_v18 = vadd.f32 %v1325_v32, %v1323_v11  ;;  %v1242_v30 = vor.u32 1.1754944e-38, %v1241_v17  ;;  %v1281_v7 = vsel %vm1278_vm15, %v1280_v29, %v1276_v0  ;;  %v5449_v29 = vld [vmem:[#allocation331_spill] sm:$0xff] }
 0x5c8   : > { %v1310_v31 = vsub.f32 1.0, %v1309_v13  ;;  %v1324_v32 = vmul.f32 %v1281_v7, %v1206_v25  ;;  %vm1303_vm5 = vcmp.eq.f32.partialorder %v1302_v14, 8.507059e+37  ;;  %vm1314_vm6 = vweird.f32 %v2245_v23  ;;  %v5451_v14 = vld [vmem:[#allocation323_spill] sm:$0xff] }
 0x5c9   : > { %2248 = vtanh.f32 %v1327_v18  ;;  %1335 = vst [vmem:[#allocation4 + $0x8] sm:$0xff] %v1327_v18  ;;  %v1234_v21 = vadd.f32 %v2241_v6, %v1233_v22  ;;  %v1306_v13 = vsel %vm1303_vm5, %v1305_v19, %v1301_v4  ;;  %v1319_v17 = vand.u32 2147483648, %v4423_v26  ;;  %v5453_v25 = vld [vmem:[#allocation315_spill] sm:$0xff] }
 0x5ca   : > { %v1311_v11 = vmul.f32 %v2245_v23, %v1310_v31  ;;  %vm1313_vm7 = vweird.f32 %v4423_v26  ;;  %v1317_v8 = vand.u32 2147483647, %v4423_v26  ;;  %v5452_v26 = vld [vmem:[#allocation319_spill] sm:$0xff] }
 0x5cb   : > { %v1238_v16 = vsel %vm1237_vm2, %v2241_v6, %v1234_v21  ;;  %vm1315_vm8 = vmor %vm1313_vm7, %vm1314_vm6  ;;  %v5447_v6 = vld [vmem:[#allocation339_spill] sm:$0xff]  ;;  %v1320_v20 = vor.u32 1.1754944e-38, %v1319_v17 }
 0x5cc   : > { %v1243_v24 = vsel %vm1240_vm4, %v1242_v30, %v1238_v16  ;;  %v1312_v27 = vadd.f32 %v2245_v23, %v1311_v11  ;;  %vm1318_vm9 = vcmp.eq.f32.partialorder %v1317_v8, 8.507059e+37  ;;  %v5450_v21 = vld [vmem:[#allocation327_spill] sm:$0xff] }
 0x5cd   : > { %v1326_v9 = vmul.f32 %v2247_v10, %v1243_v24  ;;  %v5448_v10 = vld [vmem:[#allocation335_spill] sm:$0xff] }
 0x5ce   : > { %v1316_v12 = vsel %vm1315_vm8, %v2245_v23, %v1312_v27  ;;  %v5454_v23 = vld [vmem:[#allocation311_spill] sm:$0xff] }
 0x5cf   : > { %v2249_v15 = vpop.eup %2248  ;;  %v1328_v22 = vadd.f32 %v1326_v9, %v1324_v32  ;;  %v1321_v28 = vsel %vm1318_vm9, %v1320_v20, %v1316_v12  ;;  %v5455_v30 = vld [vmem:[#allocation307_spill] sm:$0xff] }
 0x5d0   : > { %v1331_v18 = vmul.f32 %v2249_v15, %v1306_v13  ;;  %v5456_v7 = vld [vmem:[#allocation303_spill] sm:$0xff] }
 0x5d1   : > { %2250 = vtanh.f32 %v1328_v22  ;;  %1336 = vst [vmem:[#allocation4] sm:$0xff] %v1328_v22  ;;  %v5457_v16 = vld [vmem:[#allocation299_spill] sm:$0xff] }
 0x5d2   : > { %1333 = vst [vmem:[#allocation3 + $0x8] sm:$0xff] %v1331_v18  ;;  %1356 = vmatmul.f32.vlgmr.msrb.gmra.mxu3 %v1331_v18  ;;  %v5458_v4 = vld [vmem:[#allocation295_spill] sm:$0xff] }
 0x5d3   : > { %1534 = vmatpush.msrb.mxu3 %v5447_v6  ;;  %v5459_v24 = vld [vmem:[#allocation291_spill] sm:$0xff] }
 0x5d4   : > { %v5460_v11 = vld [vmem:[#allocation287_spill] sm:$0xff] }
 0x5d5   : > { %1535 = vmatpush.msrb.mxu3 %v5448_v10  ;;  %v5461_v19 = vld [vmem:[#allocation283_spill] sm:$0xff] }
 0x5d6   : > { %v5462_v32 = vld [vmem:[#allocation279_spill] sm:$0xff] }
 0x5d7   : > { %v2251_v0 = vpop.eup %2250  ;;  %1536 = vmatpush.msrb.mxu3 %v5449_v29  ;;  %v5463_v9 = vld [vmem:[#allocation459_spill] sm:$0xff] }
 0x5d8   : > { %v1332_v31 = vmul.f32 %v2251_v0, %v1321_v28  ;;  %v5464_v15 = vld [vmem:[#allocation455_spill] sm:$0xff] }
 0x5d9   : > { %1537 = vmatpush.msrb.mxu3 %v5450_v21  ;;  %v5465_v13 = vld [vmem:[#allocation451_spill] sm:$0xff] }
 0x5da   : > { %1334 = vst [vmem:[#allocation3] sm:$0xff] %v1332_v31  ;;  %1359 = vmatmul.f32.gmra.mxu3 %v1332_v31  ;;  %v5466_v22 = vld [vmem:[#allocation447_spill] sm:$0xff] }
 0x5db   : > { %1538 = vmatpush.msrb.mxu3 %v5451_v14  ;;  %v5467_v18 = vld [vmem:[#allocation443_spill] sm:$0xff] }
 0x5dc   : > { %v5468_v27 = vld [vmem:[#allocation439_spill] sm:$0xff] }
 0x5dd   : > { %1539 = vmatpush.msrb.mxu3 %v5452_v26  ;;  %v5469_v17 = vld [vmem:[#allocation435_spill] sm:$0xff] }
 0x5de   : > { %v5470_v8 = vld [vmem:[#allocation431_spill] sm:$0xff] }
 0x5df   : > { %1540 = vmatpush.msrb.mxu3 %v5453_v25  ;;  %v5471_v6 = vld [vmem:[#allocation427_spill] sm:$0xff]  ;;  %v5478_v25 = vld [vmem:[#allocation341_spill] sm:$0xff] }
 0x5e0   : > { %v5472_v12 = vld [vmem:[#allocation423_spill] sm:$0xff] }
 0x5e1   : > { %1541 = vmatpush.msrb.mxu3 %v5454_v23  ;;  %v5473_v20 = vld [vmem:[#allocation419_spill] sm:$0xff] }
 0x5e2   : > { %1458 = vmatmul.f32.vlgmr.msra.gmra.mxu3 %v4177_v5  ;;  %v5474_v10 = vld [vmem:[#allocation415_spill] sm:$0xff] }
 0x5e3   : > { %1542 = vmatpush.msrb.mxu3 %v5455_v30  ;;  %v5475_v0 = vld [vmem:[#allocation411_spill] sm:$0xff]  ;;  %v5479_v30 = vld [vmem:[#allocation337_spill] sm:$0xff] }
 0x5e4   : > { %v5476_v28 = vld [vmem:[#allocation407_spill] sm:$0xff] }
 0x5e5   : > { %1543 = vmatpush.msrb.mxu3 %v5456_v7  ;;  %v5477_v29 = vld [vmem:[#allocation119_spill] sm:$0xff] }
 0x5e6   : > { %v1338_v31 = vperm.slane %v5477_v29, 0  ;;  %v5501_v29 = vld [vmem:[#allocation433_spill] sm:$0xff] }
 0x5e7   : > { %1544 = vmatpush.msrb.mxu3 %v5457_v16  ;;  %v5480_v16 = vld [vmem:[#allocation333_spill] sm:$0xff] }
 0x5e9   : > { %1545 = vmatpush.msrb.mxu3 %v5458_v4 }
 0x5ea   : > { %1461 = vmatmul.f32.gmra.mxu3 %v4163_v61 }
 0x5eb   : > { %1546 = vmatpush.msrb.mxu3 %v5459_v24  ;;  %v5481_v24 = vld [vmem:[#allocation329_spill] sm:$0xff] }
 0x5ed   : > { %1547 = vmatpush.msrb.mxu3 %v5460_v11  ;;  %v5482_v11 = vld [vmem:[#allocation325_spill] sm:$0xff] }
 0x5ef   : > { %1548 = vmatpush.msrb.mxu3 %v5461_v19  ;;  %v5483_v19 = vld [vmem:[#allocation321_spill] sm:$0xff] }
 0x5f1   : > { %1549 = vmatpush.msrb.mxu3 %v5462_v32  ;;  %v5484_v32 = vld [vmem:[#allocation317_spill] sm:$0xff] }
 0x5f3   : > { %1626 = vmatpush.msra.mxu3 %v4104_v59  ;;  %v1926_v59 = vld [vmem:[#allocation37 + $0x78] sm:$0xff] (%p890_p7) }
 0x5f5   : > { %1627 = vmatpush.msra.mxu3 %v4096_v37  ;;  %v1905_v37 = vld [vmem:[#allocation35 + $0x58] sm:$0xff] (%p890_p7) }
 0x5f7   : > { %1628 = vmatpush.msra.mxu3 %v5463_v9  ;;  %v5485_v9 = vld [vmem:[#allocation313_spill] sm:$0xff] }
 0x5f9   : > { %1629 = vmatpush.msra.mxu3 %v5464_v15  ;;  %v5486_v15 = vld [vmem:[#allocation309_spill] sm:$0xff] }
 0x5fb   : > { %1630 = vmatpush.msra.mxu3 %v5465_v13  ;;  %v5487_v13 = vld [vmem:[#allocation305_spill] sm:$0xff] }
 0x5fd   : > { %1631 = vmatpush.msra.mxu3 %v5466_v22  ;;  %v5488_v22 = vld [vmem:[#allocation301_spill] sm:$0xff] }
 0x5ff   : > { %1632 = vmatpush.msra.mxu3 %v5467_v18  ;;  %v5489_v18 = vld [vmem:[#allocation297_spill] sm:$0xff] }
 0x601   : > { %1633 = vmatpush.msra.mxu3 %v5468_v27  ;;  %v5490_v27 = vld [vmem:[#allocation293_spill] sm:$0xff] }
 0x603   : > { %1634 = vmatpush.msra.mxu3 %v5469_v17  ;;  %v5491_v17 = vld [vmem:[#allocation289_spill] sm:$0xff] }
 0x605   : > { %1635 = vmatpush.msra.mxu3 %v5470_v8  ;;  %v5492_v8 = vld [vmem:[#allocation285_spill] sm:$0xff] }
 0x607   : > { %1636 = vmatpush.msra.mxu3 %v5471_v6  ;;  %v5493_v6 = vld [vmem:[#allocation281_spill] sm:$0xff] }
 0x609   : > { %1637 = vmatpush.msra.mxu3 %v5472_v12  ;;  %v5495_v12 = vld [vmem:[#allocation457_spill] sm:$0xff] }
 0x60b   : > { %1638 = vmatpush.msra.mxu3 %v5473_v20  ;;  %v5496_v20 = vld [vmem:[#allocation453_spill] sm:$0xff] }
 0x60d   : > { %1639 = vmatpush.msra.mxu3 %v5474_v10  ;;  %v5497_v10 = vld [vmem:[#allocation449_spill] sm:$0xff] }
 0x60f   : > { %1640 = vmatpush.msra.mxu3 %v5475_v0  ;;  %v5499_v0 = vld [vmem:[#allocation441_spill] sm:$0xff] }
 0x611   : > { %1641 = vmatpush.msra.mxu3 %v5476_v28  ;;  %v5500_v28 = vld [vmem:[#allocation437_spill] sm:$0xff] }
 0x655   : > { %v1357_v21 = vpop.f32.mrf.mxu3 }
 0x656   : > { %v1358_v14 = vadd.f32 %v1357_v21, %v1338_v31  ;;  %v5503_v21 = vld [vmem:[#allocation425_spill] sm:$0xff] }
 0x658   : > { %v1363_v26 = vmax.f32 %v1358_v14, 0.0  ;;  %v5504_v14 = vld [vmem:[#allocation421_spill] sm:$0xff] }
 0x65a   : > { %1384 = vmatmul.f32.vlgmr.msrb.gmra.mxu0 %v1363_v26  ;;  %v5505_v26 = vld [vmem:[#allocation417_spill] sm:$0xff] }
 0x65b   : > { %1580 = vmatpush.msrb.mxu0 %v5478_v25  ;;  %v5506_v25 = vld [vmem:[#allocation413_spill] sm:$0xff] }
 0x65d   : > { %v1360_v23 = vpop.f32.mrf.mxu3  ;;  %1581 = vmatpush.msrb.mxu0 %v5479_v30  ;;  %v5508_v30 = vld [vmem:[#allocation136_spill] sm:$0xff] }
 0x65e   : > { %v1361_v7 = vadd.f32 %v1360_v23, %v1338_v31  ;;  %v5502_v31 = vld [vmem:[#allocation429_spill] sm:$0xff] }
 0x65f   : > { %1582 = vmatpush.msrb.mxu0 %v5480_v16  ;;  %v5507_v23 = vld [vmem:[#allocation409_spill] sm:$0xff] }
 0x660   : > { %v1364_v4 = vmax.f32 %v1361_v7, 0.0  ;;  %v1366_v7 = vperm.slane %v5508_v30, 0  ;;  %v5517_v30 = vld [vmem:[#allocation310_spill] sm:$0xff] }
 0x661   : > { %1583 = vmatpush.msrb.mxu0 %v5481_v24 }
 0x662   : > { %1387 = vmatmul.f32.gmra.mxu0 %v1364_v4 }
 0x663   : > { %1584 = vmatpush.msrb.mxu0 %v5482_v11  ;;  %v5509_v11 = vld [vmem:[#allocation342_spill] sm:$0xff] }
 0x665   : > { %1585 = vmatpush.msrb.mxu0 %v5483_v19 }
 0x667   : > { %1586 = vmatpush.msrb.mxu0 %v5484_v32  ;;  %v5510_v32 = vld [vmem:[#allocation338_spill] sm:$0xff] }
 0x669   : > { %1587 = vmatpush.msrb.mxu0 %v5485_v9 }
 0x66a   : > { %1504 = vmatmul.f32.vlgmr.msra.gmra.mxu0 %v4177_v5  ;;  %v5494_v5 = vld [vmem:[#allocation461_spill] sm:$0xff] }
 0x66b   : > { %1588 = vmatpush.msrb.mxu0 %v5486_v15  ;;  %v5511_v15 = vld [vmem:[#allocation334_spill] sm:$0xff] }
 0x66d   : > { %1589 = vmatpush.msrb.mxu0 %v5487_v13 }
 0x66f   : > { %1590 = vmatpush.msrb.mxu0 %v5488_v22  ;;  %v5512_v22 = vld [vmem:[#allocation330_spill] sm:$0xff] }
 0x671   : > { %1591 = vmatpush.msrb.mxu0 %v5489_v18  ;;  %v5513_v18 = vld [vmem:[#allocation326_spill] sm:$0xff] }
 0x672   : > { %1507 = vmatmul.f32.gmra.mxu0 %v4163_v61  ;;  %v5498_v61 = vld [vmem:[#allocation445_spill] sm:$0xff] }
 0x673   : > { %1592 = vmatpush.msrb.mxu0 %v5490_v27  ;;  %v5514_v27 = vld [vmem:[#allocation322_spill] sm:$0xff] }
 0x675   : > { %1593 = vmatpush.msrb.mxu0 %v5491_v17  ;;  %v5515_v17 = vld [vmem:[#allocation318_spill] sm:$0xff] }
 0x677   : > { %1594 = vmatpush.msrb.mxu0 %v5492_v8  ;;  %v5516_v8 = vld [vmem:[#allocation314_spill] sm:$0xff] }
 0x679   : > { %1595 = vmatpush.msrb.mxu0 %v5493_v6  ;;  %v4542_v6 = vld [vmem:[#allocation39 + $0x8] sm:$0xff] }
 0x67b   : > { %1672 = vmatpush.msra.mxu0 %v4108_v62 }
 0x67d   : > { %1673 = vmatpush.msra.mxu0 %v5187_v2 }
 0x67f   : > { %1674 = vmatpush.msra.mxu0 %v5494_v5 }
 0x681   : > { %1675 = vmatpush.msra.mxu0 %v5495_v12 }
 0x683   : > { %1676 = vmatpush.msra.mxu0 %v5496_v20 }
 0x685   : > { %1677 = vmatpush.msra.mxu0 %v5497_v10 }
 0x687   : > { %1678 = vmatpush.msra.mxu0 %v5498_v61 }
 0x689   : > { %1679 = vmatpush.msra.mxu0 %v5499_v0 }
 0x68b   : > { %1680 = vmatpush.msra.mxu0 %v5500_v28 }
 0x68d   : > { %1681 = vmatpush.msra.mxu0 %v5501_v29 }
 0x68f   : > { %1682 = vmatpush.msra.mxu0 %v5502_v31 }
 0x691   : > { %1683 = vmatpush.msra.mxu0 %v5503_v21 }
 0x693   : > { %1684 = vmatpush.msra.mxu0 %v5504_v14 }
 0x695   : > { %1685 = vmatpush.msra.mxu0 %v5505_v26 }
 0x697   : > { %1686 = vmatpush.msra.mxu0 %v5506_v25 }
 0x699   : > { %1687 = vmatpush.msra.mxu0 %v5507_v23 }
 0x6d7   : > { %v1385_v16 = vpop.f32.mrf.mxu0 }
 0x6d8   : > { %v1386_v4 = vadd.f32 %v1385_v16, %v1366_v7  ;;  %v5519_v16 = vld [vmem:[#allocation302_spill] sm:$0xff] }
 0x6da   : > { %v1391_v24 = vmax.f32 %v1386_v4, 0.0  ;;  %v5520_v4 = vld [vmem:[#allocation298_spill] sm:$0xff] }
 0x6dc   : > { %1412 = vmatmul.f32.vlgmr.msrb.gmra.mxu1 %v1391_v24  ;;  %v4549_v24 = vld [vmem:[#allocation39] sm:$0xff] }
 0x6dd   : > { %1603 = vmatpush.msrb.mxu1 %v5509_v11  ;;  %v5521_v11 = vld [vmem:[#allocation294_spill] sm:$0xff] }
 0x6df   : > { %v1388_v19 = vpop.f32.mrf.mxu0  ;;  %1604 = vmatpush.msrb.mxu1 %v5510_v32  ;;  %v5523_v32 = vld [vmem:[#allocation286_spill] sm:$0xff] }
 0x6e0   : > { %v1389_v9 = vadd.f32 %v1388_v19, %v1366_v7  ;;  %v5518_v7 = vld [vmem:[#allocation306_spill] sm:$0xff] }
 0x6e1   : > { %1605 = vmatpush.msrb.mxu1 %v5511_v15  ;;  %v5522_v19 = vld [vmem:[#allocation290_spill] sm:$0xff] }
 0x6e2   : > { %v1392_v13 = vmax.f32 %v1389_v9, 0.0  ;;  %v5524_v9 = vld [vmem:[#allocation282_spill] sm:$0xff] }
 0x6e3   : > { %1606 = vmatpush.msrb.mxu1 %v5512_v22  ;;  %v5526_v15 = vld [vmem:[#allocation462_spill] sm:$0xff] }
 0x6e4   : > { %1415 = vmatmul.f32.gmra.mxu1 %v1392_v13  ;;  %v5527_v13 = vld [vmem:[#allocation458_spill] sm:$0xff] }
 0x6e5   : > { %1607 = vmatpush.msrb.mxu1 %v5513_v18  ;;  %v5528_v22 = vld [vmem:[#allocation454_spill] sm:$0xff] }
 0x6e6   : > { %v5529_v18 = vld [vmem:[#allocation450_spill] sm:$0xff] }
 0x6e7   : > { %1608 = vmatpush.msrb.mxu1 %v5514_v27  ;;  %v5530_v27 = vld [vmem:[#allocation446_spill] sm:$0xff] }
 0x6e9   : > { %1609 = vmatpush.msrb.mxu1 %v5515_v17  ;;  %v5531_v17 = vld [vmem:[#allocation442_spill] sm:$0xff] }
 0x6eb   : > { %1610 = vmatpush.msrb.mxu1 %v5516_v8  ;;  %v5532_v8 = vld [vmem:[#allocation438_spill] sm:$0xff] }
 0x6ec   : > { %1527 = vmatmul.f32.vlgmr.msra.gmra.mxu1 %v4542_v6 }
 0x6ed   : > { %1611 = vmatpush.msrb.mxu1 %v5517_v30  ;;  %v5533_v30 = vld [vmem:[#allocation434_spill] sm:$0xff] }
 0x6ef   : > { %1612 = vmatpush.msrb.mxu1 %v5518_v7  ;;  %v5534_v7 = vld [vmem:[#allocation430_spill] sm:$0xff] }
 0x6f1   : > { %1613 = vmatpush.msrb.mxu1 %v5519_v16  ;;  %v5535_v16 = vld [vmem:[#allocation426_spill] sm:$0xff] }
 0x6f3   : > { %1614 = vmatpush.msrb.mxu1 %v5520_v4  ;;  %v5536_v4 = vld [vmem:[#allocation422_spill] sm:$0xff] }
 0x6f4   : > { %1530 = vmatmul.f32.gmra.mxu1 %v4549_v24 }
 0x6f5   : > { %1615 = vmatpush.msrb.mxu1 %v5521_v11  ;;  %v5537_v11 = vld [vmem:[#allocation418_spill] sm:$0xff] }
 0x6f7   : > { %1616 = vmatpush.msrb.mxu1 %v5522_v19  ;;  %v5538_v19 = vld [vmem:[#allocation414_spill] sm:$0xff] }
 0x6f9   : > { %1617 = vmatpush.msrb.mxu1 %v5523_v32  ;;  %v5539_v32 = vld [vmem:[#allocation410_spill] sm:$0xff] }
 0x6fb   : > { %1618 = vmatpush.msrb.mxu1 %v5524_v9 }
 0x6fd   : > { %1695 = vmatpush.msra.mxu1 %v4110_v55  ;;  %v1897_v55 = vld [vmem:[#allocation35 + $0x18] sm:$0xff] (%p890_p7) }
 0x6ff   : > { %1696 = vmatpush.msra.mxu1 %v5525_v1 }
 0x701   : > { %1697 = vmatpush.msra.mxu1 %v5526_v15  ;;  %v5540_v15 = vld [vmem:[#allocation153_spill] sm:$0xff] }
 0x703   : > { %1698 = vmatpush.msra.mxu1 %v5527_v13  ;;  %v1394_v13 = vperm.slane %v5540_v15, 0  ;;  %v5548_v15 = vld [vmem:[#allocation384_spill] sm:$0xff] }
 0x705   : > { %1699 = vmatpush.msra.mxu1 %v5528_v22 }
 0x707   : > { %1700 = vmatpush.msra.mxu1 %v5529_v18 }
 0x709   : > { %1701 = vmatpush.msra.mxu1 %v5530_v27 }
 0x70b   : > { %1702 = vmatpush.msra.mxu1 %v5531_v17 }
 0x70d   : > { %1703 = vmatpush.msra.mxu1 %v5532_v8  ;;  %v5541_v8 = vld [vmem:[#allocation67_spill] sm:$0xff] }
 0x70f   : > { %1704 = vmatpush.msra.mxu1 %v5533_v30  ;;  %v5542_v30 = vld [vmem:[#allocation68_spill] sm:$0xff] }
 0x711   : > { %1705 = vmatpush.msra.mxu1 %v5534_v7  ;;  %v2108_v7 = vor.u32 %v5542_v30, %v5541_v8  ;;  %v5555_v8 = vld [vmem:[#allocation356_spill] sm:$0xff] }
 0x712   : > { %v5556_v30 = vld [vmem:[#allocation352_spill] sm:$0xff] }
 0x713   : > { %1706 = vmatpush.msra.mxu1 %v5535_v16  ;;  %v5543_v16 = vld [vmem:[#allocation404_spill] sm:$0xff] }
 0x715   : > { %1707 = vmatpush.msra.mxu1 %v5536_v4  ;;  %v5544_v4 = vld [vmem:[#allocation400_spill] sm:$0xff] }
 0x717   : > { %1708 = vmatpush.msra.mxu1 %v5537_v11  ;;  %v5545_v11 = vld [vmem:[#allocation396_spill] sm:$0xff] }
 0x719   : > { %1709 = vmatpush.msra.mxu1 %v5538_v19  ;;  %v5546_v19 = vld [vmem:[#allocation392_spill] sm:$0xff] }
 0x71b   : > { %1710 = vmatpush.msra.mxu1 %v5539_v32  ;;  %v5547_v32 = vld [vmem:[#allocation388_spill] sm:$0xff] }
 0x759   : > { %v1413_v9 = vpop.f32.mrf.mxu1 }
 0x75a   : > { %v1414_v18 = vadd.f32 %v1413_v9, %v1394_v13  ;;  %v5549_v9 = vld [vmem:[#allocation380_spill] sm:$0xff] }
 0x761   : > { %v1416_v22 = vpop.f32.mrf.mxu1 }
 0x762   : > { %v1417_v27 = vadd.f32 %v1416_v22, %v1394_v13  ;;  %v5550_v13 = vld [vmem:[#allocation376_spill] sm:$0xff] }
 0x763   : > { %v5551_v22 = vld [vmem:[#allocation372_spill] sm:$0xff] }
 0x764   : > { %v1419_v17 = vpack.c.bf16 %v1417_v27, %v1414_v18  ;;  %v5552_v18 = vld [vmem:[#allocation368_spill] sm:$0xff] }
 0x765   : > { %v5553_v27 = vld [vmem:[#allocation364_spill] sm:$0xff] }
 0x766   : > { %1435 = vmatpush.bf16.msrb.mxu2 %v1419_v17  ;;  %v5554_v17 = vld [vmem:[#allocation360_spill] sm:$0xff] }
 0x769   : > { %2109 = vmatmul.msk.bf16.vlgmr.msrb.gmra.mxu2 %vm984_vm0, %v2108_v7  ;;  %v5557_v7 = vld [vmem:[#allocation348_spill] sm:$0xff] }
 0x76a   : > { %1465 = vmatpush.msra.mxu2 %v5543_v16  ;;  %v5558_v16 = vld [vmem:[#allocation344_spill] sm:$0xff] }
 0x76c   : > { %1466 = vmatpush.msra.mxu2 %v5544_v4  ;;  %v5559_v4 = vld [vmem:[#allocation340_spill] sm:$0xff] }
 0x76e   : > { %1467 = vmatpush.msra.mxu2 %v5545_v11  ;;  %v5560_v11 = vld [vmem:[#allocation336_spill] sm:$0xff] }
 0x770   : > { %1468 = vmatpush.msra.mxu2 %v5546_v19  ;;  %v5561_v19 = vld [vmem:[#allocation332_spill] sm:$0xff] }
 0x772   : > { %1469 = vmatpush.msra.mxu2 %v5547_v32  ;;  %v5562_v32 = vld [vmem:[#allocation328_spill] sm:$0xff] }
 0x774   : > { %1470 = vmatpush.msra.mxu2 %v5548_v15  ;;  %v5563_v15 = vld [vmem:[#allocation324_spill] sm:$0xff] }
 0x776   : > { %1471 = vmatpush.msra.mxu2 %v5549_v9  ;;  %v5564_v9 = vld [vmem:[#allocation320_spill] sm:$0xff] }
 0x778   : > { %1472 = vmatpush.msra.mxu2 %v5550_v13  ;;  %v5565_v13 = vld [vmem:[#allocation316_spill] sm:$0xff] }
 0x77a   : > { %1473 = vmatpush.msra.mxu2 %v5551_v22  ;;  %v5566_v22 = vld [vmem:[#allocation312_spill] sm:$0xff] }
 0x77c   : > { %1474 = vmatpush.msra.mxu2 %v5552_v18  ;;  %v5567_v18 = vld [vmem:[#allocation308_spill] sm:$0xff] }
 0x77e   : > { %1475 = vmatpush.msra.mxu2 %v5553_v27  ;;  %v5568_v27 = vld [vmem:[#allocation304_spill] sm:$0xff] }
 0x780   : > { %1476 = vmatpush.msra.mxu2 %v5554_v17  ;;  %v5569_v17 = vld [vmem:[#allocation300_spill] sm:$0xff] }
 0x782   : > { %1477 = vmatpush.msra.mxu2 %v5555_v8  ;;  %v5570_v8 = vld [vmem:[#allocation296_spill] sm:$0xff] }
 0x784   : > { %1478 = vmatpush.msra.mxu2 %v5556_v30  ;;  %v5571_v30 = vld [vmem:[#allocation292_spill] sm:$0xff] }
 0x786   : > { %1479 = vmatpush.msra.mxu2 %v5557_v7  ;;  %v5572_v7 = vld [vmem:[#allocation288_spill] sm:$0xff] }
 0x788   : > { %1480 = vmatpush.msra.mxu2 %v5558_v16  ;;  %v5573_v16 = vld [vmem:[#allocation284_spill] sm:$0xff] }
 0x789   : > { %1481 = vmatmul.f32.vlgmr.msra.gmra.mxu2 %v4542_v6 }
 0x78a   : > { %1557 = vmatpush.msrb.mxu2 %v5559_v4  ;;  %v5574_v4 = vld [vmem:[#allocation280_spill] sm:$0xff] }
 0x78c   : > { %1558 = vmatpush.msrb.mxu2 %v5560_v11  ;;  %v5576_v11 = vld [vmem:[#allocation460_spill] sm:$0xff] }
 0x78e   : > { %1559 = vmatpush.msrb.mxu2 %v5561_v19  ;;  %v5577_v19 = vld [vmem:[#allocation456_spill] sm:$0xff] }
 0x790   : > { %1560 = vmatpush.msrb.mxu2 %v5562_v32  ;;  %v5578_v32 = vld [vmem:[#allocation452_spill] sm:$0xff] }
 0x791   : > { %1484 = vmatmul.f32.gmra.mxu2 %v4549_v24 }
 0x792   : > { %1561 = vmatpush.msrb.mxu2 %v5563_v15  ;;  %v5579_v15 = vld [vmem:[#allocation448_spill] sm:$0xff] }
 0x794   : > { %1562 = vmatpush.msrb.mxu2 %v5564_v9  ;;  %v5580_v9 = vld [vmem:[#allocation444_spill] sm:$0xff] }
 0x796   : > { %1563 = vmatpush.msrb.mxu2 %v5565_v13  ;;  %v5581_v13 = vld [vmem:[#allocation440_spill] sm:$0xff] }
 0x798   : > { %1564 = vmatpush.msrb.mxu2 %v5566_v22  ;;  %v5582_v22 = vld [vmem:[#allocation436_spill] sm:$0xff] }
 0x79a   : > { %1565 = vmatpush.msrb.mxu2 %v5567_v18  ;;  %v5583_v18 = vld [vmem:[#allocation432_spill] sm:$0xff] }
 0x79c   : > { %1566 = vmatpush.msrb.mxu2 %v5568_v27  ;;  %v5584_v27 = vld [vmem:[#allocation428_spill] sm:$0xff] }
 0x79e   : > { %1567 = vmatpush.msrb.mxu2 %v5569_v17  ;;  %v5585_v17 = vld [vmem:[#allocation424_spill] sm:$0xff] }
 0x7a0   : > { %1568 = vmatpush.msrb.mxu2 %v5570_v8  ;;  %v5586_v8 = vld [vmem:[#allocation420_spill] sm:$0xff] }
 0x7a2   : > { %1569 = vmatpush.msrb.mxu2 %v5571_v30  ;;  %v5587_v30 = vld [vmem:[#allocation416_spill] sm:$0xff] }
 0x7a4   : > { %1570 = vmatpush.msrb.mxu2 %v5572_v7  ;;  %v5588_v7 = vld [vmem:[#allocation412_spill] sm:$0xff] }
 0x7a6   : > { %1571 = vmatpush.msrb.mxu2 %v5573_v16  ;;  %v5589_v16 = vld [vmem:[#allocation408_spill] sm:$0xff] }
 0x7a8   : > { %1572 = vmatpush.msrb.mxu2 %v5574_v4 }
 0x7aa   : > { %1649 = vmatpush.msra.mxu2 %v4106_v58  ;;  %v1894_v58 = vld [vmem:[#allocation35] sm:$0xff] (%p890_p7) }
 0x7ac   : > { %1650 = vmatpush.msra.mxu2 %v5575_v3 }
 0x7ae   : > { %1651 = vmatpush.msra.mxu2 %v5576_v11 }
 0x7b0   : > { %1652 = vmatpush.msra.mxu2 %v5577_v19  ;;  %v1459_v19 = vpop.f32.mrf.mxu3 }
 0x7b2   : > { %1653 = vmatpush.msra.mxu2 %v5578_v32 }
 0x7b4   : > { %1654 = vmatpush.msra.mxu2 %v5579_v15 }
 0x7b6   : > { %1655 = vmatpush.msra.mxu2 %v5580_v9  ;;  %v1505_v9 = vpop.f32.mrf.mxu0 }
 0x7b8   : > { %1656 = vmatpush.msra.mxu2 %v5581_v13  ;;  %v1462_v13 = vpop.f32.mrf.mxu3 }
 0x7ba   : > { %1657 = vmatpush.msra.mxu2 %v5582_v22 }
 0x7bc   : > { %1658 = vmatpush.msra.mxu2 %v5583_v18 }
 0x7be   : > { %1659 = vmatpush.msra.mxu2 %v5584_v27  ;;  %v4650_v27 = vpop.f32.mrf.mxu0 }
 0x7c0   : > { %1660 = vmatpush.msra.mxu2 %v5585_v17 }
 0x7c2   : > { %1661 = vmatpush.msra.mxu2 %v5586_v8 }
 0x7c4   : > { %1662 = vmatpush.msra.mxu2 %v5587_v30 }
 0x7c6   : > { %1663 = vmatpush.msra.mxu2 %v5588_v7 }
 0x7c8   : > { %1664 = vmatpush.msra.mxu2 %v5589_v16 }
 0x7ec   : > { %v1437_v4 = vpop.f32.mrf.mxu2 }
 0x7ed   : > { %1550 = vmatmul.f32.vlgmr.msrb.gmra.mxu3 %v1437_v4  ;;  %1573 = vmatmul.f32.vlgmr.msrb.gmra.mxu2 %v1437_v4 }
 0x7ee   : > { %1596 = vmatmul.f32.vlgmr.msrb.gmra.mxu0 %v1437_v4  ;;  %1619 = vmatmul.f32.vlgmr.msrb.gmra.mxu1 %v1437_v4 }
 0x7ef   : > { %2118 = vmatpush.msrb.mxu3 %v4108_v62  ;;  %v1924_v62 = vld [vmem:[#allocation37 + $0x68] sm:$0xff] (%p890_p7) }
 0x7f1   : > { %2119 = vmatpush.msrb.mxu3 %v5187_v2 }
 0x7f3   : > { %2120 = vmatpush.msrb.mxu3 %v5494_v5  ;;  %v1728_v5 = vperm.slane %v4113_v57, 1 }
 0x7f4   : > { %v1439_v11 = vpop.f32.mrf.mxu2 }
 0x7f5   : > { %2121 = vmatpush.msrb.mxu3 %v5495_v12  ;;  %1576 = vmatmul.f32.gmra.mxu2 %v1439_v11  ;;  %v1727_v12 = vperm.slane %v4113_v57, 0 }
 0x7f6   : > { %1553 = vmatmul.f32.gmra.mxu3 %v1439_v11  ;;  %1599 = vmatmul.f32.gmra.mxu0 %v1439_v11 }
 0x7f7   : > { %1622 = vmatmul.f32.gmra.mxu1 %v1439_v11  ;;  %2122 = vmatpush.msrb.mxu3 %v5496_v20 }
 0x7f9   : > { %2123 = vmatpush.msrb.mxu3 %v5497_v10 }
 0x7fb   : > { %2124 = vmatpush.msrb.mxu3 %v5498_v61  ;;  %v1922_v61 = vld [vmem:[#allocation37 + $0x58] sm:$0xff] (%p890_p7) }
 0x7fd   : > { %2125 = vmatpush.msrb.mxu3 %v5499_v0  ;;  %1665 = vmatmul.f32.vlgmr.msra.gmra.mxu2 %v4549_v24  ;;  %v1730_v0 = vperm.slane %v4113_v57, 3 }
 0x7fe   : > { %1642 = vmatmul.f32.vlgmr.msra.gmra.mxu3 %v4549_v24  ;;  %1688 = vmatmul.f32.vlgmr.msra.gmra.mxu0 %v4549_v24 }
 0x7ff   : > { %1711 = vmatmul.f32.vlgmr.msra.gmra.mxu1 %v4549_v24  ;;  %2126 = vmatpush.msrb.mxu3 %v5500_v28  ;;  %v1528_v24 = vpop.f32.mrf.mxu1 }
 0x800   :  { %1987 = vmatpush.msra.mxu2 (%p890_p7), %v1926_v59 }
 0x801   : > { %2127 = vmatpush.msrb.mxu3 %v5501_v29 }
 0x802   :  { %1988 = vmatpush.msra.mxu2 (%p890_p7), %v1925_v60 }
 0x803   : > { %2128 = vmatpush.msrb.mxu3 %v5502_v31 }
 0x804   :  { %1989 = vmatpush.msra.mxu2 (%p890_p7), %v1924_v62 }
 0x805   : > { %2129 = vmatpush.msrb.mxu3 %v5503_v21  ;;  %1668 = vmatmul.f32.gmra.mxu2 %v4542_v6 }
 0x806   : > { %1645 = vmatmul.f32.gmra.mxu3 %v4542_v6  ;;  %1990 = vmatpush.msra.mxu2 (%p890_p7), %v1923_v63 }
 0x807   : > { %1714 = vmatmul.f32.gmra.mxu1 %v4542_v6  ;;  %2130 = vmatpush.msrb.mxu3 %v5504_v14  ;;  %v1531_v15 = vpop.f32.mrf.mxu1 }
 0x808   :  { %1991 = vmatpush.msra.mxu2 (%p890_p7), %v1922_v61 }
 0x809   : > { %2131 = vmatpush.msrb.mxu3 %v5505_v26 }
 0x80b   : > { %2132 = vmatpush.msrb.mxu3 %v5506_v25 }
 0x80c   : > { %v1482_v32 = vpop.f32.mrf.mxu2 }
 0x80d   : > { %2133 = vmatpush.msrb.mxu3 %v5507_v23 }
 0x80e   : > { %1691 = vmatmul.f32.vlgmr.msrb.gmra.mxu3 %v4542_v6 }
 0x814   : > { %v1485_v22 = vpop.f32.mrf.mxu2 }
 0x86b   : > { %v1620_v18 = vpop.f32.mrf.mxu1  ;;  %v1597_v4 = vpop.f32.mrf.mxu0 }
 0x86c   : > { %v1621_v11 = vadd.f32 %v1620_v18, %v1528_v24 }
 0x870   : > { %v1551_v17 = vpop.f32.mrf.mxu3  ;;  %v1574_v8 = vpop.f32.mrf.mxu2 }
 0x871   : > { %v1575_v2 = vadd.f32 %v1574_v8, %v1482_v32  ;;  %v1552_v10 = vadd.f32 %v1551_v17, %v1459_v19 }
 0x873   : > { %v1600_v24 = vpop.f32.mrf.mxu0 }
 0x874   : > { %v1623_v30 = vpop.f32.mrf.mxu1 }
 0x875   : > { %v1624_v26 = vadd.f32 %v1623_v30, %v1531_v15 }
 0x878   : > { %v1577_v7 = vpop.f32.mrf.mxu2 }
 0x879   : > { %v1554_v16 = vpop.f32.mrf.mxu3 }
 0x87a   : > { %v1555_v19 = vadd.f32 %v1554_v16, %v1462_v13 }
 0x87c   : > { %v1712_v6 = vpop.f32.mrf.mxu1 }
 0x87d   : > { %v1721_v1 = vadd.f32 %v1712_v6, %v1621_v11 }
 0x87f   : > { %v1738_v3 = vadd.f32 %v1730_v0, %v1721_v1  ;;  %v1578_v1 = vadd.f32 %v1577_v7, %v1485_v22  ;;  %v1729_v22 = vperm.slane %v4113_v57, 2  ;;  %v1895_v57 = vld [vmem:[#allocation35 + $0x8] sm:$0xff] (%p890_p7) }
 0x880   : > { %v1666_v14 = vpop.f32.mrf.mxu2 }
 0x881   : > { %v2114_v20 = vmul.f32 -1.442695, %v1738_v3  ;;  %v1643_v21 = vpop.f32.mrf.mxu3  ;;  %v1719_v23 = vadd.f32 %v1666_v14, %v1575_v2 }
 0x882   : > { %v1718_v25 = vadd.f32 %v1643_v21, %v1552_v10 }
 0x883   : > { %2252 = vpow2.f32 %v2114_v20  ;;  %v1736_v28 = vadd.f32 %v1728_v5, %v1719_v23 }
 0x884   : > { %v1735_v18 = vadd.f32 %v1727_v12, %v1718_v25  ;;  %v1715_v29 = vpop.f32.mrf.mxu1 }
 0x885   : > { %v2112_v31 = vmul.f32 -1.442695, %v1736_v28  ;;  %v1725_v11 = vadd.f32 %v1715_v29, %v1624_v26  ;;  %v1689_v26 = vpop.f32.mrf.mxu0 }
 0x886   : > { %v2110_v32 = vmul.f32 -1.442695, %v1735_v18 }
 0x887   : > { %2254 = vpow2.f32 %v2112_v31  ;;  %v1742_v8 = vadd.f32 %v1730_v0, %v1725_v11  ;;  %v1598_v31 = vadd.f32 %v1597_v4, %v1505_v9 }
 0x888   : > { %2256 = vpow2.f32 %v2110_v32  ;;  %v1669_v17 = vpop.f32.mrf.mxu2 }
 0x889   : > { %v2253_v6 = vpop.eup %2252  ;;  %v2115_v3 = vmul.f32 -1.442695, %v1742_v8  ;;  %v1646_v33 = vpop.f32.mrf.mxu3  ;;  %v1723_v2 = vadd.f32 %v1669_v17, %v1578_v1  ;;  %v1720_v13 = vadd.f32 %v1689_v26, %v1598_v31  ;;  %v1601_v8 = vadd.f32 %v1600_v24, %v4650_v27 }
 0x88a   : > { %v4655_v10 = vadd.f32 1.0, %v2253_v6  ;;  %v1722_v20 = vadd.f32 %v1646_v33, %v1555_v19 }
 0x88b   : > { %v1740_v21 = vadd.f32 %v1728_v5, %v1723_v2  ;;  %2258 = vpow2.f32 %v2115_v3  ;;  %v1737_v30 = vadd.f32 %v1729_v22, %v1720_v13 }
 0x88c   : > { %v1739_v25 = vadd.f32 %v1727_v12, %v1722_v20  ;;  %2260 = vrcp.f32 %v4655_v10  ;;  %vm1836_vm14 = vweird.f32 %v4655_v10 }
 0x88d   : > { %v2255_v14 = vpop.eup %2254  ;;  %v2113_v28 = vmul.f32 -1.442695, %v1740_v21 }
 0x88e   : > { %v2257_v29 = vpop.eup %2256  ;;  %v1789_v0 = vadd.f32 1.0, %v2255_v14  ;;  %v2111_v15 = vmul.f32 -1.442695, %v1739_v25 }
 0x88f   : > { %v1751_v23 = vadd.f32 1.0, %v2257_v29  ;;  %2262 = vpow2.f32 %v2113_v28 }
 0x890   : > { %2264 = vrcp.f32 %v1789_v0  ;;  %v1800_v2 = vand.u32 2147483647, %v1789_v0  ;;  %v1802_v20 = vand.u32 2147483648, %v1789_v0  ;;  %vm1796_vm11 = vweird.f32 %v1789_v0 }
 0x891   : > { %2266 = vrcp.f32 %v1751_v23  ;;  %v2259_v33 = vpop.eup %2258  ;;  %v1762_v3 = vand.u32 2147483647, %v1751_v23  ;;  %v1692_v21 = vpop.f32.mrf.mxu3  ;;  %v1764_v14 = vand.u32 2147483648, %v1751_v23  ;;  %vm1758_vm12 = vweird.f32 %v1751_v23 }
 0x892   : > { %2268 = vpow2.f32 %v2111_v15  ;;  %v4659_v5 = vpop.eup %2260  ;;  %v4663_v9 = vadd.f32 1.0, %v2259_v33  ;;  %v1724_v24 = vadd.f32 %v1692_v21, %v1601_v8  ;;  %v1743_v15 = vld [vmem:[#allocation2] sm:$0xff]  ;;  %v1803_v13 = vor.u32 1.1754944e-38, %v1802_v20 }
 0x893   : > { %v1832_v32 = vmul.f32 %v4659_v5, %v4655_v10  ;;  %vm1801_vm1 = vcmp.eq.f32.partialorder %v1800_v2, 8.507059e+37  ;;  %vm1763_vm2 = vcmp.eq.f32.partialorder %v1762_v3, 8.507059e+37  ;;  %v1840_v21 = vand.u32 2147483647, %v4655_v10 }
 0x894   : > { %vm1837_vm4 = vweird.f32 %v4659_v5 }
 0x895   : > { %v2263_v12 = vpop.eup %2262  ;;  %v1833_v28 = vsub.f32 1.0, %v1832_v32  ;;  %vm4694_vm9 = vmor %vm1836_vm14, %vm1837_vm4  ;;  %vm1851_vm14 = vweird.f32 %v4663_v9 }
 0x896   : > { %v2265_v7 = vpop.eup %2264  ;;  %v4661_v16 = vadd.f32 1.0, %v2263_v12  ;;  %v1765_v12 = vor.u32 1.1754944e-38, %v1764_v14  ;;  %v1842_v14 = vand.u32 2147483648, %v4655_v10 }
 0x897   : > { %v2267_v18 = vpop.eup %2266  ;;  %v1792_v11 = vmul.f32 %v2265_v7, %v1789_v0  ;;  %vm1797_vm0 = vweird.f32 %v2265_v7 }
 0x898   : > { %v2269_v4 = vpop.eup %2268  ;;  %v1754_v1 = vmul.f32 %v2267_v18, %v1751_v23  ;;  %2270 = vrcp.f32 %v4661_v16  ;;  %vm1759_vm10 = vweird.f32 %v2267_v18  ;;  %vm1798_vm13 = vmor %vm1796_vm11, %vm1797_vm0  ;;  %v1817_v2 = vand.u32 2147483648, %v4661_v16 }
 0x899   : > { %2272 = vtanh.f32 %v1737_v30  ;;  %v1793_v19 = vsub.f32 1.0, %v1792_v11  ;;  %v4669_v17 = vadd.f32 1.0, %v2269_v4  ;;  %vm1760_vm15 = vmor %vm1758_vm12, %vm1759_vm10  ;;  %v1834_v4 = vmul.f32 %v4659_v5, %v1833_v28 }
 0x89a   : > { %v1755_v6 = vsub.f32 1.0, %v1754_v1  ;;  %2274 = vrcp.f32 %v4663_v9  ;;  %vm1811_vm5 = vweird.f32 %v4661_v16  ;;  %vm1841_vm11 = vcmp.eq.f32.partialorder %v1840_v21, 8.507059e+37 }
 0x89b   : > { %v1794_v25 = vmul.f32 %v2265_v7, %v1793_v19  ;;  %2276 = vrcp.f32 %v4669_v17  ;;  %vm1773_vm0 = vweird.f32 %v4669_v17 }
 0x89c   : > { %v1756_v29 = vmul.f32 %v2267_v18, %v1755_v6  ;;  %v1741_v6 = vadd.f32 %v1729_v22, %v1724_v24 }
 0x89d   : > { %v1795_v27 = vadd.f32 %v2265_v7, %v1794_v25 }
 0x89e   : > { %v2271_v26 = vpop.eup %2270  ;;  %v1757_v31 = vadd.f32 %v2267_v18, %v1756_v29  ;;  %v1835_v29 = vadd.f32 %v4659_v5, %v1834_v4  ;;  %2278 = vtanh.f32 %v1741_v6 }
 0x89f   : > { %v2273_v33 = vpop.eup %2272  ;;  %v1799_v30 = vsel %vm1798_vm13, %v2265_v7, %v1795_v27  ;;  %v1807_v11 = vmul.f32 %v2271_v26, %v4661_v16  ;;  %vm1812_vm3 = vweird.f32 %v2271_v26 }
 0x8a0   : > { %v1761_v32 = vsel %vm1760_vm15, %v2267_v18, %v1757_v31  ;;  %v1804_v0 = vsel %vm1801_vm1, %v1803_v13, %v1799_v30  ;;  %v4676_v1 = vpop.eup %2274  ;;  %v1815_v18 = vand.u32 2147483647, %v4661_v16  ;;  %vm1813_vm6 = vmor %vm1811_vm5, %vm1812_vm3  ;;  %v1818_v31 = vor.u32 1.1754944e-38, %v1817_v2  ;;  %v1907_v16 = vld [vmem:[#allocation35 + $0x68] sm:$0xff] (%p890_p7) }
 0x8a1   : > { %v1766_v23 = vsel %vm1763_vm2, %v1765_v12, %v1761_v32  ;;  %v1861_v8 = vmul.f32 %v1804_v0, %v1743_v15  ;;  %v1808_v19 = vsub.f32 1.0, %v1807_v11  ;;  %v2277_v20 = vpop.eup %2276  ;;  %v1847_v22 = vmul.f32 %v4676_v1, %v4663_v9  ;;  %v1744_v11 = vld [vmem:[#allocation2 + $0x8] sm:$0xff] }
 0x8a2   : > { %v1863_v7 = vmul.f32 %v2273_v33, %v1766_v23  ;;  %v1769_v25 = vmul.f32 %v2277_v20, %v4669_v17  ;;  %v1777_v15 = vand.u32 2147483647, %v4669_v17  ;;  %v1779_v13 = vand.u32 2147483648, %v4669_v17 }
 0x8a3   : > { %v1809_v28 = vmul.f32 %v2271_v26, %v1808_v19  ;;  %vm1774_vm7 = vweird.f32 %v2277_v20  ;;  %vm1816_vm8 = vcmp.eq.f32.partialorder %v1815_v18, 8.507059e+37  ;;  %v1848_v30 = vsub.f32 1.0, %v1847_v22 }
 0x8a4   : > { %v1865_v3 = vadd.f32 %v1863_v7, %v1861_v8  ;;  %v1770_v27 = vsub.f32 1.0, %v1769_v25  ;;  %v1839_v32 = vsel %vm4694_vm9, %v4659_v5, %v1835_v29  ;;  %vm1775_vm10 = vmor %vm1773_vm0, %vm1774_vm7  ;;  %v1780_v23 = vor.u32 1.1754944e-38, %v1779_v13  ;;  %v2279_v8 = vpop.eup %2278  ;;  %v1909_v13 = vld [vmem:[#allocation35 + $0x78] sm:$0xff] (%p890_p7) }
 0x8a5   : > { %v1810_v24 = vadd.f32 %v2271_v26, %v1809_v28  ;;  %vm1778_vm12 = vcmp.eq.f32.partialorder %v1777_v15, 8.507059e+37  ;;  %v1849_v2 = vmul.f32 %v4676_v1, %v1848_v30  ;;  %vm1852_vm13 = vweird.f32 %v4676_v1  ;;  %v1888_v15 = vld [vmem:[#allocation34 + $0x58] sm:$0xff] (%p890_p7)  ;;  %1959 = vmatpush.msra.mxu1 (%p890_p7), %v1909_v13  ;;  %v1921_v30 = vld [vmem:[#allocation37 + $0x50] sm:$0xff] (%p890_p7) }
 0x8a6   : > { %2280 = vtanh.f32 %v1865_v3  ;;  %1873 = vst [vmem:[#allocation2] sm:$0xff] %v1865_v3  ;;  %v1771_v33 = vmul.f32 %v2277_v20, %v1770_v27  ;;  %v1857_v17 = vand.u32 2147483648, %v4663_v9  ;;  %vm1853_vm15 = vmor %vm1851_vm14, %vm1852_vm13  ;;  %1992 = vmatpush.msra.mxu2 (%p890_p7), %v1921_v30 }
 0x8a7   : > { %v1814_v12 = vsel %vm1813_vm6, %v2271_v26, %v1810_v24  ;;  %v1843_v26 = vor.u32 1.1754944e-38, %v1842_v14  ;;  %v1850_v3 = vadd.f32 %v4676_v1, %v1849_v2  ;;  %v1892_v24 = vld [vmem:[#allocation34 + $0x78] sm:$0xff] (%p890_p7) }
 0x8a8   : > { %v1819_v4 = vsel %vm1816_vm8, %v1818_v31, %v1814_v12  ;;  %v1772_v0 = vadd.f32 %v2277_v20, %v1771_v33  ;;  %v1858_v14 = vor.u32 1.1754944e-38, %v1857_v17  ;;  %v1891_v31 = vld [vmem:[#allocation34 + $0x70] sm:$0xff] (%p890_p7)  ;;  %1931 = vmatpush.msra.mxu0 (%p890_p7), %v1892_v24  ;;  %2134 = vmatpush.msra.mxu3 (%p890_p7), %v1892_v24 }
 0x8a9   : > { %v1862_v19 = vmul.f32 %v1819_v4, %v1744_v11  ;;  %v1844_v7 = vsel %vm1841_vm11, %v1843_v26, %v1839_v32  ;;  %v1854_v21 = vsel %vm1853_vm15, %v4676_v1, %v1850_v3  ;;  %v1889_v1 = vld [vmem:[#allocation34 + $0x60] sm:$0xff] (%p890_p7)  ;;  %v1908_v33 = vld [vmem:[#allocation35 + $0x70] sm:$0xff] (%p890_p7)  ;;  %v1920_v11 = vld [vmem:[#allocation37 + $0x48] sm:$0xff] (%p890_p7) }
 0x8aa   : > { %v1776_v10 = vsel %vm1775_vm10, %v2277_v20, %v1772_v0  ;;  %v1855_v20 = vand.u32 2147483647, %v4663_v9  ;;  %v1890_v9 = vld [vmem:[#allocation34 + $0x68] sm:$0xff] (%p890_p7)  ;;  %1932 = vmatpush.msra.mxu0 (%p890_p7), %v1891_v31  ;;  %2135 = vmatpush.msra.mxu3 (%p890_p7), %v1891_v31  ;;  %v1887_v12 = vld [vmem:[#allocation34 + $0x50] sm:$0xff] (%p890_p7)  ;;  %v1919_v4 = vld [vmem:[#allocation37 + $0x40] sm:$0xff] (%p890_p7) }
 0x8ab   : > { %v1781_v25 = vsel %vm1778_vm12, %v1780_v23, %v1776_v10  ;;  %1960 = vmatpush.msra.mxu1 (%p890_p7), %v1908_v33  ;;  %1993 = vmatpush.msra.mxu2 (%p890_p7), %v1920_v11  ;;  %v1918_v32 = vld [vmem:[#allocation37 + $0x38] sm:$0xff] (%p890_p7)  ;;  %v2286_v0 = vld [vmem:[%s5592_s2] ss:$0 sm:$0xff] (%p890_p7)  ;;  %v1916_v23 = vld [vmem:[#allocation37 + $0x28] sm:$0xff] (%p890_p7) }
 0x8ac   : > { %v2281_v6 = vpop.eup %2280  ;;  %v1864_v18 = vmul.f32 %v2279_v8, %v1781_v25  ;;  %vm1856_vm1 = vcmp.eq.f32.partialorder %v1855_v20, 8.507059e+37  ;;  %1933 = vmatpush.msra.mxu0 (%p890_p7), %v1890_v9  ;;  %2136 = vmatpush.msra.mxu3 (%p890_p7), %v1890_v9  ;;  %v1917_v26 = vld [vmem:[#allocation37 + $0x30] sm:$0xff] (%p890_p7)  ;;  %v1911_v3 = vld [vmem:[#allocation37] sm:$0xff] (%p890_p7) }
 0x8ad   : > { %v1869_v28 = vmul.f32 %v2281_v6, %v1844_v7  ;;  %v1859_v29 = vsel %vm1856_vm1, %v1858_v14, %v1854_v21  ;;  %1961 = vmatpush.msra.mxu1 (%p890_p7), %v1907_v16  ;;  %1994 = vmatpush.msra.mxu2 (%p890_p7), %v1919_v4  ;;  %v1914_v7 = vld [vmem:[#allocation37 + $0x18] sm:$0xff] (%p890_p7)  ;;  %v2287_v17 = vld [vmem:[%s5593_s29] ss:$0 sm:$0xff] (%p890_p7) }
 0x8ae   : > { %v1866_v5 = vadd.f32 %v1864_v18, %v1862_v19  ;;  %1934 = vmatpush.msra.mxu0 (%p890_p7), %v1889_v1  ;;  %2137 = vmatpush.msra.mxu3 (%p890_p7), %v1889_v1  ;;  %v1915_v19 = vld [vmem:[#allocation37 + $0x20] sm:$0xff] (%p890_p7)  ;;  %v1913_v18 = vld [vmem:[#allocation37 + $0x10] sm:$0xff] (%p890_p7) }
 0x8af   : > { %1871 = vst [vmem:[#allocation39] sm:$0xff] %v1869_v28  ;;  %1962 = vmatpush.msra.mxu1 (%p890_p7), %v1906_v35  ;;  %1995 = vmatpush.msra.mxu2 (%p890_p7), %v1918_v32 }
 0x8b0   : > { %2282 = vtanh.f32 %v1866_v5  ;;  %1874 = vst [vmem:[#allocation2 + $0x8] sm:$0xff] %v1866_v5  ;;  %1935 = vmatpush.msra.mxu0 (%p890_p7), %v1888_v15  ;;  %2138 = vmatpush.msra.mxu3 (%p890_p7), %v1888_v15  ;;  %v1912_v5 = vld [vmem:[#allocation37 + $0x8] sm:$0xff] (%p890_p7) }
 0x8b1   :  { %1963 = vmatpush.msra.mxu1 (%p890_p7), %v1905_v37  ;;  %1996 = vmatpush.msra.mxu2 (%p890_p7), %v1917_v26 }
 0x8b2   :  { %1936 = vmatpush.msra.mxu0 (%p890_p7), %v1887_v12  ;;  %2139 = vmatpush.msra.mxu3 (%p890_p7), %v1887_v12 }
 0x8b3   :  { %1964 = vmatpush.msra.mxu1 (%p890_p7), %v1904_v39  ;;  %1997 = vmatpush.msra.mxu2 (%p890_p7), %v1916_v23 }
 0x8b4   :  { %1937 = vmatpush.msra.mxu0 (%p890_p7), %v1886_v34  ;;  %2140 = vmatpush.msra.mxu3 (%p890_p7), %v1886_v34 }
 0x8b5   :  { %892 = sbr.rel (!%p890_p7) target bundleno = 742 (0x2e6), region = 265  ;;  %1965 = vmatpush.msra.mxu1 (%p890_p7), %v1903_v41  ;;  %1998 = vmatpush.msra.mxu2 (%p890_p7), %v1915_v19 }
 0x8b6   : > { %v2283_v22 = vpop.eup %2282  ;;  %1938 = vmatpush.msra.mxu0 (%p890_p7), %v1885_v36  ;;  %2141 = vmatpush.msra.mxu3 (%p890_p7), %v1885_v36  ;;  %v1875_v53 = vld [vmem:[#allocation39] sm:$0xff] (%p890_p7) }
 0x8b7   : > { %v1870_v27 = vmul.f32 %v2283_v22, %v1859_v29  ;;  %1966 = vmatpush.msra.mxu1 (%p890_p7), %v1902_v43  ;;  %1999 = vmatpush.msra.mxu2 (%p890_p7), %v1914_v7 }
 0x8b8   :  { %1939 = vmatpush.msra.mxu0 (%p890_p7), %v1884_v38  ;;  %2142 = vmatpush.msra.mxu3 (%p890_p7), %v1884_v38 }
 0x8b9   : > { %1872 = vst [vmem:[#allocation39 + $0x8] sm:$0xff] %v1870_v27  ;;  %1967 = vmatpush.msra.mxu1 (%p890_p7), %v1901_v45  ;;  %2000 = vmatpush.msra.mxu2 (%p890_p7), %v1913_v18 }
 0x8ba   :  { %1940 = vmatpush.msra.mxu0 %v1883_v40  ;;  %2143 = vmatpush.msra.mxu3 %v1883_v40 }
 0x8bb   :  { %1968 = vmatpush.msra.mxu1 %v1900_v47  ;;  %2001 = vmatpush.msra.mxu2 %v1912_v5 }
 0x8bc   :  { %1941 = vmatpush.msra.mxu0 %v1882_v42  ;;  %2144 = vmatpush.msra.mxu3 %v1882_v42 }
 0x8bd   :  { %1969 = vmatpush.msra.mxu1 %v1899_v49  ;;  %2002 = vmatpush.msra.mxu2 %v1911_v3 }
 0x8be   :  { %1942 = vmatpush.msra.mxu0 %v1881_v44  ;;  %2145 = vmatpush.msra.mxu3 %v1881_v44 }
 0x8bf   :  { %1970 = vmatpush.msra.mxu1 %v1898_v51 }
 0x8c0   :  { %1943 = vmatpush.msra.mxu0 %v1880_v46  ;;  %2146 = vmatpush.msra.mxu3 %v1880_v46  ;;  %v1876_v54 = vld [vmem:[#allocation39 + $0x8] sm:$0xff] }
 0x8c1   :  { %1971 = vmatpush.msra.mxu1 %v1897_v55 }
 0x8c2   :  { %1944 = vmatpush.msra.mxu0 %v1879_v48  ;;  %2147 = vmatpush.msra.mxu3 %v1879_v48 }
 0x8c3   :  { %1972 = vmatpush.msra.mxu1 %v1896_v56 }
 0x8c4   :  { %1945 = vmatpush.msra.mxu0 %v1878_v50  ;;  %2148 = vmatpush.msra.mxu3 %v1878_v50 }
 0x8c5   :  { %1973 = vmatpush.msra.mxu1 %v1895_v57 }
 0x8c6   :  { %1946 = vmatpush.msra.mxu0 %v1877_v52  ;;  %2149 = vmatpush.msra.mxu3 %v1877_v52 }
 0x8c7   :  { %1947 = vmatmul.f32.vlgmr.msra.gmra.mxu0 %v1875_v53  ;;  %1950 = vmatmul.f32.vlgmr.msra.gmra.mxu3 %v1876_v54 }
 0x8c8   :  { %1974 = vmatpush.msra.mxu1 %v1894_v58 }
 0x944   :  { %v1948_v8 = vpop.f32.mrf.mxu0 }
 0x945   :  { %v1949_v10 = vadd.f32 %v2286_v0, %v1948_v8 }
 0x947   :  { %v1954_v6 = vmax.f32 %v1949_v10, 0.0 }
 0x949   :  { %1975 = vmatmul.f32.vlgmr.msra.gmra.mxu1 %v1954_v6 }
 0x94a   :  { %v1951_v2 = vpop.f32.mrf.mxu3 }
 0x94b   :  { %v1952_v25 = vadd.f32 %v2286_v0, %v1951_v2 }
 0x94d   :  { %v1955_v28 = vmax.f32 %v1952_v25, 0.0 }
 0x951   :  { %1978 = vmatmul.f32.gmra.mxu1 %v1955_v28 }
 0x9c6   :  { %v1976_v20 = vpop.f32.mrf.mxu1 }
 0x9c7   :  { %v1977_v21 = vadd.f32 %v2287_v17, %v1976_v20 }
 0x9c9   :  { %v1982_v14 = vmax.f32 %v1977_v21, 0.0 }
 0x9cb   :  { %2003 = vmatmul.f32.vlgmr.msra.gmra.mxu2 %v1982_v14 }
 0x9ce   :  { %v1979_v22 = vpop.f32.mrf.mxu1 }
 0x9cf   :  { %v1980_v29 = vadd.f32 %v2287_v17, %v1979_v22 }
 0x9d1   :  { %v1983_v27 = vmax.f32 %v1980_v29, 0.0 }
 0x9d3   :  { %2006 = vmatmul.f32.gmra.mxu2 %v1983_v27 }
 0x9d4   :  { %2816 = shalt.err (!%p2813_p12)
}
 0x9d5   :  { %2037 = dma.vmem_to_hbm [thread:$0]  %s2030_s0, 256, %s2032_s20, [#allocation40], %s2913_s7, %s2913_s7, %s2914_s9  }
 0x9d6   :  { %v2288_v24 = vld [vmem:[%s3083_s24] ss:$0 sm:$0xff]  ;;  %s2934_s1 = smov [#allocation38]   ;;  %s2018_s30 = sshll.u32 %s3088_s8, 4  ;;  %s2019_s30 = int_to_ptr.hbm [resolvable:$true] %s2018_s30 }
 0x9d7   :  { %s2016_s25 = sshll.u32 %s2934_s1, 4  ;;  %s2829_s6 = sshra.s32 %s2019_s30, 4  ;;  %s2017_s25 = int_to_ptr.vmem [resolvable:$true] %s2016_s25  ;;  %s2830_s6 = int_to_ptr.hbm [resolvable:$true] %s2829_s6 }
 0x9d8   :  { %s2831_s22 = scalar_lea.hbm %s2830_s6, 16  ;;  %s2833_s13 = scalar_lea.hbm %s3088_s8, 16 }
 0x9d9   :  { %p2832_p13 = scmp.ne.s32.totalorder %s2830_s6, %s2831_s22  ;;  %p2834_p0 = scmp.lt.s32.totalorder %s2830_s6, %s3088_s8 }
 0x9da   :  { %p2835_p1 = scmp.lt.s32.totalorder %s2833_s13, %s2831_s22 }
 0x9dc   :  { %p2836_p2 = por %p2835_p1, %p2834_p0 }
 0x9de   :  { %p2837_p3 = pnand %p2836_p2, %p2832_p13 }
 0xa4e   :  { %v2004_v31 = vpop.f32.mrf.mxu2 }
 0xa4f   :  { %v2005_v9 = vadd.f32 %v2288_v24, %v2004_v31 }
 0xa51   :  { %2010 = vst [vmem:[#allocation38] sm:$0xff] %v2005_v9 }
 0xa56   :  { %v2007_v1 = vpop.f32.mrf.mxu2 }
 0xa57   :  { %v2008_v15 = vadd.f32 %v2288_v24, %v2007_v1 }
 0xa59   :  { %2011 = vst [vmem:[#allocation38 + $0x8] sm:$0xff] %v2008_v15 }
 0xa5a   :  { %2840 = shalt.err (!%p2837_p3)
}
 0xa5b   :  { %2024 = dma.vmem_to_hbm [thread:$0]  %s2017_s25, 256, %s2019_s30, [#allocation7], %s2913_s7, %s2913_s7, %s2914_s9  }
 0xa5c   :  { %2867 = dma.done.wait [#allocation7], 256  }
 0xa5d   :  { %2868 = vsyncadd [#allocation7], 4294967040 }
 0xa5e   :  { %2869 = dma.done.wait [#allocation40], 256  }
 0xa5f   :  { %2870 = vsyncadd [#allocation40], 4294967040 }
 0xa60   :  { %2046 = vsyncpa [#allocation6], 1 }
 0xa61   :  { %2047 = vsyncpa [#allocation9], 1 }
 0xa62   :  { %2048 = vsyncpa [#allocation12], 1 }
 0xa63   :  { %2049 = vsyncpa [#allocation15], 1 }
 0xa64   :  { %2050 = vsyncpa [#allocation18], 1 }
 0xa65   :  { %2051 = vsyncpa [#allocation21], 1 }
 0xa66   :  { %2052 = vsyncpa [#allocation24], 1 }
 0xa67   :  { %2053 = vsyncpa [#allocation27], 1 }
 0xa68   :  { %2054 = vsyncpa [#allocation30], 1 }
 0xa69   :  { %2055 = vsyncpa [#allocation33], 1 }
 0xa6a   :  { %2056 = vsyncpa [#allocation36], 1 }
 0xa6b   :  { %2057 = vsyncpa [#allocation7], 1 }
 0xa6c   :  { %2058 = vsyncpa [#allocation40], 1 }

</bundles_post_ra>
